<compile_context>
chip_gen: v5e
topology: v5e:2x2
jax: 0.10.0
libtpu: 0.0.40
codegen_flags: <defaults>
</compile_context>

<pallas_src>
import functools
import numpy as np
import jax
import jax.numpy as jnp
from jax import lax
from jax.experimental import pallas as pl
from jax.experimental.pallas import tpu as pltpu

PAIR_TILE = 512     # edge-channel pairs processed per grid step (multiple of 128)
M_BLK = 512         # output lanes (square bins) per output block (multiple of 128)
SOFT_EPS = 1e-12    # eps used by softAbs


def disk_map(n_bins):
    """Same as the torch diskMap(): maps (2*nB+1)^2 square bins -> disk bins."""
    w = 2 * n_bins + 1
    ind = []
    for i in range(w):
        for j in range(w):
            if (i - n_bins) ** 2 + (j - n_bins) ** 2 <= (n_bins + 0.25) ** 2:
                ind.append(w * i + j)
    dmap = np.zeros(w * w, dtype=np.int32)
    dmap[np.asarray(ind, dtype=np.int64)] = np.arange(len(ind), dtype=np.int32)
    return dmap, len(ind)


def _round_up(a, b):
    return ((a + b - 1) // b) * b


def _echo_kernel(pf_ref, base_ref, acc_ref, *, n_bins, m_blk):
    """One (m_block, pair_tile) grid step.

    pf_ref   : (8, TILE)    f32  rows = [x.re, x.im, ln.re, ln.im, w.re, w.im, 0, 0]
    base_ref : (1, TILE)    i32  per-pair flat base = C*w2*tgt + w2*c
    acc_ref  : (2, M_BLK)   f32  resident output block, rows = [re, im]
    """
    mb = pl.program_id(0)
    t = pl.program_id(1)

    @pl.when(t == 0)
    def _():
        acc_ref[...] = jnp.zeros_like(acc_ref)

    w = 2 * n_bins + 1
    nBf = float(n_bins)
    nBi = int(n_bins)
    tile = pf_ref.shape[1]

    # Lane-major per-pair fields: (1, TILE) rows, all 128 lanes active.
    x_re = pf_ref[0:1, :]
    x_im = pf_ref[1:2, :]
    ln_re = pf_ref[2:3, :]
    ln_im = pf_ref[3:4, :]
    w_re = pf_ref[4:5, :]
    w_im = pf_ref[5:6, :]
    base = base_ref[...]                                  # (1, TILE) int32

    # isOrigin mask (also kills zero-padded pairs past the real pair count).
    is_origin = jnp.logical_and(x_re == 0.0, x_im == 0.0)

    # conj(polar(1, softAngle(x))) == conj(x) * rsqrt(|x|^2)  (EUP rsqrt;
    # origin pairs masked by the where).
    sq = x_re * x_re + x_im * x_im
    inv = jnp.where(is_origin, 0.0, lax.rsqrt(sq))
    cu_re = x_re * inv
    cu_im = -x_im * inv

    # aligned = ln * conj(unit(x)), scaled by n_bins (rasterize does p * nB).
    p0 = (ln_re * cu_re - ln_im * cu_im) * nBf
    p1 = (ln_re * cu_im + ln_im * cu_re) * nBf

    pC0 = jnp.clip(jnp.ceil(p0), -nBf, nBf)
    pC1 = jnp.clip(jnp.ceil(p1), -nBf, nBf)
    pF0 = jnp.clip(jnp.floor(p0), -nBf, nBf)
    pF1 = jnp.clip(jnp.floor(p1), -nBf, nBf)

    rast0 = (pC0 - p0) * (pC1 - p1)
    rast1 = (p0 - pF0) * (p1 - pF1)
    rast2 = (p0 - pF0) * (pC1 - p1)
    rast3 = (pC0 - p0) * (p1 - pF1)

    pC0i = pC0.astype(jnp.int32)
    pC1i = pC1.astype(jnp.int32)
    pF0i = pF0.astype(jnp.int32)
    pF1i = pF1.astype(jnp.int32)

    # Flat square-grid scatter targets per corner (same corner pairing as torch
    # rasterize): (rast0, [F0,F1]), (rast1, [C0,C1]), (rast2, [C0,F1]),
    # (rast3, [F0,C1]).
    flat0 = base + w * (pF0i + nBi) + (pF1i + nBi)
    flat1 = base + w * (pC0i + nBi) + (pC1i + nBi)
    flat2 = base + w * (pC0i + nBi) + (pF1i + nBi)
    flat3 = base + w * (pF0i + nBi) + (pC1i + nBi)

    # xW = x * wxp, masked.
    maskf = jnp.where(is_origin, 0.0, 1.0)
    xw_re = (x_re * w_re - x_im * w_im) * maskf
    xw_im = (x_re * w_im + x_im * w_re) * maskf
    vals = jnp.concatenate([xw_re, xw_im], axis=0)        # (2, TILE)

    # Fused weighted one-hot scatter matrix for this M block:
    #   S[m, p] = sum_k rast_k[p] * [flat_k[p] == m_base + m]
    m_iota = lax.broadcasted_iota(jnp.int32, (m_blk, tile), 0) + mb * m_blk
    scat = (jnp.where(flat0 == m_iota, rast0, 0.0)
            + jnp.where(flat1 == m_iota, rast1, 0.0)
            + jnp.where(flat2 == m_iota, rast2, 0.0)
            + jnp.where(flat3 == m_iota, rast3, 0.0))     # (M_BLK, TILE) f32

    # Single MXU scatter-add: (2, TILE) . (M_BLK, TILE)^T -> (2, M_BLK)
    contrib = lax.dot_general(vals, scat, (((1,), (1,)), ((), ())),
                              preferred_element_type=jnp.float32)
    acc_ref[...] += contrib


def echo_forward(x, supp_edges, ln, wxp, n_bins=2):
    """ECHO forward.  x:(N,C) c64, supp_edges:(E,2) i32, ln/wxp:(E,) c64 -> (N,C,dS) f32."""
    N, C = x.shape
    E = supp_edges.shape[0]
    dmap_np, dS = disk_map(n_bins)
    w2 = dmap_np.shape[0]

    M_sq = N * C * w2                       # accumulate over the full square grid
    M_pad = _round_up(M_sq, M_BLK)

    # Pair construction matching torch's repeat / repeat_interleave: p = c*E + e
    src = jnp.tile(supp_edges[:, 0], C).astype(jnp.int32)
    tgt = jnp.tile(supp_edges[:, 1], C).astype(jnp.int32)
    c_ind = jnp.repeat(jnp.arange(C, dtype=jnp.int32), E)
    e_ind = jnp.tile(jnp.arange(E, dtype=jnp.int32), C)

    x_p = x[src, c_ind]                     # (P,) complex64
    ln_p = ln[e_ind]
    w_p = wxp[e_ind]
    base = (C * w2) * tgt + w2 * c_ind      # (P,) int32, square-grid base

    P = C * E
    P_pad = _round_up(P, PAIR_TILE)

    zeros = jnp.zeros((P,), jnp.float32)
    pf = jnp.stack(
        [jnp.real(x_p), jnp.imag(x_p),
         jnp.real(ln_p), jnp.imag(ln_p),
         jnp.real(w_p), jnp.imag(w_p),
         zeros, zeros], axis=0).astype(jnp.float32)                  # (8, P)
    pf = jnp.pad(pf, ((0, 0), (0, P_pad - P)))      # padded pairs => x=0 => masked
    base_a = jnp.pad(base.astype(jnp.int32), (0, P_pad - P)).reshape(1, P_pad)

    grid = (M_pad // M_BLK, P_pad // PAIR_TILE)     # pair axis innermost

    # VMEM budget: scatter block (M_BLK, PAIR_TILE) f32 = 1 MiB plus a few
    # transients; comfortably inside the v5e 16 MiB scoped default and the
    # v7x 64 MiB physical budget.
    acc = pl.pallas_call(
        functools.partial(_echo_kernel, n_bins=n_bins, m_blk=M_BLK),
        out_shape=jax.ShapeDtypeStruct((2, M_pad), jnp.float32),
        grid_spec=pltpu.PrefetchScalarGridSpec(
            num_scalar_prefetch=0,
            grid=grid,
            in_specs=[
                pl.BlockSpec((8, PAIR_TILE), lambda mb, t: (0, t)),
                pl.BlockSpec((1, PAIR_TILE), lambda mb, t: (0, t)),
            ],
            out_specs=pl.BlockSpec((2, M_BLK), lambda mb, t: (0, mb)),
        ),
        compiler_params=pltpu.CompilerParams(
            dimension_semantics=("parallel", "arbitrary"),
            vmem_limit_bytes=32 * 1024 * 1024),
    )(pf, base_a)

    # Drop padded lanes, then apply the disk map as a segment-sum over square
    # bins.  dMap (fill value 0) sends every out-of-disk square bin AND the
    # first in-disk bin to disk bin 0 -- the gather matrix reproduces that
    # aliasing exactly, matching the torch reference.
    dmap_arr = jnp.asarray(dmap_np, dtype=jnp.int32)
    gmat = jnp.zeros((w2, dS), jnp.float32).at[jnp.arange(w2), dmap_arr].set(1.0)
    acc_sq = acc[:, :M_sq].reshape(2, N * C, w2)
    acc_disk = jnp.einsum('knw,wd->knd', acc_sq, gmat)               # (2, N*C, dS)

    # softAbs of the complex accumulator, reshaped to (N, C, dS)
    y = jnp.sqrt(acc_disk[0] ** 2 + acc_disk[1] ** 2 + SOFT_EPS)
    return y.reshape(N, C, dS)


if __name__ == "__main__":
    N, C, E, n_bins = 8, 4, 80, 2

    key = jax.random.PRNGKey(0)
    k1, k2, k3, k4, k5, k6, k7 = jax.random.split(key, 7)

    xr = jax.random.normal(k1, (N, C), jnp.float32)
    xi = jax.random.normal(k2, (N, C), jnp.float32)
    x = (xr + 1j * xi).astype(jnp.complex64)
    x = x.at[0, 0].set(0.0 + 0.0j)      # exercise the isOrigin mask

    src = jax.random.randint(k3, (E,), 0, N, dtype=jnp.int32)
    tgt = jax.random.randint(k4, (E,), 0, N, dtype=jnp.int32)
    supp_edges = jnp.stack([src, tgt], axis=1)

    # ln: log map of target in source frame (kept inside the unit disk)
    lr = jax.random.uniform(k5, (E,), minval=-0.7, maxval=0.7)
    li = jax.random.uniform(k6, (E,), minval=-0.7, maxval=0.7)
    ln = (lr + 1j * li).astype(jnp.complex64)

    # wxp: unit transport pre-multiplied by integration weights
    theta = jax.random.uniform(k7, (E,), minval=0.0, maxval=2.0 * np.pi)
    wxp = (0.1 * jnp.cos(theta) + 1j * 0.1 * jnp.sin(theta)).astype(jnp.complex64)

    y = echo_forward(x, supp_edges, ln, wxp, n_bins=n_bins)
    jax.block_until_ready(y)
    assert y.shape == (N, C, disk_map(n_bins)[1])
    assert bool(jnp.all(jnp.isfinite(y)))
    print("KERNEL_OK")
</pallas_src>

<mosaic_0001>
module attributes {stable_mosaic.version = 11 : i64} {
  func.func @_echo_kernel(%arg0: i32, %arg1: i32, %arg2: memref<8x512xf32, #tpu.memory_space<vmem>>, %arg3: memref<1x512xi32, #tpu.memory_space<vmem>>, %arg4: memref<2x512xf32, #tpu.memory_space<vmem>>) attributes {dimension_semantics = [#tpu.dimension_semantics<parallel>, #tpu.dimension_semantics<arbitrary>], iteration_bounds = array<i64: 2, 1>, scalar_prefetch = 0 : i64, scratch_operands = 0 : i64, tpu.core_type = #tpu.core_type<tc>, window_params = [{transform_indices = @transform_0, window_bounds = array<i64: 8, 512>}, {transform_indices = @transform_1, window_bounds = array<i64: 1, 512>}, {transform_indices = @transform_2, window_bounds = array<i64: 2, 512>}]} {
    %c0_i32 = arith.constant 0 : i32
    %0 = arith.cmpi eq, %arg1, %c0_i32 : i32
    %1 = arith.extui %0 : i1 to i32
    %c0_i32_0 = arith.constant 0 : i32
    %2 = arith.cmpi ne, %1, %c0_i32_0 : i32
    scf.if %2 {
      %cst_43 = arith.constant 0.000000e+00 : f32
      %150 = vector.broadcast %cst_43 : f32 to vector<2x512xf32>
      %c0_44 = arith.constant 0 : index
      %c0_45 = arith.constant 0 : index
      %151 = vector.load %arg4[%c0_44, %c0_45] : memref<2x512xf32, #tpu.memory_space<vmem>>, vector<2x512xf32>
      tpu.vector_store %arg4[%c0_44, %c0_45], %150 {strides = array<i32>} : memref<2x512xf32, #tpu.memory_space<vmem>>, vector<2x512xf32>,
    } else {
    }
    %c0 = arith.constant 0 : index
    %c0_1 = arith.constant 0 : index
    %3 = vector.load %arg2[%c0, %c0_1] : memref<8x512xf32, #tpu.memory_space<vmem>>, vector<1x512xf32>
    %c1 = arith.constant 1 : index
    %c0_2 = arith.constant 0 : index
    %4 = vector.load %arg2[%c1, %c0_2] : memref<8x512xf32, #tpu.memory_space<vmem>>, vector<1x512xf32>
    %c2 = arith.constant 2 : index
    %c0_3 = arith.constant 0 : index
    %5 = vector.load %arg2[%c2, %c0_3] : memref<8x512xf32, #tpu.memory_space<vmem>>, vector<1x512xf32>
    %c3 = arith.constant 3 : index
    %c0_4 = arith.constant 0 : index
    %6 = vector.load %arg2[%c3, %c0_4] : memref<8x512xf32, #tpu.memory_space<vmem>>, vector<1x512xf32>
    %c4 = arith.constant 4 : index
    %c0_5 = arith.constant 0 : index
    %7 = vector.load %arg2[%c4, %c0_5] : memref<8x512xf32, #tpu.memory_space<vmem>>, vector<1x512xf32>
    %c5 = arith.constant 5 : index
    %c0_6 = arith.constant 0 : index
    %8 = vector.load %arg2[%c5, %c0_6] : memref<8x512xf32, #tpu.memory_space<vmem>>, vector<1x512xf32>
    %c0_7 = arith.constant 0 : index
    %c0_8 = arith.constant 0 : index
    %9 = vector.load %arg3[%c0_7, %c0_8] : memref<1x512xi32, #tpu.memory_space<vmem>>, vector<1x512xi32>
    %cst = arith.constant 0.000000e+00 : f32
    %10 = vector.broadcast %cst : f32 to vector<1x512xf32>
    %11 = arith.cmpf oeq, %3, %10 : vector<1x512xf32>
    %cst_9 = arith.constant 0.000000e+00 : f32
    %12 = vector.broadcast %cst_9 : f32 to vector<1x512xf32>
    %13 = arith.cmpf oeq, %4, %12 : vector<1x512xf32>
    %14 = arith.andi %11, %13 : vector<1x512xi1>
    %15 = arith.mulf %3, %3 : vector<1x512xf32>
    %16 = arith.mulf %4, %4 : vector<1x512xf32>
    %17 = arith.addf %15, %16 : vector<1x512xf32>
    %18 = math.rsqrt %17 : vector<1x512xf32>
    %cst_10 = arith.constant 0.000000e+00 : f32
    %19 = vector.broadcast %cst_10 : f32 to vector<1x512xf32>
    %20 = arith.select %14, %19, %18 : vector<1x512xi1>, vector<1x512xf32>
    %21 = arith.mulf %3, %20 : vector<1x512xf32>
    %cst_11 = arith.constant 0.000000e+00 : f32
    %22 = vector.broadcast %cst_11 : f32 to vector<1x512xf32>
    %23 = arith.subf %22, %4 : vector<1x512xf32>
    %24 = arith.mulf %23, %20 : vector<1x512xf32>
    %25 = arith.mulf %5, %21 : vector<1x512xf32>
    %26 = arith.mulf %6, %24 : vector<1x512xf32>
    %27 = arith.subf %25, %26 : vector<1x512xf32>
    %cst_12 = arith.constant 2.000000e+00 : f32
    %28 = vector.broadcast %cst_12 : f32 to vector<1x512xf32>
    %29 = arith.mulf %27, %28 : vector<1x512xf32>
    %30 = arith.mulf %5, %24 : vector<1x512xf32>
    %31 = arith.mulf %6, %21 : vector<1x512xf32>
    %32 = arith.addf %30, %31 : vector<1x512xf32>
    %cst_13 = arith.constant 2.000000e+00 : f32
    %33 = vector.broadcast %cst_13 : f32 to vector<1x512xf32>
    %34 = arith.mulf %32, %33 : vector<1x512xf32>
    %35 = math.ceil %29 : vector<1x512xf32>
    %cst_14 = arith.constant -2.000000e+00 : f32
    %cst_15 = arith.constant 2.000000e+00 : f32
    %36 = vector.broadcast %cst_14 : f32 to vector<1x512xf32>
    %37 = arith.maximumf %36, %35 : vector<1x512xf32>
    %38 = vector.broadcast %cst_15 : f32 to vector<1x512xf32>
    %39 = arith.minimumf %38, %37 : vector<1x512xf32>
    %40 = math.ceil %34 : vector<1x512xf32>
    %cst_16 = arith.constant -2.000000e+00 : f32
    %cst_17 = arith.constant 2.000000e+00 : f32
    %41 = vector.broadcast %cst_16 : f32 to vector<1x512xf32>
    %42 = arith.maximumf %41, %40 : vector<1x512xf32>
    %43 = vector.broadcast %cst_17 : f32 to vector<1x512xf32>
    %44 = arith.minimumf %43, %42 : vector<1x512xf32>
    %45 = math.floor %29 : vector<1x512xf32>
    %cst_18 = arith.constant -2.000000e+00 : f32
    %cst_19 = arith.constant 2.000000e+00 : f32
    %46 = vector.broadcast %cst_18 : f32 to vector<1x512xf32>
    %47 = arith.maximumf %46, %45 : vector<1x512xf32>
    %48 = vector.broadcast %cst_19 : f32 to vector<1x512xf32>
    %49 = arith.minimumf %48, %47 : vector<1x512xf32>
    %50 = math.floor %34 : vector<1x512xf32>
    %cst_20 = arith.constant -2.000000e+00 : f32
    %cst_21 = arith.constant 2.000000e+00 : f32
    %51 = vector.broadcast %cst_20 : f32 to vector<1x512xf32>
    %52 = arith.maximumf %51, %50 : vector<1x512xf32>
    %53 = vector.broadcast %cst_21 : f32 to vector<1x512xf32>
    %54 = arith.minimumf %53, %52 : vector<1x512xf32>
    %55 = arith.subf %39, %29 : vector<1x512xf32>
    %56 = arith.subf %44, %34 : vector<1x512xf32>
    %57 = arith.mulf %55, %56 : vector<1x512xf32>
    %58 = arith.subf %29, %49 : vector<1x512xf32>
    %59 = arith.subf %34, %54 : vector<1x512xf32>
    %60 = arith.mulf %58, %59 : vector<1x512xf32>
    %61 = arith.subf %29, %49 : vector<1x512xf32>
    %62 = arith.subf %44, %34 : vector<1x512xf32>
    %63 = arith.mulf %61, %62 : vector<1x512xf32>
    %64 = arith.subf %39, %29 : vector<1x512xf32>
    %65 = arith.subf %34, %54 : vector<1x512xf32>
    %66 = arith.mulf %64, %65 : vector<1x512xf32>
    %67 = arith.fptosi %39 : vector<1x512xf32> to vector<1x512xi32>
    %68 = arith.fptosi %44 : vector<1x512xf32> to vector<1x512xi32>
    %69 = arith.fptosi %49 : vector<1x512xf32> to vector<1x512xi32>
    %70 = arith.fptosi %54 : vector<1x512xf32> to vector<1x512xi32>
    %c2_i32 = arith.constant 2 : i32
    %71 = vector.broadcast %c2_i32 : i32 to vector<1x512xi32>
    %72 = arith.addi %69, %71 : vector<1x512xi32>
    %c5_i32 = arith.constant 5 : i32
    %73 = vector.broadcast %c5_i32 : i32 to vector<1x512xi32>
    %74 = arith.muli %73, %72 : vector<1x512xi32>
    %75 = arith.addi %9, %74 : vector<1x512xi32>
    %c2_i32_22 = arith.constant 2 : i32
    %76 = vector.broadcast %c2_i32_22 : i32 to vector<1x512xi32>
    %77 = arith.addi %70, %76 : vector<1x512xi32>
    %78 = arith.addi %75, %77 : vector<1x512xi32>
    %c2_i32_23 = arith.constant 2 : i32
    %79 = vector.broadcast %c2_i32_23 : i32 to vector<1x512xi32>
    %80 = arith.addi %67, %79 : vector<1x512xi32>
    %c5_i32_24 = arith.constant 5 : i32
    %81 = vector.broadcast %c5_i32_24 : i32 to vector<1x512xi32>
    %82 = arith.muli %81, %80 : vector<1x512xi32>
    %83 = arith.addi %9, %82 : vector<1x512xi32>
    %c2_i32_25 = arith.constant 2 : i32
    %84 = vector.broadcast %c2_i32_25 : i32 to vector<1x512xi32>
    %85 = arith.addi %68, %84 : vector<1x512xi32>
    %86 = arith.addi %83, %85 : vector<1x512xi32>
    %c2_i32_26 = arith.constant 2 : i32
    %87 = vector.broadcast %c2_i32_26 : i32 to vector<1x512xi32>
    %88 = arith.addi %67, %87 : vector<1x512xi32>
    %c5_i32_27 = arith.constant 5 : i32
    %89 = vector.broadcast %c5_i32_27 : i32 to vector<1x512xi32>
    %90 = arith.muli %89, %88 : vector<1x512xi32>
    %91 = arith.addi %9, %90 : vector<1x512xi32>
    %c2_i32_28 = arith.constant 2 : i32
    %92 = vector.broadcast %c2_i32_28 : i32 to vector<1x512xi32>
    %93 = arith.addi %70, %92 : vector<1x512xi32>
    %94 = arith.addi %91, %93 : vector<1x512xi32>
    %c2_i32_29 = arith.constant 2 : i32
    %95 = vector.broadcast %c2_i32_29 : i32 to vector<1x512xi32>
    %96 = arith.addi %69, %95 : vector<1x512xi32>
    %c5_i32_30 = arith.constant 5 : i32
    %97 = vector.broadcast %c5_i32_30 : i32 to vector<1x512xi32>
    %98 = arith.muli %97, %96 : vector<1x512xi32>
    %99 = arith.addi %9, %98 : vector<1x512xi32>
    %c2_i32_31 = arith.constant 2 : i32
    %100 = vector.broadcast %c2_i32_31 : i32 to vector<1x512xi32>
    %101 = arith.addi %68, %100 : vector<1x512xi32>
    %102 = arith.addi %99, %101 : vector<1x512xi32>
    %cst_32 = arith.constant 0.000000e+00 : f32
    %cst_33 = arith.constant 1.000000e+00 : f32
    %103 = vector.broadcast %cst_32 : f32 to vector<1x512xf32>
    %104 = vector.broadcast %cst_33 : f32 to vector<1x512xf32>
    %105 = arith.select %14, %103, %104 : vector<1x512xi1>, vector<1x512xf32>
    %106 = arith.mulf %3, %7 : vector<1x512xf32>
    %107 = arith.mulf %4, %8 : vector<1x512xf32>
    %108 = arith.subf %106, %107 : vector<1x512xf32>
    %109 = arith.mulf %108, %105 : vector<1x512xf32>
    %110 = arith.mulf %3, %8 : vector<1x512xf32>
    %111 = arith.mulf %4, %7 : vector<1x512xf32>
    %112 = arith.addf %110, %111 : vector<1x512xf32>
    %113 = arith.mulf %112, %105 : vector<1x512xf32>
    %114 = tpu.concatenate %109, %113 in 0 : vector<1x512xf32>, vector<1x512xf32> -> vector<2x512xf32>
    %115 = tpu.iota {dimensions = array<i32: 0>} : vector<512x512xi32>
    %c512_i32 = arith.constant 512 : i32
    %116 = arith.muli %arg0, %c512_i32 : i32
    %117 = vector.broadcast %116 : i32 to vector<512x512xi32>
    %118 = arith.addi %115, %117 : vector<512x512xi32>
    %119 = vector.broadcast %78 : vector<1x512xi32> to vector<512x512xi32>
    %120 = arith.cmpi eq, %119, %118 : vector<512x512xi32>
    %cst_34 = arith.constant 0.000000e+00 : f32
    %121 = vector.shape_cast %57 : vector<1x512xf32> to vector<1x512xf32>
    %122 = vector.broadcast %121 : vector<1x512xf32> to vector<512x512xf32>
    %123 = vector.broadcast %cst_34 : f32 to vector<512x512xf32>
    %124 = arith.select %120, %122, %123 : vector<512x512xi1>, vector<512x512xf32>
    %125 = vector.broadcast %86 : vector<1x512xi32> to vector<512x512xi32>
    %126 = arith.cmpi eq, %125, %118 : vector<512x512xi32>
    %cst_35 = arith.constant 0.000000e+00 : f32
    %127 = vector.shape_cast %60 : vector<1x512xf32> to vector<1x512xf32>
    %128 = vector.broadcast %127 : vector<1x512xf32> to vector<512x512xf32>
    %129 = vector.broadcast %cst_35 : f32 to vector<512x512xf32>
    %130 = arith.select %126, %128, %129 : vector<512x512xi1>, vector<512x512xf32>
    %131 = arith.addf %124, %130 : vector<512x512xf32>
    %132 = vector.broadcast %94 : vector<1x512xi32> to vector<512x512xi32>
    %133 = arith.cmpi eq, %132, %118 : vector<512x512xi32>
    %cst_36 = arith.constant 0.000000e+00 : f32
    %134 = vector.shape_cast %63 : vector<1x512xf32> to vector<1x512xf32>
    %135 = vector.broadcast %134 : vector<1x512xf32> to vector<512x512xf32>
    %136 = vector.broadcast %cst_36 : f32 to vector<512x512xf32>
    %137 = arith.select %133, %135, %136 : vector<512x512xi1>, vector<512x512xf32>
    %138 = arith.addf %131, %137 : vector<512x512xf32>
    %139 = vector.broadcast %102 : vector<1x512xi32> to vector<512x512xi32>
    %140 = arith.cmpi eq, %139, %118 : vector<512x512xi32>
    %cst_37 = arith.constant 0.000000e+00 : f32
    %141 = vector.shape_cast %66 : vector<1x512xf32> to vector<1x512xf32>
    %142 = vector.broadcast %141 : vector<1x512xf32> to vector<512x512xf32>
    %143 = vector.broadcast %cst_37 : f32 to vector<512x512xf32>
    %144 = arith.select %140, %142, %143 : vector<512x512xi1>, vector<512x512xf32>
    %145 = arith.addf %138, %144 : vector<512x512xf32>
    %cst_38 = arith.constant dense<0.000000e+00> : vector<2x512xf32>
    %146 = tpu.matmul %114, %145, %cst_38 {dimension_numbers = #tpu.dot_dimension_numbers<[1], [1], [0], [0], [0, 0, 1, 0], [], []>} : vector<2x512xf32>, vector<512x512xf32>, vector<2x512xf32> -> vector<2x512xf32>
    %c0_39 = arith.constant 0 : index
    %c0_40 = arith.constant 0 : index
    %147 = vector.load %arg4[%c0_39, %c0_40] : memref<2x512xf32, #tpu.memory_space<vmem>>, vector<2x512xf32>
    %148 = arith.addf %147, %146 : vector<2x512xf32>
    %c0_41 = arith.constant 0 : index
    %c0_42 = arith.constant 0 : index
    %149 = vector.load %arg4[%c0_41, %c0_42] : memref<2x512xf32, #tpu.memory_space<vmem>>, vector<2x512xf32>
    tpu.vector_store %arg4[%c0_41, %c0_42], %148 {strides = array<i32>} : memref<2x512xf32, #tpu.memory_space<vmem>>, vector<2x512xf32>,
    return
  }
  func.func @transform_0(%arg0: i32, %arg1: i32) -> (i32, i32) {
    %c0_i32 = arith.constant 0 : i32
    %c0_i32_0 = arith.constant 0 : i32
    return %c0_i32, %arg1 : i32, i32
  }
  func.func @transform_1(%arg0: i32, %arg1: i32) -> (i32, i32) {
    %c0_i32 = arith.constant 0 : i32
    %c0_i32_0 = arith.constant 0 : i32
    return %c0_i32, %arg1 : i32, i32
  }
  func.func @transform_2(%arg0: i32, %arg1: i32) -> (i32, i32) {
    %c0_i32 = arith.constant 0 : i32
    %c0_i32_0 = arith.constant 0 : i32
    return %c0_i32, %arg0 : i32, i32
  }
}

</mosaic_0001>

<bundles_post_ra>
// kernel: tpu_custom_call.1
= control target key start
LH: loop header
LB: loop body
LE: loop exit
PB: predicated region body
PF: predicated region fallthrough
CT: control target
= control target key end

     0   :  { %7 = vsyncpa [#allocation3], 0  ;;  %s7177_s0 = inlined_call_operand.hbm [shape: f32[8,512], index: 0, kind: input, shape index: {}]   ;;  %s7178_s1 = inlined_call_operand.hbm [shape: s32[1,512], index: 1, kind: input, shape index: {}]   ;;  %s7179_s2 = inlined_call_operand.hbm [shape: f32[2,1024], index: 2, kind: output, shape index: {}]  }
   0x1   :  { %8 = vsyncpa [#allocation6], 0 }
   0x2   :  { %9 = vsyncpa [#allocation4], 0 }
   0x3   :  { %11 = vsyncpa [#allocation4 + $0x1], 0  ;;  %s4005_s9 = smov 0   ;;  %s4007_s10 = smov 0  }
   0x4   :  { %s4009_s11 = smov 0   ;;  %s4011_s12 = smov 0  }
   0x5   :  { %s4013_s13 = smov 0   ;;  %s4015_s14 = smov 0  }
   0x6 LB: > { %s3729_s15 = sadd.s32 4294967295, %s3985_s14   ;;  %s3730_s16 = sadd.s32 4294967294, %s3985_s14   ;;  %s3985_s14 = sphi %s4015_s14, %s17_s14   ;;  %s3981_s13 = sphi %s4013_s13, %s7190_s13   ;;  %s3977_s12 = sphi %s4011_s12, %s7189_s12   ;;  %s3973_s11 = sphi %s4009_s11, %s7188_s11   ;;  %s3969_s10 = sphi %s4007_s10, %s7187_s10   ;;  %s3965_s9 = sphi %s4005_s9, %s7186_s9  }
   0x7   : > { %s29_s17 = sadd.s32 1, %s3981_s13  ;;  %s88_s18 = sadd.s32 1, %s3973_s11 }
   0x8   : > { %p31_p0 = scmp.ge.s32.totalorder %s29_s17, 2  ;;  %p98_p1 = scmp.ne.s32.totalorder %s3973_s11, %s3969_s10 }
   0x9   : > { %p99_p2 = scmp.eq.s32.totalorder %s3729_s15, 1  ;;  %p104_p3 = scmp.ne.s32.totalorder %s3969_s10, %s3965_s9 }
   0xa   : > { %s7192_s17 = smov (%p31_p0, %s29_s17), 0  ;;  %p105_p5 = scmp.eq.s32.totalorder %s3730_s16, 1 }
   0xb   : > { %p4045_p4 = por %p99_p2, %p98_p1  ;;  %s85_s20 = ssub.s32 %s3981_s13, %s7192_s17 }
   0xc   : > { %p3731_p6 = scmp.ge.s32.totalorder %s3985_s14, 1  ;;  %p86_p7 = scmp.eq.s32.totalorder %s85_s20, 0 }
   0xd   : > { %p4052_p8 = por %p105_p5, %p104_p3  ;;  %p112_p9 = scmp.lt.s32.totalorder %s3985_s14, 3 }
   0xe   : > { %s4058_s22 = scalar_select %p86_p7, %s3973_s11, %s88_s18  }
   0xf   : > { %p4060_p10 = pnand %p3731_p6, %p112_p9  ;;  %p4064_p11 = scmp.eq.s32.totalorder %s3729_s15, 0 }
  0x10   : > { %s127_s27 = sshll.u32 %s7177_s0, 4  ;;  %s3987_s28 = smov [#allocation2]   ;;  %s128_s27 = int_to_ptr.hbm [resolvable:$true] %s127_s27 }
  0x11   : > { %p3767_p12 = pneg %p4060_p10  ;;  %s129_s29 = sshll.u32 %s3987_s28, 4  ;;  %s130_s29 = int_to_ptr.vmem [resolvable:$true] %s129_s29 }
  0x12   : > { %s141_s4 = sshll.u32 %s7178_s1, 4  ;;  %s3988_s5 = smov [#allocation5]   ;;  %s142_s4 = int_to_ptr.hbm [resolvable:$true] %s141_s4 }
  0x13   : > { %p3768_p13 = pnand %p4064_p11, %p3767_p12  ;;  %s143_s6 = sshll.u32 %s3988_s5, 4  ;;  %s144_s6 = int_to_ptr.vmem [resolvable:$true] %s143_s6 }
  0x14   : > { %156 = sbr.rel (%p4060_p10) target bundleno = 972 (0x3cc), region = 28 }
  0x15   : > { %3770 = dma.hbm_to_vmem [thread:$0]  (!%p3768_p13), %s128_s27, 512, %s130_s29, [#allocation3]  }
  0x16   : > { %3773 = dma.hbm_to_vmem [thread:$0]  (!%p3768_p13), %s142_s4, 64, %s144_s6, [#allocation6]  }
  0x19   : > { %3952 = dma.done.wait (%p4064_p11), [#allocation3], 512  }
  0x1a   : > { %3954 = vsyncadd (%p4064_p11), [#allocation3], 4294966784 }
  0x1b   : > { %3956 = dma.done.wait (%p4064_p11), [#allocation6], 64  }
  0x1c   : > { %3958 = vsyncadd (%p4064_p11), [#allocation6], 4294967232  ;;  %v187_v0 = vld [vmem:[#allocation2] ss:$8 sm:$0xf]  ;;  %v295_v19 = vlaneseq  ;;  %s3742_s7 = sshll.u32 %s3977_s12, 9 }
  0x1d   : > { %v189_v1 = vld [vmem:[#allocation2 + $0x1] ss:$8 sm:$0xf]  ;;  %v202_v2 = vmul.f32 %v187_v0, %v187_v0  ;;  %vm199_vm2 = vcmp.eq.f32.partialorder %v187_v0, 0.0  ;;  %v4099_v39 = vstv %s3742_s7  ;;  %s176_s8 = sand.u32 1, %s3969_s10   ;;  %s3748_s16 = sshll.u32 %s3977_s12, 3 }
  0x1e   : > { %v203_v3 = vmul.f32 %v189_v1, %v189_v1  ;;  %vm200_vm3 = vcmp.eq.f32.partialorder %v189_v1, 0.0  ;;  %v217_v12 = vsub.f32 0.0, %v189_v1  ;;  %v191_v13 = vld [vmem:[#allocation2 + $0x2] ss:$8 sm:$0xf]  ;;  %v4094_v26 = vshrl.u32 %v295_v19, 7  ;;  %s3643_s23 = scalar_lea.hbm %s7179_s2, %s3748_s16 }
  0x1f   : > { %vm4088_vm5 = vmand %vm199_vm2, %vm200_vm3  ;;  %v193_v15 = vld [vmem:[#allocation2 + $0x3] ss:$8 sm:$0xf]  ;;  %s3737_s15 = sshll.u32 %s176_s8, 3  ;;  %s3647_s26 = sshll.u32 %s3643_s23, 4  ;;  %s3648_s26 = int_to_ptr.hbm [resolvable:$true] %s3647_s26 }
  0x20   : > { %v204_v4 = vadd.f32 %v203_v3, %v202_v2  ;;  %v311_v33 = vadd.s32 120, %v4094_v26  ;;  %v310_v34 = vadd.s32 112, %v4094_v26  ;;  %v309_v40 = vadd.s32 104, %v4094_v26  ;;  %v198_v57 = vld [vmem:[#allocation5] sm:$0xf]  ;;  %s178_s24 = scalar_lea.vmem [#allocation7], %s3737_s15 }
  0x21   : > { %s3645_s25 = sshll.u32 %s178_s24, 4  ;;  %s3632_s12 = scalar_lea.sflag [#allocation4], %s176_s8  ;;  %s3646_s25 = int_to_ptr.vmem [resolvable:$true] %s3645_s25 }
  0x22   : > { %3835 = vrsqrt.f32 %v204_v4  ;;  %vm211_vm0 = vweird.f32 %v204_v4  ;;  %v4103_v51 = vadd.s32 %v4099_v39, %v311_v33  ;;  %v4106_v52 = vadd.s32 %v4099_v39, %v310_v34  ;;  %s3913_s27 = sshra.s32 %s3648_s26, 4  ;;  %s3919_s3 = scalar_lea.hbm %s7179_s2, 16  ;;  %s3914_s27 = int_to_ptr.hbm [resolvable:$true] %s3913_s27 }
  0x23   : > { %v4109_v56 = vadd.s32 %v4099_v39, %v309_v40  ;;  %s3915_s28 = scalar_lea.hbm %s3914_s27, 8  ;;  %p3920_p3 = scmp.lt.s32.totalorder %s3914_s27, %s7179_s2 }
  0x24   : > { %p3916_p0 = scmp.ne.s32.totalorder %s3914_s27, %s3915_s28  ;;  %p3921_p5 = scmp.lt.s32.totalorder %s3919_s3, %s3915_s28 }
  0x26   : > { %p3917_p1 = pnand %p3916_p0, %p4045_p4  ;;  %p3922_p6 = por %p3921_p5, %p3920_p3 }
  0x28   : > { %v3836_v5 = vpop.eup %3835  ;;  %p3918_p2 = pneg %p3917_p1 }
  0x29   : > { %v206_v6 = vmul.f32 %v3836_v5, %v204_v4  ;;  %vm212_vm1 = vweird.f32 %v3836_v5 }
  0x2a   : > { %vm213_vm4 = vmor %vm211_vm0, %vm212_vm1  ;;  %p3923_p7 = pnand %p3922_p6, %p3918_p2 }
  0x2b   : > { %v207_v7 = vmul.f32 %v3836_v5, %v206_v6 }
  0x2d   : > { %v208_v8 = vmul.f32 0.5, %v207_v7 }
  0x2f   : > { %v209_v9 = vsub.f32 1.5, %v208_v8 }
  0x31   : > { %v210_v11 = vmul.f32 %v3836_v5, %v209_v9 }
  0x33   : > { %v214_v14 = vsel %vm213_vm4, %v3836_v5, %v210_v11 }
  0x34   : > { %v215_v16 = vsel %vm4088_vm5, 0.0, %v214_v14 }
  0x35   : > { %v216_v17 = vmul.f32 %v215_v16, %v187_v0  ;;  %v218_v18 = vmul.f32 %v217_v12, %v215_v16 }
  0x37   : > { %v219_v20 = vmul.f32 %v216_v17, %v191_v13  ;;  %v220_v21 = vmul.f32 %v218_v18, %v193_v15  ;;  %v223_v22 = vmul.f32 %v218_v18, %v191_v13  ;;  %v224_v23 = vmul.f32 %v216_v17, %v193_v15 }
  0x39   : > { %v221_v24 = vsub.f32 %v219_v20, %v220_v21  ;;  %v225_v25 = vadd.f32 %v224_v23, %v223_v22  ;;  %v4144_v22 = vadd.s32 96, %v4094_v26 }
  0x3b   : > { %v222_v27 = vmul.f32 2.0, %v221_v24  ;;  %v226_v28 = vmul.f32 2.0, %v225_v25 }
  0x3d   : > { %v227_v29 = vceil.f32 %v222_v27  ;;  %v230_v30 = vceil.f32 %v226_v28  ;;  %v233_v31 = vfloor.f32 %v222_v27  ;;  %v236_v32 = vfloor.f32 %v226_v28 }
  0x3f   : > { %v3738_v35 = vclamps-f32 %v227_v29, 2.0  ;;  %v3739_v36 = vclamps-f32 %v230_v30, 2.0  ;;  %v3740_v37 = vclamps-f32 %v233_v31, 2.0  ;;  %v3741_v38 = vclamps-f32 %v236_v32, 2.0 }
  0x41   : > { %v239_v41 = vsub.f32 %v3738_v35, %v222_v27  ;;  %v240_v42 = vsub.f32 %v3739_v36, %v226_v28  ;;  %v242_v43 = vsub.f32 %v222_v27, %v3740_v37  ;;  %v243_v44 = vsub.f32 %v226_v28, %v3741_v38 }
  0x42   : > { %v3750_v45 = vcvt.f32.s32 %v3738_v35  ;;  %v3752_v46 = vcvt.f32.s32 %v3739_v36  ;;  %v3754_v47 = vcvt.f32.s32 %v3740_v37  ;;  %v3756_v48 = vcvt.f32.s32 %v3741_v38 }
  0x43   : > { %v241_v49 = vmul.f32 %v240_v42, %v239_v41  ;;  %v244_v50 = vmul.f32 %v243_v44, %v242_v43  ;;  %v245_v53 = vmul.f32 %v242_v43, %v240_v42  ;;  %v246_v58 = vmul.f32 %v243_v44, %v239_v41 }
  0x44   : > { %v251_v54 = vadd.s32 2, %v3754_v47  ;;  %v256_v55 = vadd.s32 2, %v3750_v45  ;;  %v254_v59 = vadd.s32 2, %v3756_v48  ;;  %v259_v60 = vadd.s32 2, %v3752_v46 }
  0x45   : > { %v4111_v61 = vperm.slane %v241_v49, 0  ;;  %v4113_v0 = vperm.slane %v241_v49, 1  ;;  %v4115_v1 = vperm.slane %v241_v49, 2  ;;  %v4117_v2 = vperm.slane %v241_v49, 3 }
  0x46   : > { %v252_v62 = vmul.u32 5, %v251_v54  ;;  %v257_v63 = vmul.u32 5, %v256_v55  ;;  %v4119_v3 = vperm.slane %v244_v50, 0  ;;  %v4121_v4 = vperm.slane %v244_v50, 1 }
  0x47   : > { %v4123_v5 = vperm.slane %v244_v50, 2  ;;  %v4125_v8 = vperm.slane %v244_v50, 3  ;;  %v4127_v9 = vperm.slane %v245_v53, 0  ;;  %v4129_v11 = vperm.slane %v245_v53, 1 }
  0x48   : > { %v253_v6 = vadd.s32 %v252_v62, %v198_v57  ;;  %v258_v7 = vadd.s32 %v257_v63, %v198_v57  ;;  %v4131_v12 = vperm.slane %v245_v53, 2  ;;  %v4133_v13 = vperm.slane %v245_v53, 3 }
  0x49   : > { %v4135_v14 = vperm.slane %v246_v58, 0  ;;  %v4137_v18 = vperm.slane %v246_v58, 1  ;;  %v4139_v20 = vperm.slane %v246_v58, 2  ;;  %v4141_v21 = vperm.slane %v246_v58, 3 }
  0x4a   : > { %v255_v15 = vadd.s32 %v254_v59, %v253_v6  ;;  %v260_v16 = vadd.s32 %v259_v60, %v258_v7  ;;  %v261_v17 = vadd.s32 %v258_v7, %v254_v59  ;;  %v262_v19 = vadd.s32 %v259_v60, %v253_v6 }
  0x4c   : > { %v4146_v23 = vperm.slane %v255_v15, 0  ;;  %v4148_v24 = vperm.slane %v255_v15, 1  ;;  %v4150_v25 = vperm.slane %v255_v15, 2  ;;  %v4152_v27 = vperm.slane %v255_v15, 3 }
  0x4d   : > { %v4154_v28 = vperm.slane %v260_v16, 0  ;;  %v4156_v29 = vperm.slane %v260_v16, 1  ;;  %v4158_v30 = vperm.slane %v260_v16, 2  ;;  %v4160_v31 = vperm.slane %v260_v16, 3 }
  0x4e   : > { %v4162_v32 = vperm.slane %v261_v17, 0  ;;  %v4164_v33 = vperm.slane %v261_v17, 1  ;;  %v4166_v34 = vperm.slane %v261_v17, 2  ;;  %v4168_v35 = vperm.slane %v261_v17, 3 }
  0x4f   : > { %v4170_v36 = vperm.slane %v262_v19, 0  ;;  %v4172_v37 = vperm.slane %v262_v19, 1  ;;  %v4174_v38 = vperm.slane %v262_v19, 2  ;;  %v4176_v40 = vperm.slane %v262_v19, 3 }
  0x50   : > { %vm492_vm6 = vcmp.eq.s32.totalorder %v4150_v25, %v4103_v51  ;;  %vm1017_vm7 = vcmp.eq.s32.totalorder %v4158_v30, %v4103_v51  ;;  %vm1798_vm8 = vcmp.eq.s32.totalorder %v4166_v34, %v4103_v51  ;;  %vm493_vm9 = vcmp.eq.s32.totalorder %v4152_v27, %v4103_v51 }
  0x51   : > { %v757_v41 = vsel %vm492_vm6, %v4115_v1, 0.0  ;;  %v1282_v42 = vsel %vm1017_vm7, %v4123_v5, 0.0  ;;  %v2063_v43 = vsel %vm1798_vm8, %v4131_v12, 0.0  ;;  %vm2579_vm10 = vcmp.eq.s32.totalorder %v4174_v38, %v4103_v51 }
  0x52   : > { %v1538_v44 = vadd.f32 %v1282_v42, %v757_v41  ;;  %v2844_v45 = vsel %vm2579_vm10, %v4139_v20, 0.0  ;;  %v758_v46 = vsel %vm493_vm9, %v4117_v2, 0.0  ;;  %vm1018_vm11 = vcmp.eq.s32.totalorder %v4160_v31, %v4103_v51 }
  0x53   : > { %v1283_v47 = vsel %vm1018_vm11, %v4125_v8, 0.0  ;;  %vm1799_vm12 = vcmp.eq.s32.totalorder %v4168_v35, %v4103_v51  ;;  %vm2580_vm13 = vcmp.eq.s32.totalorder %v4176_v40, %v4103_v51  ;;  %vm490_vm14 = vcmp.eq.s32.totalorder %v4146_v23, %v4103_v51 }
  0x54   : > { %v2319_v48 = vadd.f32 %v2063_v43, %v1538_v44  ;;  %v1539_v49 = vadd.f32 %v1283_v47, %v758_v46  ;;  %v2064_v50 = vsel %vm1799_vm12, %v4133_v13, 0.0  ;;  %v2845_v53 = vsel %vm2580_vm13, %v4141_v21, 0.0 }
  0x55   : > { %v755_v54 = vsel %vm490_vm14, %v4111_v61, 0.0  ;;  %vm1015_vm15 = vcmp.eq.s32.totalorder %v4154_v28, %v4103_v51  ;;  %vm1796_vm0 = vcmp.eq.s32.totalorder %v4162_v32, %v4103_v51  ;;  %vm2577_vm1 = vcmp.eq.s32.totalorder %v4170_v36, %v4103_v51 }
  0x56   : > { %v3100_v55 = vadd.f32 %v2844_v45, %v2319_v48  ;;  %v2320_v57 = vadd.f32 %v2064_v50, %v1539_v49  ;;  %v1280_v58 = vsel %vm1015_vm15, %v4119_v3, 0.0  ;;  %v2061_v59 = vsel %vm1796_vm0, %v4127_v9, 0.0 }
  0x57   : > { %v1536_v60 = vadd.f32 %v1280_v58, %v755_v54  ;;  %v2842_v62 = vsel %vm2577_vm1, %v4135_v14, 0.0  ;;  %vm491_vm2 = vcmp.eq.s32.totalorder %v4148_v24, %v4103_v51  ;;  %vm1016_vm3 = vcmp.eq.s32.totalorder %v4156_v29, %v4103_v51 }
  0x58   : > { %3334 = vmatpush.xpose.msra.mxu2 %v3100_v55  ;;  %v3101_v63 = vadd.f32 %v2845_v53, %v2320_v57  ;;  %v756_v6 = vsel %vm491_vm2, %v4113_v0, 0.0  ;;  %v1281_v7 = vsel %vm1016_vm3, %v4121_v4, 0.0  ;;  %vm1797_vm4 = vcmp.eq.s32.totalorder %v4164_v33, %v4103_v51 }
  0x59   : > { %v2317_v15 = vadd.f32 %v2061_v59, %v1536_v60  ;;  %v1537_v16 = vadd.f32 %v1281_v7, %v756_v6  ;;  %v2062_v17 = vsel %vm1797_vm4, %v4129_v11, 0.0  ;;  %vm2578_vm6 = vcmp.eq.s32.totalorder %v4172_v37, %v4103_v51 }
  0x5a   : > { %3354 = vmatpush.xpose.msra.mxu3 %v3101_v63  ;;  %v2843_v19 = vsel %vm2578_vm6, %v4137_v18, 0.0  ;;  %vm488_vm7 = vcmp.eq.s32.totalorder %v4150_v25, %v4106_v52  ;;  %vm1013_vm8 = vcmp.eq.s32.totalorder %v4158_v30, %v4106_v52  ;;  %vm1794_vm9 = vcmp.eq.s32.totalorder %v4166_v34, %v4106_v52 }
  0x5b   : > { %v3098_v41 = vadd.f32 %v2842_v62, %v2317_v15  ;;  %v2318_v42 = vadd.f32 %v2062_v17, %v1537_v16  ;;  %v753_v43 = vsel %vm488_vm7, %v4115_v1, 0.0  ;;  %v1278_v44 = vsel %vm1013_vm8, %v4123_v5, 0.0 }
  0x5c   : > { %v1534_v45 = vadd.f32 %v1278_v44, %v753_v43  ;;  %v2059_v51 = vsel %vm1794_vm9, %v4131_v12, 0.0  ;;  %vm2575_vm10 = vcmp.eq.s32.totalorder %v4174_v38, %v4106_v52  ;;  %vm489_vm11 = vcmp.eq.s32.totalorder %v4152_v27, %v4106_v52 }
  0x5d   : > { %3294 = vmatpush.xpose.msra.mxu0 %v3098_v41  ;;  %v3099_v46 = vadd.f32 %v2843_v19, %v2318_v42  ;;  %v2840_v47 = vsel %vm2575_vm10, %v4139_v20, 0.0  ;;  %v754_v48 = vsel %vm489_vm11, %v4117_v2, 0.0  ;;  %vm1014_vm12 = vcmp.eq.s32.totalorder %v4160_v31, %v4106_v52 }
  0x5e   : > { %v2315_v49 = vadd.f32 %v2059_v51, %v1534_v45  ;;  %v1279_v50 = vsel %vm1014_vm12, %v4125_v8, 0.0  ;;  %vm1795_vm13 = vcmp.eq.s32.totalorder %v4168_v35, %v4106_v52  ;;  %vm2576_vm14 = vcmp.eq.s32.totalorder %v4176_v40, %v4106_v52 }
  0x5f   : > { %3314 = vmatpush.xpose.msra.mxu1 %v3099_v46  ;;  %v1535_v53 = vadd.f32 %v1279_v50, %v754_v48  ;;  %v2060_v54 = vsel %vm1795_vm13, %v4133_v13, 0.0  ;;  %v2841_v55 = vsel %vm2576_vm14, %v4141_v21, 0.0  ;;  %vm486_vm15 = vcmp.eq.s32.totalorder %v4146_v23, %v4106_v52 }
  0x60   : > { %v3096_v57 = vadd.f32 %v2840_v47, %v2315_v49  ;;  %v751_v58 = vsel %vm486_vm15, %v4111_v61, 0.0  ;;  %vm1011_vm0 = vcmp.eq.s32.totalorder %v4154_v28, %v4106_v52  ;;  %vm1792_vm1 = vcmp.eq.s32.totalorder %v4162_v32, %v4106_v52 }
  0x61   : > { %v2316_v59 = vadd.f32 %v2060_v54, %v1535_v53  ;;  %v1276_v60 = vsel %vm1011_vm0, %v4119_v3, 0.0  ;;  %v2057_v62 = vsel %vm1792_vm1, %v4127_v9, 0.0  ;;  %vm2573_vm2 = vcmp.eq.s32.totalorder %v4170_v36, %v4106_v52 }
  0x62   : > { %3335 = vmatpush.xpose.msra.mxu2 %v3096_v57  ;;  %v1532_v63 = vadd.f32 %v1276_v60, %v751_v58  ;;  %v2838_v6 = vsel %vm2573_vm2, %v4135_v14, 0.0  ;;  %vm487_vm3 = vcmp.eq.s32.totalorder %v4148_v24, %v4106_v52  ;;  %vm1012_vm4 = vcmp.eq.s32.totalorder %v4156_v29, %v4106_v52 }
  0x63   : > { %v3097_v7 = vadd.f32 %v2841_v55, %v2316_v59  ;;  %v752_v15 = vsel %vm487_vm3, %v4113_v0, 0.0  ;;  %v1277_v16 = vsel %vm1012_vm4, %v4121_v4, 0.0  ;;  %vm1793_vm6 = vcmp.eq.s32.totalorder %v4164_v33, %v4106_v52 }
  0x64   : > { %v2313_v17 = vadd.f32 %v2057_v62, %v1532_v63  ;;  %v1533_v19 = vadd.f32 %v1277_v16, %v752_v15  ;;  %v2058_v41 = vsel %vm1793_vm6, %v4129_v11, 0.0  ;;  %vm2574_vm7 = vcmp.eq.s32.totalorder %v4172_v37, %v4106_v52 }
  0x65   : > { %3355 = vmatpush.xpose.msra.mxu3 %v3097_v7  ;;  %v2839_v42 = vsel %vm2574_vm7, %v4137_v18, 0.0  ;;  %vm484_vm8 = vcmp.eq.s32.totalorder %v4150_v25, %v4109_v56  ;;  %vm1009_vm9 = vcmp.eq.s32.totalorder %v4158_v30, %v4109_v56  ;;  %vm1790_vm10 = vcmp.eq.s32.totalorder %v4166_v34, %v4109_v56 }
  0x66   : > { %v3094_v43 = vadd.f32 %v2838_v6, %v2313_v17  ;;  %v2314_v44 = vadd.f32 %v2058_v41, %v1533_v19  ;;  %v749_v45 = vsel %vm484_vm8, %v4115_v1, 0.0  ;;  %v1274_v51 = vsel %vm1009_vm9, %v4123_v5, 0.0 }
  0x67   : > { %v1530_v46 = vadd.f32 %v1274_v51, %v749_v45  ;;  %v2055_v52 = vsel %vm1790_vm10, %v4131_v12, 0.0  ;;  %vm2571_vm11 = vcmp.eq.s32.totalorder %v4174_v38, %v4109_v56  ;;  %vm485_vm12 = vcmp.eq.s32.totalorder %v4152_v27, %v4109_v56 }
  0x68   : > { %3295 = vmatpush.xpose.msra.mxu0 %v3094_v43  ;;  %v3095_v47 = vadd.f32 %v2839_v42, %v2314_v44  ;;  %v2836_v48 = vsel %vm2571_vm11, %v4139_v20, 0.0  ;;  %v750_v49 = vsel %vm485_vm12, %v4117_v2, 0.0  ;;  %vm1010_vm13 = vcmp.eq.s32.totalorder %v4160_v31, %v4109_v56 }
  0x69   : > { %v2311_v50 = vadd.f32 %v2055_v52, %v1530_v46  ;;  %v1275_v53 = vsel %vm1010_vm13, %v4125_v8, 0.0  ;;  %vm1791_vm14 = vcmp.eq.s32.totalorder %v4168_v35, %v4109_v56  ;;  %vm2572_vm15 = vcmp.eq.s32.totalorder %v4176_v40, %v4109_v56 }
  0x6a   : > { %3315 = vmatpush.xpose.msra.mxu1 %v3095_v47  ;;  %v1531_v54 = vadd.f32 %v1275_v53, %v750_v49  ;;  %v2056_v55 = vsel %vm1791_vm14, %v4133_v13, 0.0  ;;  %v2837_v57 = vsel %vm2572_vm15, %v4141_v21, 0.0  ;;  %vm482_vm0 = vcmp.eq.s32.totalorder %v4146_v23, %v4109_v56 }
  0x6b   : > { %v3092_v58 = vadd.f32 %v2836_v48, %v2311_v50  ;;  %v747_v59 = vsel %vm482_vm0, %v4111_v61, 0.0  ;;  %vm1007_vm1 = vcmp.eq.s32.totalorder %v4154_v28, %v4109_v56  ;;  %vm1788_vm2 = vcmp.eq.s32.totalorder %v4162_v32, %v4109_v56 }
  0x6c   : > { %v2312_v60 = vadd.f32 %v2056_v55, %v1531_v54  ;;  %v1272_v62 = vsel %vm1007_vm1, %v4119_v3, 0.0  ;;  %v2053_v63 = vsel %vm1788_vm2, %v4127_v9, 0.0  ;;  %vm2569_vm3 = vcmp.eq.s32.totalorder %v4170_v36, %v4109_v56 }
  0x6d   : > { %3336 = vmatpush.xpose.msra.mxu2 %v3092_v58  ;;  %v1528_v6 = vadd.f32 %v1272_v62, %v747_v59  ;;  %v2834_v7 = vsel %vm2569_vm3, %v4135_v14, 0.0  ;;  %vm483_vm4 = vcmp.eq.s32.totalorder %v4148_v24, %v4109_v56  ;;  %vm1008_vm6 = vcmp.eq.s32.totalorder %v4156_v29, %v4109_v56 }
  0x6e   : > { %v3093_v15 = vadd.f32 %v2837_v57, %v2312_v60  ;;  %v748_v16 = vsel %vm483_vm4, %v4113_v0, 0.0  ;;  %v1273_v17 = vsel %vm1008_vm6, %v4121_v4, 0.0  ;;  %vm1789_vm7 = vcmp.eq.s32.totalorder %v4164_v33, %v4109_v56 }
  0x6f   : > { %v2309_v19 = vadd.f32 %v2053_v63, %v1528_v6  ;;  %v1529_v41 = vadd.f32 %v1273_v17, %v748_v16  ;;  %v2054_v42 = vsel %vm1789_vm7, %v4129_v11, 0.0  ;;  %vm2570_vm8 = vcmp.eq.s32.totalorder %v4172_v37, %v4109_v56 }
  0x70   : > { %3356 = vmatpush.xpose.msra.mxu3 %v3093_v15  ;;  %v2835_v43 = vsel %vm2570_vm8, %v4137_v18, 0.0  ;;  %v374_v44 = vadd.s32 %v4099_v39, %v4144_v22  ;;  %v307_v45 = vadd.s32 88, %v4094_v26  ;;  %v306_v52 = vadd.s32 80, %v4094_v26 }
  0x71   : > { %v3090_v51 = vadd.f32 %v2834_v7, %v2309_v19  ;;  %v2310_v46 = vadd.f32 %v2054_v42, %v1529_v41  ;;  %v305_v47 = vadd.s32 72, %v4094_v26 }
  0x72   : > { %vm480_vm9 = vcmp.eq.s32.totalorder %v4150_v25, %v374_v44  ;;  %vm1005_vm10 = vcmp.eq.s32.totalorder %v4158_v30, %v374_v44  ;;  %vm1786_vm11 = vcmp.eq.s32.totalorder %v4166_v34, %v374_v44  ;;  %vm2567_vm12 = vcmp.eq.s32.totalorder %v4174_v38, %v374_v44 }
  0x73   : > { %3296 = vmatpush.xpose.msra.mxu0 %v3090_v51  ;;  %v3091_v56 = vadd.f32 %v2835_v43, %v2310_v46  ;;  %v745_v22 = vsel %vm480_vm9, %v4115_v1, 0.0  ;;  %v1270_v48 = vsel %vm1005_vm10, %v4123_v5, 0.0  ;;  %v2051_v49 = vsel %vm1786_vm11, %v4131_v12, 0.0 }
  0x74   : > { %v1526_v50 = vadd.f32 %v1270_v48, %v745_v22  ;;  %v2832_v53 = vsel %vm2567_vm12, %v4139_v20, 0.0  ;;  %vm481_vm13 = vcmp.eq.s32.totalorder %v4152_v27, %v374_v44  ;;  %vm1006_vm14 = vcmp.eq.s32.totalorder %v4160_v31, %v374_v44 }
  0x75   : > { %3316 = vmatpush.xpose.msra.mxu1 %v3091_v56  ;;  %v746_v54 = vsel %vm481_vm13, %v4117_v2, 0.0  ;;  %v1271_v55 = vsel %vm1006_vm14, %v4125_v8, 0.0  ;;  %vm1787_vm15 = vcmp.eq.s32.totalorder %v4168_v35, %v374_v44  ;;  %vm2568_vm0 = vcmp.eq.s32.totalorder %v4176_v40, %v374_v44 }
  0x76   : > { %v2307_v57 = vadd.f32 %v2051_v49, %v1526_v50  ;;  %v1527_v58 = vadd.f32 %v1271_v55, %v746_v54  ;;  %v2052_v59 = vsel %vm1787_vm15, %v4133_v13, 0.0  ;;  %v2833_v60 = vsel %vm2568_vm0, %v4141_v21, 0.0 }
  0x77   : > { %vm478_vm1 = vcmp.eq.s32.totalorder %v4146_v23, %v374_v44  ;;  %vm1003_vm2 = vcmp.eq.s32.totalorder %v4154_v28, %v374_v44  ;;  %vm1784_vm3 = vcmp.eq.s32.totalorder %v4162_v32, %v374_v44  ;;  %vm2565_vm4 = vcmp.eq.s32.totalorder %v4170_v36, %v374_v44 }
  0x78   : > { %v3088_v62 = vadd.f32 %v2832_v53, %v2307_v57  ;;  %v2308_v63 = vadd.f32 %v2052_v59, %v1527_v58  ;;  %v743_v6 = vsel %vm478_vm1, %v4111_v61, 0.0  ;;  %v1268_v7 = vsel %vm1003_vm2, %v4119_v3, 0.0 }
  0x79   : > { %v1524_v15 = vadd.f32 %v1268_v7, %v743_v6  ;;  %v2049_v16 = vsel %vm1784_vm3, %v4127_v9, 0.0  ;;  %v2830_v17 = vsel %vm2565_vm4, %v4135_v14, 0.0  ;;  %vm479_vm6 = vcmp.eq.s32.totalorder %v4148_v24, %v374_v44 }
  0x7a   : > { %3337 = vmatpush.xpose.msra.mxu2 %v3088_v62  ;;  %v3089_v19 = vadd.f32 %v2833_v60, %v2308_v63  ;;  %v744_v41 = vsel %vm479_vm6, %v4113_v0, 0.0  ;;  %vm1004_vm7 = vcmp.eq.s32.totalorder %v4156_v29, %v374_v44  ;;  %vm1785_vm8 = vcmp.eq.s32.totalorder %v4164_v33, %v374_v44 }
  0x7b   : > { %v2305_v42 = vadd.f32 %v2049_v16, %v1524_v15  ;;  %v1269_v43 = vsel %vm1004_vm7, %v4121_v4, 0.0  ;;  %v2050_v51 = vsel %vm1785_vm8, %v4129_v11, 0.0  ;;  %vm2566_vm9 = vcmp.eq.s32.totalorder %v4172_v37, %v374_v44 }
  0x7c   : > { %3357 = vmatpush.xpose.msra.mxu3 %v3089_v19  ;;  %v1525_v46 = vadd.f32 %v1269_v43, %v744_v41  ;;  %v2831_v56 = vsel %vm2566_vm9, %v4137_v18, 0.0  ;;  %v373_v22 = vadd.s32 %v4099_v39, %v307_v45  ;;  %v4361_v49 = vadd.s32 %v4099_v39, %v306_v52 }
  0x7d   : > { %v3086_v48 = vadd.f32 %v2830_v17, %v2305_v42  ;;  %v4364_v50 = vadd.s32 %v4099_v39, %v305_v47  ;;  %v4367_v53 = vadd.s32 64, %v4094_v26 }
  0x7e   : > { %v2306_v54 = vadd.f32 %v2050_v51, %v1525_v46  ;;  %vm476_vm10 = vcmp.eq.s32.totalorder %v4150_v25, %v373_v22  ;;  %vm1001_vm11 = vcmp.eq.s32.totalorder %v4158_v30, %v373_v22  ;;  %vm1782_vm12 = vcmp.eq.s32.totalorder %v4166_v34, %v373_v22 }
  0x7f   : > { %3297 = vmatpush.xpose.msra.mxu0 %v3086_v48  ;;  %v741_v44 = vsel %vm476_vm10, %v4115_v1, 0.0  ;;  %v1266_v45 = vsel %vm1001_vm11, %v4123_v5, 0.0  ;;  %v2047_v52 = vsel %vm1782_vm12, %v4131_v12, 0.0  ;;  %vm2563_vm13 = vcmp.eq.s32.totalorder %v4174_v38, %v373_v22 }
  0x80   : > { %v3087_v47 = vadd.f32 %v2831_v56, %v2306_v54  ;;  %v1522_v55 = vadd.f32 %v1266_v45, %v741_v44  ;;  %v2828_v57 = vsel %vm2563_vm13, %v4139_v20, 0.0  ;;  %vm477_vm14 = vcmp.eq.s32.totalorder %v4152_v27, %v373_v22 }
  0x81   : > { %v742_v58 = vsel %vm477_vm14, %v4117_v2, 0.0  ;;  %vm1002_vm15 = vcmp.eq.s32.totalorder %v4160_v31, %v373_v22  ;;  %vm1783_vm0 = vcmp.eq.s32.totalorder %v4168_v35, %v373_v22  ;;  %vm2564_vm1 = vcmp.eq.s32.totalorder %v4176_v40, %v373_v22 }
  0x82   : > { %3317 = vmatpush.xpose.msra.mxu1 %v3087_v47  ;;  %v2303_v59 = vadd.f32 %v2047_v52, %v1522_v55  ;;  %v1267_v60 = vsel %vm1002_vm15, %v4125_v8, 0.0  ;;  %v2048_v62 = vsel %vm1783_vm0, %v4133_v13, 0.0  ;;  %v2829_v63 = vsel %vm2564_vm1, %v4141_v21, 0.0 }
  0x83   : > { %v1523_v6 = vadd.f32 %v1267_v60, %v742_v58  ;;  %vm474_vm2 = vcmp.eq.s32.totalorder %v4146_v23, %v373_v22  ;;  %vm999_vm3 = vcmp.eq.s32.totalorder %v4154_v28, %v373_v22  ;;  %vm1780_vm4 = vcmp.eq.s32.totalorder %v4162_v32, %v373_v22 }
  0x84   : > { %v3084_v7 = vadd.f32 %v2828_v57, %v2303_v59  ;;  %v739_v15 = vsel %vm474_vm2, %v4111_v61, 0.0  ;;  %v1264_v16 = vsel %vm999_vm3, %v4119_v3, 0.0  ;;  %v2045_v17 = vsel %vm1780_vm4, %v4127_v9, 0.0 }
  0x85   : > { %v2304_v19 = vadd.f32 %v2048_v62, %v1523_v6  ;;  %v1520_v41 = vadd.f32 %v1264_v16, %v739_v15  ;;  %vm2561_vm6 = vcmp.eq.s32.totalorder %v4170_v36, %v373_v22  ;;  %vm475_vm7 = vcmp.eq.s32.totalorder %v4148_v24, %v373_v22 }
  0x86   : > { %3338 = vmatpush.xpose.msra.mxu2 %v3084_v7  ;;  %v2826_v42 = vsel %vm2561_vm6, %v4135_v14, 0.0  ;;  %v740_v43 = vsel %vm475_vm7, %v4113_v0, 0.0  ;;  %vm1000_vm8 = vcmp.eq.s32.totalorder %v4156_v29, %v373_v22  ;;  %vm1781_vm9 = vcmp.eq.s32.totalorder %v4164_v33, %v373_v22 }
  0x87   : > { %v3085_v51 = vadd.f32 %v2829_v63, %v2304_v19  ;;  %v2301_v46 = vadd.f32 %v2045_v17, %v1520_v41  ;;  %v1265_v56 = vsel %vm1000_vm8, %v4121_v4, 0.0  ;;  %v2046_v48 = vsel %vm1781_vm9, %v4129_v11, 0.0 }
  0x88   : > { %v1521_v54 = vadd.f32 %v1265_v56, %v740_v43  ;;  %vm2562_vm10 = vcmp.eq.s32.totalorder %v4172_v37, %v373_v22  ;;  %vm472_vm11 = vcmp.eq.s32.totalorder %v4150_v25, %v4361_v49  ;;  %vm997_vm12 = vcmp.eq.s32.totalorder %v4158_v30, %v4361_v49 }
  0x89   : > { %3358 = vmatpush.xpose.msra.mxu3 %v3085_v51  ;;  %v3082_v44 = vadd.f32 %v2826_v42, %v2301_v46  ;;  %v2827_v45 = vsel %vm2562_vm10, %v4137_v18, 0.0  ;;  %v737_v52 = vsel %vm472_vm11, %v4115_v1, 0.0  ;;  %v1262_v47 = vsel %vm997_vm12, %v4123_v5, 0.0 }
  0x8a   : > { %v2302_v55 = vadd.f32 %v2046_v48, %v1521_v54  ;;  %v1518_v57 = vadd.f32 %v1262_v47, %v737_v52  ;;  %vm1778_vm13 = vcmp.eq.s32.totalorder %v4166_v34, %v4361_v49  ;;  %vm2559_vm14 = vcmp.eq.s32.totalorder %v4174_v38, %v4361_v49 }
  0x8b   : > { %3298 = vmatpush.xpose.msra.mxu0 %v3082_v44  ;;  %v2043_v22 = vsel %vm1778_vm13, %v4131_v12, 0.0  ;;  %v2824_v58 = vsel %vm2559_vm14, %v4139_v20, 0.0  ;;  %vm473_vm15 = vcmp.eq.s32.totalorder %v4152_v27, %v4361_v49  ;;  %vm998_vm0 = vcmp.eq.s32.totalorder %v4160_v31, %v4361_v49 }
  0x8c   : > { %v3083_v59 = vadd.f32 %v2827_v45, %v2302_v55  ;;  %v2299_v60 = vadd.f32 %v2043_v22, %v1518_v57  ;;  %v738_v62 = vsel %vm473_vm15, %v4117_v2, 0.0  ;;  %v1263_v63 = vsel %vm998_vm0, %v4125_v8, 0.0 }
  0x8d   : > { %v1519_v6 = vadd.f32 %v1263_v63, %v738_v62  ;;  %vm1779_vm1 = vcmp.eq.s32.totalorder %v4168_v35, %v4361_v49  ;;  %vm2560_vm2 = vcmp.eq.s32.totalorder %v4176_v40, %v4361_v49  ;;  %vm470_vm3 = vcmp.eq.s32.totalorder %v4146_v23, %v4361_v49 }
  0x8e   : > { %3318 = vmatpush.xpose.msra.mxu1 %v3083_v59  ;;  %v3080_v7 = vadd.f32 %v2824_v58, %v2299_v60  ;;  %v2044_v15 = vsel %vm1779_vm1, %v4133_v13, 0.0  ;;  %v2825_v16 = vsel %vm2560_vm2, %v4141_v21, 0.0  ;;  %v735_v17 = vsel %vm470_vm3, %v4111_v61, 0.0 }
  0x8f   : > { %v2300_v19 = vadd.f32 %v2044_v15, %v1519_v6  ;;  %vm995_vm4 = vcmp.eq.s32.totalorder %v4154_v28, %v4361_v49  ;;  %vm1776_vm6 = vcmp.eq.s32.totalorder %v4162_v32, %v4361_v49  ;;  %vm2557_vm7 = vcmp.eq.s32.totalorder %v4170_v36, %v4361_v49 }
  0x90   : > { %3339 = vmatpush.xpose.msra.mxu2 %v3080_v7  ;;  %v1260_v41 = vsel %vm995_vm4, %v4119_v3, 0.0  ;;  %v2041_v42 = vsel %vm1776_vm6, %v4127_v9, 0.0  ;;  %v2822_v43 = vsel %vm2557_vm7, %v4135_v14, 0.0  ;;  %vm471_vm8 = vcmp.eq.s32.totalorder %v4148_v24, %v4361_v49 }
  0x91   : > { %v3081_v51 = vadd.f32 %v2825_v16, %v2300_v19  ;;  %v1516_v46 = vadd.f32 %v1260_v41, %v735_v17  ;;  %v736_v56 = vsel %vm471_vm8, %v4113_v0, 0.0  ;;  %vm996_vm9 = vcmp.eq.s32.totalorder %v4156_v29, %v4361_v49 }
  0x92   : > { %v1261_v48 = vsel %vm996_vm9, %v4121_v4, 0.0  ;;  %vm1777_vm10 = vcmp.eq.s32.totalorder %v4164_v33, %v4361_v49  ;;  %vm2558_vm11 = vcmp.eq.s32.totalorder %v4172_v37, %v4361_v49  ;;  %vm468_vm12 = vcmp.eq.s32.totalorder %v4150_v25, %v4364_v50 }
  0x93   : > { %3359 = vmatpush.xpose.msra.mxu3 %v3081_v51  ;;  %v2297_v54 = vadd.f32 %v2041_v42, %v1516_v46  ;;  %v1517_v44 = vadd.f32 %v1261_v48, %v736_v56  ;;  %v2042_v45 = vsel %vm1777_vm10, %v4129_v11, 0.0  ;;  %v2823_v52 = vsel %vm2558_vm11, %v4137_v18, 0.0 }
  0x94   : > { %v733_v47 = vsel %vm468_vm12, %v4115_v1, 0.0  ;;  %vm993_vm13 = vcmp.eq.s32.totalorder %v4158_v30, %v4364_v50  ;;  %vm1774_vm14 = vcmp.eq.s32.totalorder %v4166_v34, %v4364_v50  ;;  %vm2555_vm15 = vcmp.eq.s32.totalorder %v4174_v38, %v4364_v50 }
  0x95   : > { %v3078_v49 = vadd.f32 %v2822_v43, %v2297_v54  ;;  %v2298_v55 = vadd.f32 %v2042_v45, %v1517_v44  ;;  %v1258_v57 = vsel %vm993_vm13, %v4123_v5, 0.0  ;;  %v2039_v22 = vsel %vm1774_vm14, %v4131_v12, 0.0 }
  0x96   : > { %v1514_v58 = vadd.f32 %v1258_v57, %v733_v47  ;;  %v2820_v59 = vsel %vm2555_vm15, %v4139_v20, 0.0  ;;  %vm469_vm0 = vcmp.eq.s32.totalorder %v4152_v27, %v4364_v50  ;;  %vm994_vm1 = vcmp.eq.s32.totalorder %v4160_v31, %v4364_v50 }
  0x97   : > { %3299 = vmatpush.xpose.msra.mxu0 %v3078_v49  ;;  %v3079_v60 = vadd.f32 %v2823_v52, %v2298_v55  ;;  %v734_v62 = vsel %vm469_vm0, %v4117_v2, 0.0  ;;  %v1259_v63 = vsel %vm994_vm1, %v4125_v8, 0.0  ;;  %vm1775_vm2 = vcmp.eq.s32.totalorder %v4168_v35, %v4364_v50 }
  0x98   : > { %v2295_v6 = vadd.f32 %v2039_v22, %v1514_v58  ;;  %v1515_v7 = vadd.f32 %v1259_v63, %v734_v62  ;;  %v2040_v15 = vsel %vm1775_vm2, %v4133_v13, 0.0  ;;  %vm2556_vm3 = vcmp.eq.s32.totalorder %v4176_v40, %v4364_v50 }
  0x99   : > { %3319 = vmatpush.xpose.msra.mxu1 %v3079_v60  ;;  %v2821_v16 = vsel %vm2556_vm3, %v4141_v21, 0.0  ;;  %vm466_vm4 = vcmp.eq.s32.totalorder %v4146_v23, %v4364_v50  ;;  %vm991_vm6 = vcmp.eq.s32.totalorder %v4154_v28, %v4364_v50  ;;  %vm1772_vm7 = vcmp.eq.s32.totalorder %v4162_v32, %v4364_v50 }
  0x9a   : > { %v3076_v17 = vadd.f32 %v2820_v59, %v2295_v6  ;;  %v2296_v19 = vadd.f32 %v2040_v15, %v1515_v7  ;;  %v731_v41 = vsel %vm466_vm4, %v4111_v61, 0.0  ;;  %v1256_v42 = vsel %vm991_vm6, %v4119_v3, 0.0 }
  0x9b   : > { %v1512_v43 = vadd.f32 %v1256_v42, %v731_v41  ;;  %v2037_v51 = vsel %vm1772_vm7, %v4127_v9, 0.0  ;;  %vm2553_vm8 = vcmp.eq.s32.totalorder %v4170_v36, %v4364_v50  ;;  %vm467_vm9 = vcmp.eq.s32.totalorder %v4148_v24, %v4364_v50 }
  0x9c   : > { %3340 = vmatpush.xpose.msra.mxu2 %v3076_v17  ;;  %v3077_v46 = vadd.f32 %v2821_v16, %v2296_v19  ;;  %v2818_v56 = vsel %vm2553_vm8, %v4135_v14, 0.0  ;;  %v732_v48 = vsel %vm467_vm9, %v4113_v0, 0.0  ;;  %vm992_vm10 = vcmp.eq.s32.totalorder %v4156_v29, %v4364_v50 }
  0x9d   : > { %v2293_v54 = vadd.f32 %v2037_v51, %v1512_v43  ;;  %v1257_v44 = vsel %vm992_vm10, %v4121_v4, 0.0  ;;  %vm1773_vm11 = vcmp.eq.s32.totalorder %v4164_v33, %v4364_v50  ;;  %vm2554_vm12 = vcmp.eq.s32.totalorder %v4172_v37, %v4364_v50 }
  0x9e   : > { %3360 = vmatpush.xpose.msra.mxu3 %v3077_v46  ;;  %v1513_v45 = vadd.f32 %v1257_v44, %v732_v48  ;;  %v2038_v52 = vsel %vm1773_vm11, %v4129_v11, 0.0  ;;  %v2819_v47 = vsel %vm2554_vm12, %v4137_v18, 0.0  ;;  %v370_v49 = vadd.s32 %v4099_v39, %v4367_v53 }
  0x9f   : > { %v3074_v55 = vadd.f32 %v2818_v56, %v2293_v54  ;;  %v303_v57 = vadd.s32 56, %v4094_v26  ;;  %v302_v22 = vadd.s32 48, %v4094_v26  ;;  %v301_v58 = vadd.s32 40, %v4094_v26 }
  0xa0   : > { %v2294_v59 = vadd.f32 %v2038_v52, %v1513_v45  ;;  %vm464_vm13 = vcmp.eq.s32.totalorder %v4150_v25, %v370_v49  ;;  %vm989_vm14 = vcmp.eq.s32.totalorder %v4158_v30, %v370_v49  ;;  %vm1770_vm15 = vcmp.eq.s32.totalorder %v4166_v34, %v370_v49 }
  0xa1   : > { %3300 = vmatpush.xpose.msra.mxu0 %v3074_v55  ;;  %v729_v50 = vsel %vm464_vm13, %v4115_v1, 0.0  ;;  %v1254_v60 = vsel %vm989_vm14, %v4123_v5, 0.0  ;;  %v2035_v53 = vsel %vm1770_vm15, %v4131_v12, 0.0  ;;  %vm2551_vm0 = vcmp.eq.s32.totalorder %v4174_v38, %v370_v49 }
  0xa2   : > { %v3075_v62 = vadd.f32 %v2819_v47, %v2294_v59  ;;  %v1510_v63 = vadd.f32 %v1254_v60, %v729_v50  ;;  %v2816_v6 = vsel %vm2551_vm0, %v4139_v20, 0.0  ;;  %vm465_vm1 = vcmp.eq.s32.totalorder %v4152_v27, %v370_v49 }
  0xa3   : > { %v730_v7 = vsel %vm465_vm1, %v4117_v2, 0.0  ;;  %vm990_vm2 = vcmp.eq.s32.totalorder %v4160_v31, %v370_v49  ;;  %vm1771_vm3 = vcmp.eq.s32.totalorder %v4168_v35, %v370_v49  ;;  %vm2552_vm4 = vcmp.eq.s32.totalorder %v4176_v40, %v370_v49 }
  0xa4   : > { %3320 = vmatpush.xpose.msra.mxu1 %v3075_v62  ;;  %v2291_v15 = vadd.f32 %v2035_v53, %v1510_v63  ;;  %v1255_v16 = vsel %vm990_vm2, %v4125_v8, 0.0  ;;  %v2036_v17 = vsel %vm1771_vm3, %v4133_v13, 0.0  ;;  %v2817_v19 = vsel %vm2552_vm4, %v4141_v21, 0.0 }
  0xa5   : > { %v1511_v41 = vadd.f32 %v1255_v16, %v730_v7  ;;  %vm462_vm6 = vcmp.eq.s32.totalorder %v4146_v23, %v370_v49  ;;  %vm987_vm7 = vcmp.eq.s32.totalorder %v4154_v28, %v370_v49  ;;  %vm1768_vm8 = vcmp.eq.s32.totalorder %v4162_v32, %v370_v49 }
  0xa6   : > { %v3072_v42 = vadd.f32 %v2816_v6, %v2291_v15  ;;  %v727_v43 = vsel %vm462_vm6, %v4111_v61, 0.0  ;;  %v1252_v51 = vsel %vm987_vm7, %v4119_v3, 0.0  ;;  %v2033_v46 = vsel %vm1768_vm8, %v4127_v9, 0.0 }
  0xa7   : > { %v2292_v56 = vadd.f32 %v2036_v17, %v1511_v41  ;;  %v1508_v48 = vadd.f32 %v1252_v51, %v727_v43  ;;  %vm2549_vm9 = vcmp.eq.s32.totalorder %v4170_v36, %v370_v49  ;;  %vm463_vm10 = vcmp.eq.s32.totalorder %v4148_v24, %v370_v49 }
  0xa8   : > { %3341 = vmatpush.xpose.msra.mxu2 %v3072_v42  ;;  %v2814_v54 = vsel %vm2549_vm9, %v4135_v14, 0.0  ;;  %v728_v44 = vsel %vm463_vm10, %v4113_v0, 0.0  ;;  %vm988_vm11 = vcmp.eq.s32.totalorder %v4156_v29, %v370_v49  ;;  %vm1769_vm12 = vcmp.eq.s32.totalorder %v4164_v33, %v370_v49 }
  0xa9   : > { %v3073_v45 = vadd.f32 %v2817_v19, %v2292_v56  ;;  %v2289_v52 = vadd.f32 %v2033_v46, %v1508_v48  ;;  %v1253_v47 = vsel %vm988_vm11, %v4121_v4, 0.0  ;;  %v2034_v55 = vsel %vm1769_vm12, %v4129_v11, 0.0 }
  0xaa   : > { %v1509_v59 = vadd.f32 %v1253_v47, %v728_v44  ;;  %vm2550_vm13 = vcmp.eq.s32.totalorder %v4172_v37, %v370_v49  ;;  %v369_v50 = vadd.s32 %v4099_v39, %v303_v57  ;;  %v4535_v60 = vadd.s32 %v4099_v39, %v302_v22 }
  0xab   : > { %3361 = vmatpush.xpose.msra.mxu3 %v3073_v45  ;;  %v3070_v53 = vadd.f32 %v2814_v54, %v2289_v52  ;;  %v2815_v62 = vsel %vm2550_vm13, %v4137_v18, 0.0  ;;  %v4539_v63 = vadd.s32 %v4099_v39, %v301_v58  ;;  %v4542_v6 = vadd.s32 32, %v4094_v26 }
  0xac   : > { %v2290_v7 = vadd.f32 %v2034_v55, %v1509_v59  ;;  %vm460_vm14 = vcmp.eq.s32.totalorder %v4150_v25, %v369_v50  ;;  %vm985_vm15 = vcmp.eq.s32.totalorder %v4158_v30, %v369_v50  ;;  %vm1766_vm0 = vcmp.eq.s32.totalorder %v4166_v34, %v369_v50 }
  0xad   : > { %3301 = vmatpush.xpose.msra.mxu0 %v3070_v53  ;;  %v725_v49 = vsel %vm460_vm14, %v4115_v1, 0.0  ;;  %v1250_v57 = vsel %vm985_vm15, %v4123_v5, 0.0  ;;  %v2031_v22 = vsel %vm1766_vm0, %v4131_v12, 0.0  ;;  %vm2547_vm1 = vcmp.eq.s32.totalorder %v4174_v38, %v369_v50 }
  0xae   : > { %v3071_v58 = vadd.f32 %v2815_v62, %v2290_v7  ;;  %v1506_v15 = vadd.f32 %v1250_v57, %v725_v49  ;;  %v2812_v16 = vsel %vm2547_vm1, %v4139_v20, 0.0  ;;  %vm461_vm2 = vcmp.eq.s32.totalorder %v4152_v27, %v369_v50 }
  0xaf   : > { %v726_v17 = vsel %vm461_vm2, %v4117_v2, 0.0  ;;  %vm986_vm3 = vcmp.eq.s32.totalorder %v4160_v31, %v369_v50  ;;  %vm1767_vm4 = vcmp.eq.s32.totalorder %v4168_v35, %v369_v50  ;;  %vm2548_vm6 = vcmp.eq.s32.totalorder %v4176_v40, %v369_v50 }
  0xb0   : > { %3321 = vmatpush.xpose.msra.mxu1 %v3071_v58  ;;  %v2287_v19 = vadd.f32 %v2031_v22, %v1506_v15  ;;  %v1251_v41 = vsel %vm986_vm3, %v4125_v8, 0.0  ;;  %v2032_v42 = vsel %vm1767_vm4, %v4133_v13, 0.0  ;;  %v2813_v43 = vsel %vm2548_vm6, %v4141_v21, 0.0 }
  0xb1   : > { %v1507_v51 = vadd.f32 %v1251_v41, %v726_v17  ;;  %vm458_vm7 = vcmp.eq.s32.totalorder %v4146_v23, %v369_v50  ;;  %vm983_vm8 = vcmp.eq.s32.totalorder %v4154_v28, %v369_v50  ;;  %vm1764_vm9 = vcmp.eq.s32.totalorder %v4162_v32, %v369_v50 }
  0xb2   : > { %v3068_v46 = vadd.f32 %v2812_v16, %v2287_v19  ;;  %v723_v56 = vsel %vm458_vm7, %v4111_v61, 0.0  ;;  %v1248_v48 = vsel %vm983_vm8, %v4119_v3, 0.0  ;;  %v2029_v54 = vsel %vm1764_vm9, %v4127_v9, 0.0 }
  0xb3   : > { %v2288_v44 = vadd.f32 %v2032_v42, %v1507_v51  ;;  %v1504_v45 = vadd.f32 %v1248_v48, %v723_v56  ;;  %vm2545_vm10 = vcmp.eq.s32.totalorder %v4170_v36, %v369_v50  ;;  %vm459_vm11 = vcmp.eq.s32.totalorder %v4148_v24, %v369_v50 }
  0xb4   : > { %3342 = vmatpush.xpose.msra.mxu2 %v3068_v46  ;;  %v2810_v52 = vsel %vm2545_vm10, %v4135_v14, 0.0  ;;  %v724_v47 = vsel %vm459_vm11, %v4113_v0, 0.0  ;;  %vm984_vm12 = vcmp.eq.s32.totalorder %v4156_v29, %v369_v50  ;;  %vm1765_vm13 = vcmp.eq.s32.totalorder %v4164_v33, %v369_v50 }
  0xb5   : > { %v3069_v55 = vadd.f32 %v2813_v43, %v2288_v44  ;;  %v2285_v59 = vadd.f32 %v2029_v54, %v1504_v45  ;;  %v1249_v53 = vsel %vm984_vm12, %v4121_v4, 0.0  ;;  %v2030_v62 = vsel %vm1765_vm13, %v4129_v11, 0.0 }
  0xb6   : > { %v1505_v7 = vadd.f32 %v1249_v53, %v724_v47  ;;  %vm2546_vm14 = vcmp.eq.s32.totalorder %v4172_v37, %v369_v50  ;;  %vm456_vm15 = vcmp.eq.s32.totalorder %v4150_v25, %v4535_v60  ;;  %vm981_vm0 = vcmp.eq.s32.totalorder %v4158_v30, %v4535_v60 }
  0xb7   : > { %3362 = vmatpush.xpose.msra.mxu3 %v3069_v55  ;;  %v3066_v49 = vadd.f32 %v2810_v52, %v2285_v59  ;;  %v2811_v57 = vsel %vm2546_vm14, %v4137_v18, 0.0  ;;  %v721_v22 = vsel %vm456_vm15, %v4115_v1, 0.0  ;;  %v1246_v58 = vsel %vm981_vm0, %v4123_v5, 0.0 }
  0xb8   : > { %v2286_v15 = vadd.f32 %v2030_v62, %v1505_v7  ;;  %v1502_v16 = vadd.f32 %v1246_v58, %v721_v22  ;;  %vm1762_vm1 = vcmp.eq.s32.totalorder %v4166_v34, %v4535_v60  ;;  %vm2543_vm2 = vcmp.eq.s32.totalorder %v4174_v38, %v4535_v60 }
  0xb9   : > { %3302 = vmatpush.xpose.msra.mxu0 %v3066_v49  ;;  %v2027_v50 = vsel %vm1762_vm1, %v4131_v12, 0.0  ;;  %v2808_v17 = vsel %vm2543_vm2, %v4139_v20, 0.0  ;;  %vm457_vm3 = vcmp.eq.s32.totalorder %v4152_v27, %v4535_v60  ;;  %vm982_vm4 = vcmp.eq.s32.totalorder %v4160_v31, %v4535_v60 }
  0xba   : > { %v3067_v19 = vadd.f32 %v2811_v57, %v2286_v15  ;;  %v2283_v41 = vadd.f32 %v2027_v50, %v1502_v16  ;;  %v722_v42 = vsel %vm457_vm3, %v4117_v2, 0.0  ;;  %v1247_v43 = vsel %vm982_vm4, %v4125_v8, 0.0 }
  0xbb   : > { %v1503_v51 = vadd.f32 %v1247_v43, %v722_v42  ;;  %vm1763_vm6 = vcmp.eq.s32.totalorder %v4168_v35, %v4535_v60  ;;  %vm2544_vm7 = vcmp.eq.s32.totalorder %v4176_v40, %v4535_v60  ;;  %vm454_vm8 = vcmp.eq.s32.totalorder %v4146_v23, %v4535_v60 }
  0xbc   : > { %3322 = vmatpush.xpose.msra.mxu1 %v3067_v19  ;;  %v3064_v46 = vadd.f32 %v2808_v17, %v2283_v41  ;;  %v2028_v56 = vsel %vm1763_vm6, %v4133_v13, 0.0  ;;  %v2809_v48 = vsel %vm2544_vm7, %v4141_v21, 0.0  ;;  %v719_v54 = vsel %vm454_vm8, %v4111_v61, 0.0 }
  0xbd   : > { %v2284_v44 = vadd.f32 %v2028_v56, %v1503_v51  ;;  %vm979_vm9 = vcmp.eq.s32.totalorder %v4154_v28, %v4535_v60  ;;  %vm1760_vm10 = vcmp.eq.s32.totalorder %v4162_v32, %v4535_v60  ;;  %vm2541_vm11 = vcmp.eq.s32.totalorder %v4170_v36, %v4535_v60 }
  0xbe   : > { %3343 = vmatpush.xpose.msra.mxu2 %v3064_v46  ;;  %v1244_v45 = vsel %vm979_vm9, %v4119_v3, 0.0  ;;  %v2025_v52 = vsel %vm1760_vm10, %v4127_v9, 0.0  ;;  %v2806_v47 = vsel %vm2541_vm11, %v4135_v14, 0.0  ;;  %vm455_vm12 = vcmp.eq.s32.totalorder %v4148_v24, %v4535_v60 }
  0xbf   : > { %v3065_v55 = vadd.f32 %v2809_v48, %v2284_v44  ;;  %v1500_v59 = vadd.f32 %v1244_v45, %v719_v54  ;;  %v720_v53 = vsel %vm455_vm12, %v4113_v0, 0.0  ;;  %vm980_vm13 = vcmp.eq.s32.totalorder %v4156_v29, %v4535_v60 }
  0xc0   : > { %v1245_v62 = vsel %vm980_vm13, %v4121_v4, 0.0  ;;  %vm1761_vm14 = vcmp.eq.s32.totalorder %v4164_v33, %v4535_v60  ;;  %vm2542_vm15 = vcmp.eq.s32.totalorder %v4172_v37, %v4535_v60  ;;  %vm452_vm0 = vcmp.eq.s32.totalorder %v4150_v25, %v4539_v63 }
  0xc1   : > { %3363 = vmatpush.xpose.msra.mxu3 %v3065_v55  ;;  %v2281_v7 = vadd.f32 %v2025_v52, %v1500_v59  ;;  %v1501_v49 = vadd.f32 %v1245_v62, %v720_v53  ;;  %v2026_v57 = vsel %vm1761_vm14, %v4129_v11, 0.0  ;;  %v2807_v22 = vsel %vm2542_vm15, %v4137_v18, 0.0 }
  0xc2   : > { %v717_v58 = vsel %vm452_vm0, %v4115_v1, 0.0  ;;  %vm977_vm1 = vcmp.eq.s32.totalorder %v4158_v30, %v4539_v63  ;;  %vm1758_vm2 = vcmp.eq.s32.totalorder %v4166_v34, %v4539_v63  ;;  %vm2539_vm3 = vcmp.eq.s32.totalorder %v4174_v38, %v4539_v63 }
  0xc3   : > { %v3062_v60 = vadd.f32 %v2806_v47, %v2281_v7  ;;  %v2282_v15 = vadd.f32 %v2026_v57, %v1501_v49  ;;  %v1242_v16 = vsel %vm977_vm1, %v4123_v5, 0.0  ;;  %v2023_v50 = vsel %vm1758_vm2, %v4131_v12, 0.0 }
  0xc4   : > { %v1498_v17 = vadd.f32 %v1242_v16, %v717_v58  ;;  %v2804_v19 = vsel %vm2539_vm3, %v4139_v20, 0.0  ;;  %vm453_vm4 = vcmp.eq.s32.totalorder %v4152_v27, %v4539_v63  ;;  %vm978_vm6 = vcmp.eq.s32.totalorder %v4160_v31, %v4539_v63 }
  0xc5   : > { %3303 = vmatpush.xpose.msra.mxu0 %v3062_v60  ;;  %v3063_v41 = vadd.f32 %v2807_v22, %v2282_v15  ;;  %v718_v42 = vsel %vm453_vm4, %v4117_v2, 0.0  ;;  %v1243_v43 = vsel %vm978_vm6, %v4125_v8, 0.0  ;;  %vm1759_vm7 = vcmp.eq.s32.totalorder %v4168_v35, %v4539_v63 }
  0xc6   : > { %v2279_v51 = vadd.f32 %v2023_v50, %v1498_v17  ;;  %v1499_v46 = vadd.f32 %v1243_v43, %v718_v42  ;;  %v2024_v56 = vsel %vm1759_vm7, %v4133_v13, 0.0  ;;  %vm2540_vm8 = vcmp.eq.s32.totalorder %v4176_v40, %v4539_v63 }
  0xc7   : > { %3323 = vmatpush.xpose.msra.mxu1 %v3063_v41  ;;  %v2805_v48 = vsel %vm2540_vm8, %v4141_v21, 0.0  ;;  %vm450_vm9 = vcmp.eq.s32.totalorder %v4146_v23, %v4539_v63  ;;  %vm975_vm10 = vcmp.eq.s32.totalorder %v4154_v28, %v4539_v63  ;;  %vm1756_vm11 = vcmp.eq.s32.totalorder %v4162_v32, %v4539_v63 }
  0xc8   : > { %v3060_v54 = vadd.f32 %v2804_v19, %v2279_v51  ;;  %v2280_v44 = vadd.f32 %v2024_v56, %v1499_v46  ;;  %v715_v45 = vsel %vm450_vm9, %v4111_v61, 0.0  ;;  %v1240_v52 = vsel %vm975_vm10, %v4119_v3, 0.0 }
  0xc9   : > { %v1496_v47 = vadd.f32 %v1240_v52, %v715_v45  ;;  %v2021_v55 = vsel %vm1756_vm11, %v4127_v9, 0.0  ;;  %vm2537_vm12 = vcmp.eq.s32.totalorder %v4170_v36, %v4539_v63  ;;  %vm451_vm13 = vcmp.eq.s32.totalorder %v4148_v24, %v4539_v63 }
  0xca   : > { %3344 = vmatpush.xpose.msra.mxu2 %v3060_v54  ;;  %v3061_v59 = vadd.f32 %v2805_v48, %v2280_v44  ;;  %v2802_v53 = vsel %vm2537_vm12, %v4135_v14, 0.0  ;;  %v716_v62 = vsel %vm451_vm13, %v4113_v0, 0.0  ;;  %vm976_vm14 = vcmp.eq.s32.totalorder %v4156_v29, %v4539_v63 }
  0xcb   : > { %v2277_v7 = vadd.f32 %v2021_v55, %v1496_v47  ;;  %v1241_v49 = vsel %vm976_vm14, %v4121_v4, 0.0  ;;  %vm1757_vm15 = vcmp.eq.s32.totalorder %v4164_v33, %v4539_v63  ;;  %vm2538_vm0 = vcmp.eq.s32.totalorder %v4172_v37, %v4539_v63 }
  0xcc   : > { %3364 = vmatpush.xpose.msra.mxu3 %v3061_v59  ;;  %v1497_v57 = vadd.f32 %v1241_v49, %v716_v62  ;;  %v2022_v22 = vsel %vm1757_vm15, %v4129_v11, 0.0  ;;  %v2803_v58 = vsel %vm2538_vm0, %v4137_v18, 0.0  ;;  %v366_v60 = vadd.s32 %v4099_v39, %v4542_v6 }
  0xcd   : > { %v3058_v15 = vadd.f32 %v2802_v53, %v2277_v7  ;;  %v299_v16 = vadd.s32 24, %v4094_v26  ;;  %v298_v50 = vadd.s32 16, %v4094_v26  ;;  %v297_v17 = vadd.s32 8, %v4094_v26 }
  0xce   : > { %v2278_v19 = vadd.f32 %v2022_v22, %v1497_v57  ;;  %vm448_vm1 = vcmp.eq.s32.totalorder %v4150_v25, %v366_v60  ;;  %vm973_vm2 = vcmp.eq.s32.totalorder %v4158_v30, %v366_v60  ;;  %vm1754_vm3 = vcmp.eq.s32.totalorder %v4166_v34, %v366_v60 }
  0xcf   : > { %3304 = vmatpush.xpose.msra.mxu0 %v3058_v15  ;;  %v713_v63 = vsel %vm448_vm1, %v4115_v1, 0.0  ;;  %v1238_v41 = vsel %vm973_vm2, %v4123_v5, 0.0  ;;  %v2019_v6 = vsel %vm1754_vm3, %v4131_v12, 0.0  ;;  %vm2535_vm4 = vcmp.eq.s32.totalorder %v4174_v38, %v366_v60 }
  0xd0   : > { %v3059_v42 = vadd.f32 %v2803_v58, %v2278_v19  ;;  %v1494_v43 = vadd.f32 %v1238_v41, %v713_v63  ;;  %v2800_v51 = vsel %vm2535_vm4, %v4139_v20, 0.0  ;;  %vm449_vm6 = vcmp.eq.s32.totalorder %v4152_v27, %v366_v60 }
  0xd1   : > { %v714_v46 = vsel %vm449_vm6, %v4117_v2, 0.0  ;;  %vm974_vm7 = vcmp.eq.s32.totalorder %v4160_v31, %v366_v60  ;;  %vm1755_vm8 = vcmp.eq.s32.totalorder %v4168_v35, %v366_v60  ;;  %vm2536_vm9 = vcmp.eq.s32.totalorder %v4176_v40, %v366_v60 }
  0xd2   : > { %3324 = vmatpush.xpose.msra.mxu1 %v3059_v42  ;;  %v2275_v56 = vadd.f32 %v2019_v6, %v1494_v43  ;;  %v1239_v48 = vsel %vm974_vm7, %v4125_v8, 0.0  ;;  %v2020_v54 = vsel %vm1755_vm8, %v4133_v13, 0.0  ;;  %v2801_v44 = vsel %vm2536_vm9, %v4141_v21, 0.0 }
  0xd3   : > { %v1495_v45 = vadd.f32 %v1239_v48, %v714_v46  ;;  %vm446_vm10 = vcmp.eq.s32.totalorder %v4146_v23, %v366_v60  ;;  %vm971_vm11 = vcmp.eq.s32.totalorder %v4154_v28, %v366_v60  ;;  %vm1752_vm12 = vcmp.eq.s32.totalorder %v4162_v32, %v366_v60 }
  0xd4   : > { %v3056_v52 = vadd.f32 %v2800_v51, %v2275_v56  ;;  %v711_v47 = vsel %vm446_vm10, %v4111_v61, 0.0  ;;  %v1236_v55 = vsel %vm971_vm11, %v4119_v3, 0.0  ;;  %v2017_v59 = vsel %vm1752_vm12, %v4127_v9, 0.0 }
  0xd5   : > { %v2276_v53 = vadd.f32 %v2020_v54, %v1495_v45  ;;  %v1492_v62 = vadd.f32 %v1236_v55, %v711_v47  ;;  %vm2533_vm13 = vcmp.eq.s32.totalorder %v4170_v36, %v366_v60  ;;  %vm447_vm14 = vcmp.eq.s32.totalorder %v4148_v24, %v366_v60 }
  0xd6   : > { %3345 = vmatpush.xpose.msra.mxu2 %v3056_v52  ;;  %v2798_v7 = vsel %vm2533_vm13, %v4135_v14, 0.0  ;;  %v712_v49 = vsel %vm447_vm14, %v4113_v0, 0.0  ;;  %vm972_vm15 = vcmp.eq.s32.totalorder %v4156_v29, %v366_v60  ;;  %vm1753_vm0 = vcmp.eq.s32.totalorder %v4164_v33, %v366_v60 }
  0xd7   : > { %v3057_v57 = vadd.f32 %v2801_v44, %v2276_v53  ;;  %v2273_v22 = vadd.f32 %v2017_v59, %v1492_v62  ;;  %v1237_v58 = vsel %vm972_vm15, %v4121_v4, 0.0  ;;  %v2018_v15 = vsel %vm1753_vm0, %v4129_v11, 0.0 }
  0xd8   : > { %v1493_v19 = vadd.f32 %v1237_v58, %v712_v49  ;;  %vm2534_vm1 = vcmp.eq.s32.totalorder %v4172_v37, %v366_v60  ;;  %v365_v63 = vadd.s32 %v4099_v39, %v299_v16  ;;  %v4710_v41 = vadd.s32 %v4099_v39, %v298_v50 }
  0xd9   : > { %3365 = vmatpush.xpose.msra.mxu3 %v3057_v57  ;;  %v3054_v6 = vadd.f32 %v2798_v7, %v2273_v22  ;;  %v2799_v42 = vsel %vm2534_vm1, %v4137_v18, 0.0  ;;  %v4714_v43 = vadd.s32 %v4099_v39, %v297_v17  ;;  %v4718_v51 = vadd.s32 %v4099_v39, %v4094_v26 }
  0xda   : > { %v2274_v46 = vadd.f32 %v2018_v15, %v1493_v19  ;;  %vm444_vm2 = vcmp.eq.s32.totalorder %v4150_v25, %v365_v63  ;;  %vm969_vm3 = vcmp.eq.s32.totalorder %v4158_v30, %v365_v63  ;;  %vm1750_vm4 = vcmp.eq.s32.totalorder %v4166_v34, %v365_v63 }
  0xdb   : > { %3305 = vmatpush.xpose.msra.mxu0 %v3054_v6  ;;  %v709_v60 = vsel %vm444_vm2, %v4115_v1, 0.0  ;;  %v1234_v16 = vsel %vm969_vm3, %v4123_v5, 0.0  ;;  %v2015_v50 = vsel %vm1750_vm4, %v4131_v12, 0.0  ;;  %vm2531_vm6 = vcmp.eq.s32.totalorder %v4174_v38, %v365_v63 }
  0xdc   : > { %v3055_v17 = vadd.f32 %v2799_v42, %v2274_v46  ;;  %v1490_v56 = vadd.f32 %v1234_v16, %v709_v60  ;;  %v2796_v48 = vsel %vm2531_vm6, %v4139_v20, 0.0  ;;  %vm445_vm7 = vcmp.eq.s32.totalorder %v4152_v27, %v365_v63 }
  0xdd   : > { %v710_v54 = vsel %vm445_vm7, %v4117_v2, 0.0  ;;  %vm970_vm8 = vcmp.eq.s32.totalorder %v4160_v31, %v365_v63  ;;  %vm1751_vm9 = vcmp.eq.s32.totalorder %v4168_v35, %v365_v63  ;;  %vm2532_vm10 = vcmp.eq.s32.totalorder %v4176_v40, %v365_v63 }
  0xde   : > { %3325 = vmatpush.xpose.msra.mxu1 %v3055_v17  ;;  %v2271_v44 = vadd.f32 %v2015_v50, %v1490_v56  ;;  %v1235_v45 = vsel %vm970_vm8, %v4125_v8, 0.0  ;;  %v2016_v52 = vsel %vm1751_vm9, %v4133_v13, 0.0  ;;  %v2797_v47 = vsel %vm2532_vm10, %v4141_v21, 0.0 }
  0xdf   : > { %v1491_v55 = vadd.f32 %v1235_v45, %v710_v54  ;;  %vm442_vm11 = vcmp.eq.s32.totalorder %v4146_v23, %v365_v63  ;;  %vm967_vm12 = vcmp.eq.s32.totalorder %v4154_v28, %v365_v63  ;;  %vm1748_vm13 = vcmp.eq.s32.totalorder %v4162_v32, %v365_v63 }
  0xe0   : > { %v3052_v59 = vadd.f32 %v2796_v48, %v2271_v44  ;;  %v707_v53 = vsel %vm442_vm11, %v4111_v61, 0.0  ;;  %v1232_v62 = vsel %vm967_vm12, %v4119_v3, 0.0  ;;  %v2013_v7 = vsel %vm1748_vm13, %v4127_v9, 0.0 }
  0xe1   : > { %v2272_v49 = vadd.f32 %v2016_v52, %v1491_v55  ;;  %v1488_v57 = vadd.f32 %v1232_v62, %v707_v53  ;;  %vm2529_vm14 = vcmp.eq.s32.totalorder %v4170_v36, %v365_v63  ;;  %vm443_vm15 = vcmp.eq.s32.totalorder %v4148_v24, %v365_v63 }
  0xe2   : > { %3346 = vmatpush.xpose.msra.mxu2 %v3052_v59  ;;  %v2794_v22 = vsel %vm2529_vm14, %v4135_v14, 0.0  ;;  %v708_v58 = vsel %vm443_vm15, %v4113_v0, 0.0  ;;  %vm968_vm0 = vcmp.eq.s32.totalorder %v4156_v29, %v365_v63  ;;  %vm1749_vm1 = vcmp.eq.s32.totalorder %v4164_v33, %v365_v63 }
  0xe3   : > { %v3053_v15 = vadd.f32 %v2797_v47, %v2272_v49  ;;  %v2269_v19 = vadd.f32 %v2013_v7, %v1488_v57  ;;  %v1233_v6 = vsel %vm968_vm0, %v4121_v4, 0.0  ;;  %v2014_v42 = vsel %vm1749_vm1, %v4129_v11, 0.0 }
  0xe4   : > { %v1489_v46 = vadd.f32 %v1233_v6, %v708_v58  ;;  %vm2530_vm2 = vcmp.eq.s32.totalorder %v4172_v37, %v365_v63  ;;  %vm440_vm3 = vcmp.eq.s32.totalorder %v4150_v25, %v4710_v41  ;;  %vm965_vm4 = vcmp.eq.s32.totalorder %v4158_v30, %v4710_v41 }
  0xe5   : > { %3366 = vmatpush.xpose.msra.mxu3 %v3053_v15  ;;  %v3050_v60 = vadd.f32 %v2794_v22, %v2269_v19  ;;  %v2795_v16 = vsel %vm2530_vm2, %v4137_v18, 0.0  ;;  %v705_v50 = vsel %vm440_vm3, %v4115_v1, 0.0  ;;  %v1230_v17 = vsel %vm965_vm4, %v4123_v5, 0.0 }
  0xe6   : > { %v2270_v56 = vadd.f32 %v2014_v42, %v1489_v46  ;;  %v1486_v48 = vadd.f32 %v1230_v17, %v705_v50  ;;  %vm1746_vm6 = vcmp.eq.s32.totalorder %v4166_v34, %v4710_v41  ;;  %vm2527_vm7 = vcmp.eq.s32.totalorder %v4174_v38, %v4710_v41 }
  0xe7   : > { %3306 = vmatpush.xpose.msra.mxu0 %v3050_v60  ;;  %v2011_v63 = vsel %vm1746_vm6, %v4131_v12, 0.0  ;;  %v2792_v54 = vsel %vm2527_vm7, %v4139_v20, 0.0  ;;  %vm441_vm8 = vcmp.eq.s32.totalorder %v4152_v27, %v4710_v41  ;;  %vm966_vm9 = vcmp.eq.s32.totalorder %v4160_v31, %v4710_v41 }
  0xe8   : > { %v3051_v44 = vadd.f32 %v2795_v16, %v2270_v56  ;;  %v2267_v45 = vadd.f32 %v2011_v63, %v1486_v48  ;;  %v706_v52 = vsel %vm441_vm8, %v4117_v2, 0.0  ;;  %v1231_v47 = vsel %vm966_vm9, %v4125_v8, 0.0 }
  0xe9   : > { %v1487_v55 = vadd.f32 %v1231_v47, %v706_v52  ;;  %vm1747_vm10 = vcmp.eq.s32.totalorder %v4168_v35, %v4710_v41  ;;  %vm2528_vm11 = vcmp.eq.s32.totalorder %v4176_v40, %v4710_v41  ;;  %vm438_vm12 = vcmp.eq.s32.totalorder %v4146_v23, %v4710_v41 }
  0xea   : > { %3326 = vmatpush.xpose.msra.mxu1 %v3051_v44  ;;  %v3048_v59 = vadd.f32 %v2792_v54, %v2267_v45  ;;  %v2012_v53 = vsel %vm1747_vm10, %v4133_v13, 0.0  ;;  %v2793_v62 = vsel %vm2528_vm11, %v4141_v21, 0.0  ;;  %v703_v7 = vsel %vm438_vm12, %v4111_v61, 0.0 }
  0xeb   : > { %v2268_v49 = vadd.f32 %v2012_v53, %v1487_v55  ;;  %vm963_vm13 = vcmp.eq.s32.totalorder %v4154_v28, %v4710_v41  ;;  %vm1744_vm14 = vcmp.eq.s32.totalorder %v4162_v32, %v4710_v41  ;;  %vm2525_vm15 = vcmp.eq.s32.totalorder %v4170_v36, %v4710_v41 }
  0xec   : > { %3347 = vmatpush.xpose.msra.mxu2 %v3048_v59  ;;  %v1228_v57 = vsel %vm963_vm13, %v4119_v3, 0.0  ;;  %v2009_v22 = vsel %vm1744_vm14, %v4127_v9, 0.0  ;;  %v2790_v58 = vsel %vm2525_vm15, %v4135_v14, 0.0  ;;  %vm439_vm0 = vcmp.eq.s32.totalorder %v4148_v24, %v4710_v41 }
  0xed   : > { %v3049_v15 = vadd.f32 %v2793_v62, %v2268_v49  ;;  %v1484_v19 = vadd.f32 %v1228_v57, %v703_v7  ;;  %v704_v6 = vsel %vm439_vm0, %v4113_v0, 0.0  ;;  %vm964_vm1 = vcmp.eq.s32.totalorder %v4156_v29, %v4710_v41 }
  0xee   : > { %v1229_v42 = vsel %vm964_vm1, %v4121_v4, 0.0  ;;  %vm1745_vm2 = vcmp.eq.s32.totalorder %v4164_v33, %v4710_v41  ;;  %vm2526_vm3 = vcmp.eq.s32.totalorder %v4172_v37, %v4710_v41  ;;  %vm436_vm4 = vcmp.eq.s32.totalorder %v4150_v25, %v4714_v43 }
  0xef   : > { %3367 = vmatpush.xpose.msra.mxu3 %v3049_v15  ;;  %v2265_v46 = vadd.f32 %v2009_v22, %v1484_v19  ;;  %v1485_v60 = vadd.f32 %v1229_v42, %v704_v6  ;;  %v2010_v16 = vsel %vm1745_vm2, %v4129_v11, 0.0  ;;  %v2791_v50 = vsel %vm2526_vm3, %v4137_v18, 0.0 }
  0xf0   : > { %v701_v17 = vsel %vm436_vm4, %v4115_v1, 0.0  ;;  %vm961_vm6 = vcmp.eq.s32.totalorder %v4158_v30, %v4714_v43  ;;  %vm1742_vm7 = vcmp.eq.s32.totalorder %v4166_v34, %v4714_v43  ;;  %vm2523_vm8 = vcmp.eq.s32.totalorder %v4174_v38, %v4714_v43 }
  0xf1   : > { %v3046_v41 = vadd.f32 %v2790_v58, %v2265_v46  ;;  %v2266_v56 = vadd.f32 %v2010_v16, %v1485_v60  ;;  %v1226_v48 = vsel %vm961_vm6, %v4123_v5, 0.0  ;;  %v2007_v63 = vsel %vm1742_vm7, %v4131_v12, 0.0 }
  0xf2   : > { %v1482_v54 = vadd.f32 %v1226_v48, %v701_v17  ;;  %v2788_v44 = vsel %vm2523_vm8, %v4139_v20, 0.0  ;;  %vm437_vm9 = vcmp.eq.s32.totalorder %v4152_v27, %v4714_v43  ;;  %vm962_vm10 = vcmp.eq.s32.totalorder %v4160_v31, %v4714_v43 }
  0xf3   : > { %3307 = vmatpush.xpose.msra.mxu0 %v3046_v41  ;;  %v3047_v45 = vadd.f32 %v2791_v50, %v2266_v56  ;;  %v702_v52 = vsel %vm437_vm9, %v4117_v2, 0.0  ;;  %v1227_v47 = vsel %vm962_vm10, %v4125_v8, 0.0  ;;  %vm1743_vm11 = vcmp.eq.s32.totalorder %v4168_v35, %v4714_v43 }
  0xf4   : > { %v2263_v55 = vadd.f32 %v2007_v63, %v1482_v54  ;;  %v1483_v59 = vadd.f32 %v1227_v47, %v702_v52  ;;  %v2008_v53 = vsel %vm1743_vm11, %v4133_v13, 0.0  ;;  %vm2524_vm12 = vcmp.eq.s32.totalorder %v4176_v40, %v4714_v43 }
  0xf5   : > { %3327 = vmatpush.xpose.msra.mxu1 %v3047_v45  ;;  %v2789_v62 = vsel %vm2524_vm12, %v4141_v21, 0.0  ;;  %vm434_vm13 = vcmp.eq.s32.totalorder %v4146_v23, %v4714_v43  ;;  %vm959_vm14 = vcmp.eq.s32.totalorder %v4154_v28, %v4714_v43  ;;  %vm1740_vm15 = vcmp.eq.s32.totalorder %v4162_v32, %v4714_v43 }
  0xf6   : > { %v3044_v7 = vadd.f32 %v2788_v44, %v2263_v55  ;;  %v2264_v49 = vadd.f32 %v2008_v53, %v1483_v59  ;;  %v699_v57 = vsel %vm434_vm13, %v4111_v61, 0.0  ;;  %v1224_v22 = vsel %vm959_vm14, %v4119_v3, 0.0 }
  0xf7   : > { %v1480_v58 = vadd.f32 %v1224_v22, %v699_v57  ;;  %v2005_v15 = vsel %vm1740_vm15, %v4127_v9, 0.0  ;;  %vm2521_vm0 = vcmp.eq.s32.totalorder %v4170_v36, %v4714_v43  ;;  %vm435_vm1 = vcmp.eq.s32.totalorder %v4148_v24, %v4714_v43 }
  0xf8   : > { %3348 = vmatpush.xpose.msra.mxu2 %v3044_v7  ;;  %v3045_v19 = vadd.f32 %v2789_v62, %v2264_v49  ;;  %v2786_v6 = vsel %vm2521_vm0, %v4135_v14, 0.0  ;;  %v700_v42 = vsel %vm435_vm1, %v4113_v0, 0.0  ;;  %vm960_vm2 = vcmp.eq.s32.totalorder %v4156_v29, %v4714_v43 }
  0xf9   : > { %v2261_v46 = vadd.f32 %v2005_v15, %v1480_v58  ;;  %v1225_v60 = vsel %vm960_vm2, %v4121_v4, 0.0  ;;  %vm1741_vm3 = vcmp.eq.s32.totalorder %v4164_v33, %v4714_v43  ;;  %vm2522_vm4 = vcmp.eq.s32.totalorder %v4172_v37, %v4714_v43 }
  0xfa   : > { %3368 = vmatpush.xpose.msra.mxu3 %v3045_v19  ;;  %v1481_v16 = vadd.f32 %v1225_v60, %v700_v42  ;;  %v2006_v50 = vsel %vm1741_vm3, %v4129_v11, 0.0  ;;  %v2787_v17 = vsel %vm2522_vm4, %v4137_v18, 0.0  ;;  %vm432_vm6 = vcmp.eq.s32.totalorder %v4150_v25, %v4718_v51 }
  0xfb   : > { %v3042_v41 = vadd.f32 %v2786_v6, %v2261_v46  ;;  %v697_v56 = vsel %vm432_vm6, %v4115_v1, 0.0  ;;  %vm957_vm7 = vcmp.eq.s32.totalorder %v4158_v30, %v4718_v51  ;;  %vm1738_vm8 = vcmp.eq.s32.totalorder %v4166_v34, %v4718_v51 }
  0xfc   : > { %v2262_v48 = vadd.f32 %v2006_v50, %v1481_v16  ;;  %v1222_v43 = vsel %vm957_vm7, %v4123_v5, 0.0  ;;  %v2003_v63 = vsel %vm1738_vm8, %v4131_v12, 0.0  ;;  %vm2519_vm9 = vcmp.eq.s32.totalorder %v4174_v38, %v4718_v51 }
  0xfd   : > { %3308 = vmatpush.xpose.msra.mxu0 %v3042_v41  ;;  %v1478_v54 = vadd.f32 %v1222_v43, %v697_v56  ;;  %v2784_v44 = vsel %vm2519_vm9, %v4139_v20, 0.0  ;;  %v327_v45 = vadd.s32 248, %v4094_v26  ;;  %vm433_vm10 = vcmp.eq.s32.totalorder %v4152_v27, %v4718_v51 }
  0xfe   : > { %v3043_v52 = vadd.f32 %v2787_v17, %v2262_v48  ;;  %v698_v47 = vsel %vm433_vm10, %v4117_v2, 0.0  ;;  %vm958_vm11 = vcmp.eq.s32.totalorder %v4160_v31, %v4718_v51  ;;  %vm1739_vm12 = vcmp.eq.s32.totalorder %v4168_v35, %v4718_v51 }
  0xff   : > { %v2259_v55 = vadd.f32 %v2003_v63, %v1478_v54  ;;  %v4869_v59 = vadd.s32 %v4099_v39, %v327_v45  ;;  %v1223_v53 = vsel %vm958_vm11, %v4125_v8, 0.0  ;;  %v2004_v62 = vsel %vm1739_vm12, %v4133_v13, 0.0 }
 0x100   : > { %3328 = vmatpush.xpose.msra.mxu1 %v3043_v52  ;;  %v1479_v7 = vadd.f32 %v1223_v53, %v698_v47  ;;  %vm2520_vm13 = vcmp.eq.s32.totalorder %v4176_v40, %v4718_v51  ;;  %vm430_vm14 = vcmp.eq.s32.totalorder %v4146_v23, %v4718_v51  ;;  %vm955_vm15 = vcmp.eq.s32.totalorder %v4154_v28, %v4718_v51 }
 0x101   : > { %v3040_v49 = vadd.f32 %v2784_v44, %v2259_v55  ;;  %vm556_vm0 = vcmp.eq.s32.totalorder %v4150_v25, %v4869_v59  ;;  %vm1081_vm1 = vcmp.eq.s32.totalorder %v4158_v30, %v4869_v59  ;;  %vm1862_vm2 = vcmp.eq.s32.totalorder %v4166_v34, %v4869_v59 }
 0x102   : > { %v821_v57 = vsel %vm556_vm0, %v4115_v1, 0.0  ;;  %v1346_v22 = vsel %vm1081_vm1, %v4123_v5, 0.0  ;;  %v2127_v58 = vsel %vm1862_vm2, %v4131_v12, 0.0  ;;  %vm2643_vm3 = vcmp.eq.s32.totalorder %v4174_v38, %v4869_v59 }
 0x103   : > { %3349 = vmatpush.xpose.msra.mxu2 %v3040_v49  ;;  %v1602_v15 = vadd.f32 %v1346_v22, %v821_v57  ;;  %v2908_v19 = vsel %vm2643_vm3, %v4139_v20, 0.0  ;;  %v2260_v6 = vadd.f32 %v2004_v62, %v1479_v7  ;;  %v2785_v42 = vsel %vm2520_vm13, %v4141_v21, 0.0 }
 0x104   : > { %vm557_vm4 = vcmp.eq.s32.totalorder %v4152_v27, %v4869_v59  ;;  %vm1082_vm6 = vcmp.eq.s32.totalorder %v4160_v31, %v4869_v59  ;;  %vm1863_vm7 = vcmp.eq.s32.totalorder %v4168_v35, %v4869_v59  ;;  %vm2644_vm8 = vcmp.eq.s32.totalorder %v4176_v40, %v4869_v59 }
 0x105   : > { %v2383_v46 = vadd.f32 %v2127_v58, %v1602_v15  ;;  %v3041_v60 = vadd.f32 %v2785_v42, %v2260_v6  ;;  %v822_v16 = vsel %vm557_vm4, %v4117_v2, 0.0  ;;  %v1347_v50 = vsel %vm1082_vm6, %v4125_v8, 0.0 }
 0x106   : > { %v1603_v17 = vadd.f32 %v1347_v50, %v822_v16  ;;  %v2128_v41 = vsel %vm1863_vm7, %v4133_v13, 0.0  ;;  %v2909_v56 = vsel %vm2644_vm8, %v4141_v21, 0.0  ;;  %v695_v48 = vsel %vm430_vm14, %v4111_v61, 0.0 }
 0x107   : > { %v3164_v43 = vadd.f32 %v2908_v19, %v2383_v46  ;;  %3369 = vmatpush.xpose.msra.mxu3 %v3041_v60  ;;  %v1220_v63 = vsel %vm955_vm15, %v4119_v3, 0.0  ;;  %vm1736_vm9 = vcmp.eq.s32.totalorder %v4162_v32, %v4718_v51  ;;  %vm2517_vm10 = vcmp.eq.s32.totalorder %v4170_v36, %v4718_v51 }
 0x108   : > { %v2384_v54 = vadd.f32 %v2128_v41, %v1603_v17  ;;  %v1476_v44 = vadd.f32 %v1220_v63, %v695_v48  ;;  %v2001_v45 = vsel %vm1736_vm9, %v4127_v9, 0.0  ;;  %v2782_v52 = vsel %vm2517_vm10, %v4135_v14, 0.0 }
 0x109   : > { %3414 = vmatpush.xpose.msrb.mxu2 %v3164_v43  ;;  %vm431_vm11 = vcmp.eq.s32.totalorder %v4148_v24, %v4718_v51  ;;  %vm956_vm12 = vcmp.eq.s32.totalorder %v4156_v29, %v4718_v51  ;;  %vm1737_vm13 = vcmp.eq.s32.totalorder %v4164_v33, %v4718_v51  ;;  %vm2518_vm14 = vcmp.eq.s32.totalorder %v4172_v37, %v4718_v51 }
 0x10a   : > { %v3165_v47 = vadd.f32 %v2909_v56, %v2384_v54  ;;  %v2257_v55 = vadd.f32 %v2001_v45, %v1476_v44  ;;  %v696_v53 = vsel %vm431_vm11, %v4113_v0, 0.0  ;;  %v1221_v62 = vsel %vm956_vm12, %v4121_v4, 0.0 }
 0x10b   : > { %v1477_v7 = vadd.f32 %v1221_v62, %v696_v53  ;;  %v2002_v49 = vsel %vm1737_vm13, %v4129_v11, 0.0  ;;  %v2783_v57 = vsel %vm2518_vm14, %v4137_v18, 0.0  ;;  %vm554_vm15 = vcmp.eq.s32.totalorder %v4146_v23, %v4869_v59 }
 0x10c   : > { %3434 = vmatpush.xpose.msrb.mxu3 %v3165_v47  ;;  %v3038_v22 = vadd.f32 %v2782_v52, %v2257_v55  ;;  %v819_v58 = vsel %vm554_vm15, %v4111_v61, 0.0  ;;  %vm1079_vm0 = vcmp.eq.s32.totalorder %v4154_v28, %v4869_v59  ;;  %vm1860_vm1 = vcmp.eq.s32.totalorder %v4162_v32, %v4869_v59 }
 0x10d   : > { %v2258_v51 = vadd.f32 %v2002_v49, %v1477_v7  ;;  %v1344_v15 = vsel %vm1079_vm0, %v4119_v3, 0.0  ;;  %v2125_v19 = vsel %vm1860_vm1, %v4127_v9, 0.0  ;;  %vm2641_vm2 = vcmp.eq.s32.totalorder %v4170_v36, %v4869_v59 }
 0x10e   : > { %3309 = vmatpush.xpose.msra.mxu0 %v3038_v22  ;;  %v1600_v6 = vadd.f32 %v1344_v15, %v819_v58  ;;  %v2906_v42 = vsel %vm2641_vm2, %v4135_v14, 0.0  ;;  %vm555_vm3 = vcmp.eq.s32.totalorder %v4148_v24, %v4869_v59  ;;  %vm1080_vm4 = vcmp.eq.s32.totalorder %v4156_v29, %v4869_v59 }
 0x10f   : > { %v3039_v46 = vadd.f32 %v2783_v57, %v2258_v51  ;;  %v820_v60 = vsel %vm555_vm3, %v4113_v0, 0.0  ;;  %v1345_v16 = vsel %vm1080_vm4, %v4121_v4, 0.0  ;;  %vm1861_vm6 = vcmp.eq.s32.totalorder %v4164_v33, %v4869_v59 }
 0x110   : > { %v2381_v50 = vadd.f32 %v2125_v19, %v1600_v6  ;;  %v1601_v17 = vadd.f32 %v1345_v16, %v820_v60  ;;  %v2126_v41 = vsel %vm1861_vm6, %v4129_v11, 0.0  ;;  %vm2642_vm7 = vcmp.eq.s32.totalorder %v4172_v37, %v4869_v59 }
 0x111   : > { %3329 = vmatpush.xpose.msra.mxu1 %v3039_v46  ;;  %v2907_v56 = vsel %vm2642_vm7, %v4137_v18, 0.0  ;;  %v326_v48 = vadd.s32 240, %v4094_v26  ;;  %v325_v43 = vadd.s32 232, %v4094_v26  ;;  %v324_v63 = vadd.s32 224, %v4094_v26 }
 0x112   : > { %v3162_v54 = vadd.f32 %v2906_v42, %v2381_v50  ;;  %v2382_v44 = vadd.f32 %v2126_v41, %v1601_v17  ;;  %v323_v45 = vadd.s32 216, %v4094_v26 }
 0x113   : > { %v392_v52 = vadd.s32 %v4099_v39, %v326_v48  ;;  %v4960_v55 = vadd.s32 %v4099_v39, %v325_v43  ;;  %v4963_v59 = vadd.s32 %v4099_v39, %v324_v63 }
 0x114   : > { %3374 = vmatpush.xpose.msrb.mxu0 %v3162_v54  ;;  %v3163_v47 = vadd.f32 %v2907_v56, %v2382_v44  ;;  %v4966_v53 = vadd.s32 %v4099_v39, %v323_v45 }
 0x115   : > { %vm552_vm8 = vcmp.eq.s32.totalorder %v4150_v25, %v392_v52  ;;  %vm1077_vm9 = vcmp.eq.s32.totalorder %v4158_v30, %v392_v52  ;;  %vm1858_vm10 = vcmp.eq.s32.totalorder %v4166_v34, %v392_v52  ;;  %vm2639_vm11 = vcmp.eq.s32.totalorder %v4174_v38, %v392_v52 }
 0x116   : > { %3394 = vmatpush.xpose.msrb.mxu1 %v3163_v47  ;;  %v817_v62 = vsel %vm552_vm8, %v4115_v1, 0.0  ;;  %v1342_v7 = vsel %vm1077_vm9, %v4123_v5, 0.0  ;;  %v2123_v49 = vsel %vm1858_vm10, %v4131_v12, 0.0  ;;  %v2904_v57 = vsel %vm2639_vm11, %v4139_v20, 0.0 }
 0x117   : > { %v1598_v22 = vadd.f32 %v1342_v7, %v817_v62  ;;  %vm553_vm12 = vcmp.eq.s32.totalorder %v4152_v27, %v392_v52  ;;  %vm1078_vm13 = vcmp.eq.s32.totalorder %v4160_v31, %v392_v52  ;;  %vm1859_vm14 = vcmp.eq.s32.totalorder %v4168_v35, %v392_v52 }
 0x118   : > { %v818_v58 = vsel %vm553_vm12, %v4117_v2, 0.0  ;;  %v1343_v51 = vsel %vm1078_vm13, %v4125_v8, 0.0  ;;  %v2124_v15 = vsel %vm1859_vm14, %v4133_v13, 0.0  ;;  %vm2640_vm15 = vcmp.eq.s32.totalorder %v4176_v40, %v392_v52 }
 0x119   : > { %v2379_v19 = vadd.f32 %v2123_v49, %v1598_v22  ;;  %v1599_v6 = vadd.f32 %v1343_v51, %v818_v58  ;;  %v2905_v42 = vsel %vm2640_vm15, %v4141_v21, 0.0  ;;  %vm550_vm0 = vcmp.eq.s32.totalorder %v4146_v23, %v392_v52 }
 0x11a   : > { %v815_v46 = vsel %vm550_vm0, %v4111_v61, 0.0  ;;  %vm1075_vm1 = vcmp.eq.s32.totalorder %v4154_v28, %v392_v52  ;;  %vm1856_vm2 = vcmp.eq.s32.totalorder %v4162_v32, %v392_v52  ;;  %vm2637_vm3 = vcmp.eq.s32.totalorder %v4170_v36, %v392_v52 }
 0x11b   : > { %v3160_v60 = vadd.f32 %v2904_v57, %v2379_v19  ;;  %v2380_v16 = vadd.f32 %v2124_v15, %v1599_v6  ;;  %v1340_v50 = vsel %vm1075_vm1, %v4119_v3, 0.0  ;;  %v2121_v17 = vsel %vm1856_vm2, %v4127_v9, 0.0 }
 0x11c   : > { %v1596_v41 = vadd.f32 %v1340_v50, %v815_v46  ;;  %v2902_v56 = vsel %vm2637_vm3, %v4135_v14, 0.0  ;;  %vm551_vm4 = vcmp.eq.s32.totalorder %v4148_v24, %v392_v52  ;;  %vm1076_vm6 = vcmp.eq.s32.totalorder %v4156_v29, %v392_v52 }
 0x11d   : > { %3415 = vmatpush.xpose.msrb.mxu2 %v3160_v60  ;;  %v3161_v48 = vadd.f32 %v2905_v42, %v2380_v16  ;;  %v816_v43 = vsel %vm551_vm4, %v4113_v0, 0.0  ;;  %v1341_v63 = vsel %vm1076_vm6, %v4121_v4, 0.0  ;;  %vm1857_vm7 = vcmp.eq.s32.totalorder %v4164_v33, %v392_v52 }
 0x11e   : > { %v2377_v54 = vadd.f32 %v2121_v17, %v1596_v41  ;;  %v1597_v44 = vadd.f32 %v1341_v63, %v816_v43  ;;  %v2122_v45 = vsel %vm1857_vm7, %v4129_v11, 0.0  ;;  %vm2638_vm8 = vcmp.eq.s32.totalorder %v4172_v37, %v392_v52 }
 0x11f   : > { %3435 = vmatpush.xpose.msrb.mxu3 %v3161_v48  ;;  %v2903_v47 = vsel %vm2638_vm8, %v4137_v18, 0.0  ;;  %vm548_vm9 = vcmp.eq.s32.totalorder %v4150_v25, %v4960_v55  ;;  %vm1073_vm10 = vcmp.eq.s32.totalorder %v4158_v30, %v4960_v55  ;;  %vm1854_vm11 = vcmp.eq.s32.totalorder %v4166_v34, %v4960_v55 }
 0x120   : > { %v3158_v62 = vadd.f32 %v2902_v56, %v2377_v54  ;;  %v2378_v7 = vadd.f32 %v2122_v45, %v1597_v44  ;;  %v813_v49 = vsel %vm548_vm9, %v4115_v1, 0.0  ;;  %v1338_v57 = vsel %vm1073_vm10, %v4123_v5, 0.0 }
 0x121   : > { %v1594_v22 = vadd.f32 %v1338_v57, %v813_v49  ;;  %v2119_v52 = vsel %vm1854_vm11, %v4131_v12, 0.0  ;;  %vm2635_vm12 = vcmp.eq.s32.totalorder %v4174_v38, %v4960_v55  ;;  %vm549_vm13 = vcmp.eq.s32.totalorder %v4152_v27, %v4960_v55 }
 0x122   : > { %3375 = vmatpush.xpose.msrb.mxu0 %v3158_v62  ;;  %v3159_v58 = vadd.f32 %v2903_v47, %v2378_v7  ;;  %v2900_v51 = vsel %vm2635_vm12, %v4139_v20, 0.0  ;;  %v814_v15 = vsel %vm549_vm13, %v4117_v2, 0.0  ;;  %vm1074_vm14 = vcmp.eq.s32.totalorder %v4160_v31, %v4960_v55 }
 0x123   : > { %v2375_v19 = vadd.f32 %v2119_v52, %v1594_v22  ;;  %v1339_v6 = vsel %vm1074_vm14, %v4125_v8, 0.0  ;;  %vm1855_vm15 = vcmp.eq.s32.totalorder %v4168_v35, %v4960_v55  ;;  %vm2636_vm0 = vcmp.eq.s32.totalorder %v4176_v40, %v4960_v55 }
 0x124   : > { %3395 = vmatpush.xpose.msrb.mxu1 %v3159_v58  ;;  %v1595_v42 = vadd.f32 %v1339_v6, %v814_v15  ;;  %v2120_v46 = vsel %vm1855_vm15, %v4133_v13, 0.0  ;;  %v2901_v60 = vsel %vm2636_vm0, %v4141_v21, 0.0  ;;  %vm546_vm1 = vcmp.eq.s32.totalorder %v4146_v23, %v4960_v55 }
 0x125   : > { %v3156_v16 = vadd.f32 %v2900_v51, %v2375_v19  ;;  %v811_v50 = vsel %vm546_vm1, %v4111_v61, 0.0  ;;  %vm1071_vm2 = vcmp.eq.s32.totalorder %v4154_v28, %v4960_v55  ;;  %vm1852_vm3 = vcmp.eq.s32.totalorder %v4162_v32, %v4960_v55 }
 0x126   : > { %v2376_v17 = vadd.f32 %v2120_v46, %v1595_v42  ;;  %v1336_v41 = vsel %vm1071_vm2, %v4119_v3, 0.0  ;;  %v2117_v56 = vsel %vm1852_vm3, %v4127_v9, 0.0  ;;  %vm2633_vm4 = vcmp.eq.s32.totalorder %v4170_v36, %v4960_v55 }
 0x127   : > { %3416 = vmatpush.xpose.msrb.mxu2 %v3156_v16  ;;  %v1592_v48 = vadd.f32 %v1336_v41, %v811_v50  ;;  %v2898_v43 = vsel %vm2633_vm4, %v4135_v14, 0.0  ;;  %vm547_vm6 = vcmp.eq.s32.totalorder %v4148_v24, %v4960_v55  ;;  %vm1072_vm7 = vcmp.eq.s32.totalorder %v4156_v29, %v4960_v55 }
 0x128   : > { %v3157_v63 = vadd.f32 %v2901_v60, %v2376_v17  ;;  %v812_v54 = vsel %vm547_vm6, %v4113_v0, 0.0  ;;  %v1337_v44 = vsel %vm1072_vm7, %v4121_v4, 0.0  ;;  %vm1853_vm8 = vcmp.eq.s32.totalorder %v4164_v33, %v4960_v55 }
 0x129   : > { %v2373_v45 = vadd.f32 %v2117_v56, %v1592_v48  ;;  %v1593_v47 = vadd.f32 %v1337_v44, %v812_v54  ;;  %v2118_v62 = vsel %vm1853_vm8, %v4129_v11, 0.0  ;;  %vm2634_vm9 = vcmp.eq.s32.totalorder %v4172_v37, %v4960_v55 }
 0x12a   : > { %3436 = vmatpush.xpose.msrb.mxu3 %v3157_v63  ;;  %v2899_v7 = vsel %vm2634_vm9, %v4137_v18, 0.0  ;;  %vm544_vm10 = vcmp.eq.s32.totalorder %v4150_v25, %v4963_v59  ;;  %vm1069_vm11 = vcmp.eq.s32.totalorder %v4158_v30, %v4963_v59  ;;  %vm1850_vm12 = vcmp.eq.s32.totalorder %v4166_v34, %v4963_v59 }
 0x12b   : > { %v3154_v49 = vadd.f32 %v2898_v43, %v2373_v45  ;;  %v2374_v57 = vadd.f32 %v2118_v62, %v1593_v47  ;;  %v809_v22 = vsel %vm544_vm10, %v4115_v1, 0.0  ;;  %v1334_v52 = vsel %vm1069_vm11, %v4123_v5, 0.0 }
 0x12c   : > { %v1590_v58 = vadd.f32 %v1334_v52, %v809_v22  ;;  %v2115_v55 = vsel %vm1850_vm12, %v4131_v12, 0.0  ;;  %vm2631_vm13 = vcmp.eq.s32.totalorder %v4174_v38, %v4963_v59  ;;  %vm545_vm14 = vcmp.eq.s32.totalorder %v4152_v27, %v4963_v59 }
 0x12d   : > { %3376 = vmatpush.xpose.msrb.mxu0 %v3154_v49  ;;  %v3155_v51 = vadd.f32 %v2899_v7, %v2374_v57  ;;  %v2896_v15 = vsel %vm2631_vm13, %v4139_v20, 0.0  ;;  %v810_v19 = vsel %vm545_vm14, %v4117_v2, 0.0  ;;  %vm1070_vm15 = vcmp.eq.s32.totalorder %v4160_v31, %v4963_v59 }
 0x12e   : > { %v2371_v6 = vadd.f32 %v2115_v55, %v1590_v58  ;;  %v1335_v42 = vsel %vm1070_vm15, %v4125_v8, 0.0  ;;  %vm1851_vm0 = vcmp.eq.s32.totalorder %v4168_v35, %v4963_v59  ;;  %vm2632_vm1 = vcmp.eq.s32.totalorder %v4176_v40, %v4963_v59 }
 0x12f   : > { %3396 = vmatpush.xpose.msrb.mxu1 %v3155_v51  ;;  %v1591_v46 = vadd.f32 %v1335_v42, %v810_v19  ;;  %v2116_v60 = vsel %vm1851_vm0, %v4133_v13, 0.0  ;;  %v2897_v16 = vsel %vm2632_vm1, %v4141_v21, 0.0  ;;  %vm542_vm2 = vcmp.eq.s32.totalorder %v4146_v23, %v4963_v59 }
 0x130   : > { %v3152_v50 = vadd.f32 %v2896_v15, %v2371_v6  ;;  %v807_v17 = vsel %vm542_vm2, %v4111_v61, 0.0  ;;  %vm1067_vm3 = vcmp.eq.s32.totalorder %v4154_v28, %v4963_v59  ;;  %vm1848_vm4 = vcmp.eq.s32.totalorder %v4162_v32, %v4963_v59 }
 0x131   : > { %v2372_v41 = vadd.f32 %v2116_v60, %v1591_v46  ;;  %v1332_v56 = vsel %vm1067_vm3, %v4119_v3, 0.0  ;;  %v2113_v48 = vsel %vm1848_vm4, %v4127_v9, 0.0  ;;  %vm2629_vm6 = vcmp.eq.s32.totalorder %v4170_v36, %v4963_v59 }
 0x132   : > { %3417 = vmatpush.xpose.msrb.mxu2 %v3152_v50  ;;  %v1588_v43 = vadd.f32 %v1332_v56, %v807_v17  ;;  %v2894_v63 = vsel %vm2629_vm6, %v4135_v14, 0.0  ;;  %vm543_vm7 = vcmp.eq.s32.totalorder %v4148_v24, %v4963_v59  ;;  %vm1068_vm8 = vcmp.eq.s32.totalorder %v4156_v29, %v4963_v59 }
 0x133   : > { %v3153_v54 = vadd.f32 %v2897_v16, %v2372_v41  ;;  %v808_v44 = vsel %vm543_vm7, %v4113_v0, 0.0  ;;  %v1333_v45 = vsel %vm1068_vm8, %v4121_v4, 0.0  ;;  %vm1849_vm9 = vcmp.eq.s32.totalorder %v4164_v33, %v4963_v59 }
 0x134   : > { %v2369_v47 = vadd.f32 %v2113_v48, %v1588_v43  ;;  %v1589_v62 = vadd.f32 %v1333_v45, %v808_v44  ;;  %v2114_v7 = vsel %vm1849_vm9, %v4129_v11, 0.0  ;;  %vm2630_vm10 = vcmp.eq.s32.totalorder %v4172_v37, %v4963_v59 }
 0x135   : > { %3437 = vmatpush.xpose.msrb.mxu3 %v3153_v54  ;;  %v2895_v49 = vsel %vm2630_vm10, %v4137_v18, 0.0  ;;  %vm540_vm11 = vcmp.eq.s32.totalorder %v4150_v25, %v4966_v53  ;;  %vm1065_vm12 = vcmp.eq.s32.totalorder %v4158_v30, %v4966_v53  ;;  %vm1846_vm13 = vcmp.eq.s32.totalorder %v4166_v34, %v4966_v53 }
 0x136   : > { %v3150_v57 = vadd.f32 %v2894_v63, %v2369_v47  ;;  %v2370_v22 = vadd.f32 %v2114_v7, %v1589_v62  ;;  %v805_v52 = vsel %vm540_vm11, %v4115_v1, 0.0  ;;  %v1330_v58 = vsel %vm1065_vm12, %v4123_v5, 0.0 }
 0x137   : > { %v1586_v55 = vadd.f32 %v1330_v58, %v805_v52  ;;  %v2111_v59 = vsel %vm1846_vm13, %v4131_v12, 0.0  ;;  %vm2627_vm14 = vcmp.eq.s32.totalorder %v4174_v38, %v4966_v53  ;;  %vm541_vm15 = vcmp.eq.s32.totalorder %v4152_v27, %v4966_v53 }
 0x138   : > { %3377 = vmatpush.xpose.msrb.mxu0 %v3150_v57  ;;  %v3151_v51 = vadd.f32 %v2895_v49, %v2370_v22  ;;  %v2892_v15 = vsel %vm2627_vm14, %v4139_v20, 0.0  ;;  %v806_v19 = vsel %vm541_vm15, %v4117_v2, 0.0  ;;  %vm1066_vm0 = vcmp.eq.s32.totalorder %v4160_v31, %v4966_v53 }
 0x139   : > { %v2367_v6 = vadd.f32 %v2111_v59, %v1586_v55  ;;  %v1331_v42 = vsel %vm1066_vm0, %v4125_v8, 0.0  ;;  %vm1847_vm1 = vcmp.eq.s32.totalorder %v4168_v35, %v4966_v53  ;;  %vm2628_vm2 = vcmp.eq.s32.totalorder %v4176_v40, %v4966_v53 }
 0x13a   : > { %3397 = vmatpush.xpose.msrb.mxu1 %v3151_v51  ;;  %v1587_v46 = vadd.f32 %v1331_v42, %v806_v19  ;;  %v2112_v60 = vsel %vm1847_vm1, %v4133_v13, 0.0  ;;  %v2893_v16 = vsel %vm2628_vm2, %v4141_v21, 0.0  ;;  %vm538_vm3 = vcmp.eq.s32.totalorder %v4146_v23, %v4966_v53 }
 0x13b   : > { %v3148_v50 = vadd.f32 %v2892_v15, %v2367_v6  ;;  %v803_v17 = vsel %vm538_vm3, %v4111_v61, 0.0  ;;  %vm1063_vm4 = vcmp.eq.s32.totalorder %v4154_v28, %v4966_v53  ;;  %vm1844_vm6 = vcmp.eq.s32.totalorder %v4162_v32, %v4966_v53 }
 0x13c   : > { %v2368_v41 = vadd.f32 %v2112_v60, %v1587_v46  ;;  %v1328_v56 = vsel %vm1063_vm4, %v4119_v3, 0.0  ;;  %v2109_v48 = vsel %vm1844_vm6, %v4127_v9, 0.0  ;;  %vm2625_vm7 = vcmp.eq.s32.totalorder %v4170_v36, %v4966_v53 }
 0x13d   : > { %3418 = vmatpush.xpose.msrb.mxu2 %v3148_v50  ;;  %v1584_v43 = vadd.f32 %v1328_v56, %v803_v17  ;;  %v2890_v63 = vsel %vm2625_vm7, %v4135_v14, 0.0  ;;  %vm539_vm8 = vcmp.eq.s32.totalorder %v4148_v24, %v4966_v53  ;;  %vm1064_vm9 = vcmp.eq.s32.totalorder %v4156_v29, %v4966_v53 }
 0x13e   : > { %v3149_v54 = vadd.f32 %v2893_v16, %v2368_v41  ;;  %v804_v44 = vsel %vm539_vm8, %v4113_v0, 0.0  ;;  %v1329_v45 = vsel %vm1064_vm9, %v4121_v4, 0.0  ;;  %vm1845_vm10 = vcmp.eq.s32.totalorder %v4164_v33, %v4966_v53 }
 0x13f   : > { %v2365_v47 = vadd.f32 %v2109_v48, %v1584_v43  ;;  %v1585_v62 = vadd.f32 %v1329_v45, %v804_v44  ;;  %v2110_v7 = vsel %vm1845_vm10, %v4129_v11, 0.0  ;;  %vm2626_vm11 = vcmp.eq.s32.totalorder %v4172_v37, %v4966_v53 }
 0x140   : > { %3438 = vmatpush.xpose.msrb.mxu3 %v3149_v54  ;;  %v2891_v49 = vsel %vm2626_vm11, %v4137_v18, 0.0  ;;  %v322_v57 = vadd.s32 208, %v4094_v26  ;;  %v321_v22 = vadd.s32 200, %v4094_v26  ;;  %v320_v52 = vadd.s32 192, %v4094_v26 }
 0x141   : > { %v3146_v58 = vadd.f32 %v2890_v63, %v2365_v47  ;;  %v2366_v55 = vadd.f32 %v2110_v7, %v1585_v62  ;;  %v319_v59 = vadd.s32 184, %v4094_v26 }
 0x142   : > { %v388_v51 = vadd.s32 %v4099_v39, %v322_v57  ;;  %v5150_v19 = vadd.s32 %v4099_v39, %v321_v22  ;;  %v5153_v53 = vadd.s32 %v4099_v39, %v320_v52 }
 0x143   : > { %3378 = vmatpush.xpose.msrb.mxu0 %v3146_v58  ;;  %v3147_v15 = vadd.f32 %v2891_v49, %v2366_v55  ;;  %v5156_v6 = vadd.s32 %v4099_v39, %v319_v59 }
 0x144   : > { %vm536_vm12 = vcmp.eq.s32.totalorder %v4150_v25, %v388_v51  ;;  %vm1061_vm13 = vcmp.eq.s32.totalorder %v4158_v30, %v388_v51  ;;  %vm1842_vm14 = vcmp.eq.s32.totalorder %v4166_v34, %v388_v51  ;;  %vm2623_vm15 = vcmp.eq.s32.totalorder %v4174_v38, %v388_v51 }
 0x145   : > { %3398 = vmatpush.xpose.msrb.mxu1 %v3147_v15  ;;  %v801_v42 = vsel %vm536_vm12, %v4115_v1, 0.0  ;;  %v1326_v46 = vsel %vm1061_vm13, %v4123_v5, 0.0  ;;  %v2107_v60 = vsel %vm1842_vm14, %v4131_v12, 0.0  ;;  %v2888_v16 = vsel %vm2623_vm15, %v4139_v20, 0.0 }
 0x146   : > { %v1582_v50 = vadd.f32 %v1326_v46, %v801_v42  ;;  %vm537_vm0 = vcmp.eq.s32.totalorder %v4152_v27, %v388_v51  ;;  %vm1062_vm1 = vcmp.eq.s32.totalorder %v4160_v31, %v388_v51  ;;  %vm1843_vm2 = vcmp.eq.s32.totalorder %v4168_v35, %v388_v51 }
 0x147   : > { %v802_v17 = vsel %vm537_vm0, %v4117_v2, 0.0  ;;  %v1327_v41 = vsel %vm1062_vm1, %v4125_v8, 0.0  ;;  %v2108_v56 = vsel %vm1843_vm2, %v4133_v13, 0.0  ;;  %vm2624_vm3 = vcmp.eq.s32.totalorder %v4176_v40, %v388_v51 }
 0x148   : > { %v2363_v48 = vadd.f32 %v2107_v60, %v1582_v50  ;;  %v1583_v43 = vadd.f32 %v1327_v41, %v802_v17  ;;  %v2889_v63 = vsel %vm2624_vm3, %v4141_v21, 0.0  ;;  %vm534_vm4 = vcmp.eq.s32.totalorder %v4146_v23, %v388_v51 }
 0x149   : > { %v799_v54 = vsel %vm534_vm4, %v4111_v61, 0.0  ;;  %vm1059_vm6 = vcmp.eq.s32.totalorder %v4154_v28, %v388_v51  ;;  %vm1840_vm7 = vcmp.eq.s32.totalorder %v4162_v32, %v388_v51  ;;  %vm2621_vm8 = vcmp.eq.s32.totalorder %v4170_v36, %v388_v51 }
 0x14a   : > { %v3144_v44 = vadd.f32 %v2888_v16, %v2363_v48  ;;  %v2364_v45 = vadd.f32 %v2108_v56, %v1583_v43  ;;  %v1324_v47 = vsel %vm1059_vm6, %v4119_v3, 0.0  ;;  %v2105_v62 = vsel %vm1840_vm7, %v4127_v9, 0.0 }
 0x14b   : > { %v1580_v7 = vadd.f32 %v1324_v47, %v799_v54  ;;  %v2886_v49 = vsel %vm2621_vm8, %v4135_v14, 0.0  ;;  %vm535_vm9 = vcmp.eq.s32.totalorder %v4148_v24, %v388_v51  ;;  %vm1060_vm10 = vcmp.eq.s32.totalorder %v4156_v29, %v388_v51 }
 0x14c   : > { %3419 = vmatpush.xpose.msrb.mxu2 %v3144_v44  ;;  %v3145_v57 = vadd.f32 %v2889_v63, %v2364_v45  ;;  %v800_v22 = vsel %vm535_vm9, %v4113_v0, 0.0  ;;  %v1325_v52 = vsel %vm1060_vm10, %v4121_v4, 0.0  ;;  %vm1841_vm11 = vcmp.eq.s32.totalorder %v4164_v33, %v388_v51 }
 0x14d   : > { %v2361_v58 = vadd.f32 %v2105_v62, %v1580_v7  ;;  %v1581_v55 = vadd.f32 %v1325_v52, %v800_v22  ;;  %v2106_v59 = vsel %vm1841_vm11, %v4129_v11, 0.0  ;;  %vm2622_vm12 = vcmp.eq.s32.totalorder %v4172_v37, %v388_v51 }
 0x14e   : > { %3439 = vmatpush.xpose.msrb.mxu3 %v3145_v57  ;;  %v2887_v15 = vsel %vm2622_vm12, %v4137_v18, 0.0  ;;  %vm532_vm13 = vcmp.eq.s32.totalorder %v4150_v25, %v5150_v19  ;;  %vm1057_vm14 = vcmp.eq.s32.totalorder %v4158_v30, %v5150_v19  ;;  %vm1838_vm15 = vcmp.eq.s32.totalorder %v4166_v34, %v5150_v19 }
 0x14f   : > { %v3142_v42 = vadd.f32 %v2886_v49, %v2361_v58  ;;  %v2362_v46 = vadd.f32 %v2106_v59, %v1581_v55  ;;  %v797_v60 = vsel %vm532_vm13, %v4115_v1, 0.0  ;;  %v1322_v16 = vsel %vm1057_vm14, %v4123_v5, 0.0 }
 0x150   : > { %v1578_v50 = vadd.f32 %v1322_v16, %v797_v60  ;;  %v2103_v51 = vsel %vm1838_vm15, %v4131_v12, 0.0  ;;  %vm2619_vm0 = vcmp.eq.s32.totalorder %v4174_v38, %v5150_v19  ;;  %vm533_vm1 = vcmp.eq.s32.totalorder %v4152_v27, %v5150_v19 }
 0x151   : > { %3379 = vmatpush.xpose.msrb.mxu0 %v3142_v42  ;;  %v3143_v17 = vadd.f32 %v2887_v15, %v2362_v46  ;;  %v2884_v41 = vsel %vm2619_vm0, %v4139_v20, 0.0  ;;  %v798_v56 = vsel %vm533_vm1, %v4117_v2, 0.0  ;;  %vm1058_vm2 = vcmp.eq.s32.totalorder %v4160_v31, %v5150_v19 }
 0x152   : > { %v2359_v48 = vadd.f32 %v2103_v51, %v1578_v50  ;;  %v1323_v43 = vsel %vm1058_vm2, %v4125_v8, 0.0  ;;  %vm1839_vm3 = vcmp.eq.s32.totalorder %v4168_v35, %v5150_v19  ;;  %vm2620_vm4 = vcmp.eq.s32.totalorder %v4176_v40, %v5150_v19 }
 0x153   : > { %3399 = vmatpush.xpose.msrb.mxu1 %v3143_v17  ;;  %v1579_v63 = vadd.f32 %v1323_v43, %v798_v56  ;;  %v2104_v54 = vsel %vm1839_vm3, %v4133_v13, 0.0  ;;  %v2885_v44 = vsel %vm2620_vm4, %v4141_v21, 0.0  ;;  %vm530_vm6 = vcmp.eq.s32.totalorder %v4146_v23, %v5150_v19 }
 0x154   : > { %v3140_v45 = vadd.f32 %v2884_v41, %v2359_v48  ;;  %v795_v47 = vsel %vm530_vm6, %v4111_v61, 0.0  ;;  %vm1055_vm7 = vcmp.eq.s32.totalorder %v4154_v28, %v5150_v19  ;;  %vm1836_vm8 = vcmp.eq.s32.totalorder %v4162_v32, %v5150_v19 }
 0x155   : > { %v2360_v62 = vadd.f32 %v2104_v54, %v1579_v63  ;;  %v1320_v7 = vsel %vm1055_vm7, %v4119_v3, 0.0  ;;  %v2101_v49 = vsel %vm1836_vm8, %v4127_v9, 0.0  ;;  %vm2617_vm9 = vcmp.eq.s32.totalorder %v4170_v36, %v5150_v19 }
 0x156   : > { %3420 = vmatpush.xpose.msrb.mxu2 %v3140_v45  ;;  %v1576_v57 = vadd.f32 %v1320_v7, %v795_v47  ;;  %v2882_v22 = vsel %vm2617_vm9, %v4135_v14, 0.0  ;;  %vm531_vm10 = vcmp.eq.s32.totalorder %v4148_v24, %v5150_v19  ;;  %vm1056_vm11 = vcmp.eq.s32.totalorder %v4156_v29, %v5150_v19 }
 0x157   : > { %v3141_v52 = vadd.f32 %v2885_v44, %v2360_v62  ;;  %v796_v58 = vsel %vm531_vm10, %v4113_v0, 0.0  ;;  %v1321_v55 = vsel %vm1056_vm11, %v4121_v4, 0.0  ;;  %vm1837_vm12 = vcmp.eq.s32.totalorder %v4164_v33, %v5150_v19 }
 0x158   : > { %v2357_v59 = vadd.f32 %v2101_v49, %v1576_v57  ;;  %v1577_v15 = vadd.f32 %v1321_v55, %v796_v58  ;;  %v2102_v42 = vsel %vm1837_vm12, %v4129_v11, 0.0  ;;  %vm2618_vm13 = vcmp.eq.s32.totalorder %v4172_v37, %v5150_v19 }
 0x159   : > { %3440 = vmatpush.xpose.msrb.mxu3 %v3141_v52  ;;  %v2883_v46 = vsel %vm2618_vm13, %v4137_v18, 0.0  ;;  %vm528_vm14 = vcmp.eq.s32.totalorder %v4150_v25, %v5153_v53  ;;  %vm1053_vm15 = vcmp.eq.s32.totalorder %v4158_v30, %v5153_v53  ;;  %vm1834_vm0 = vcmp.eq.s32.totalorder %v4166_v34, %v5153_v53 }
 0x15a   : > { %v3138_v60 = vadd.f32 %v2882_v22, %v2357_v59  ;;  %v2358_v16 = vadd.f32 %v2102_v42, %v1577_v15  ;;  %v793_v50 = vsel %vm528_vm14, %v4115_v1, 0.0  ;;  %v1318_v51 = vsel %vm1053_vm15, %v4123_v5, 0.0 }
 0x15b   : > { %v1574_v17 = vadd.f32 %v1318_v51, %v793_v50  ;;  %v2099_v19 = vsel %vm1834_vm0, %v4131_v12, 0.0  ;;  %vm2615_vm1 = vcmp.eq.s32.totalorder %v4174_v38, %v5153_v53  ;;  %vm529_vm2 = vcmp.eq.s32.totalorder %v4152_v27, %v5153_v53 }
 0x15c   : > { %3380 = vmatpush.xpose.msrb.mxu0 %v3138_v60  ;;  %v3139_v41 = vadd.f32 %v2883_v46, %v2358_v16  ;;  %v2880_v56 = vsel %vm2615_vm1, %v4139_v20, 0.0  ;;  %v794_v48 = vsel %vm529_vm2, %v4117_v2, 0.0  ;;  %vm1054_vm3 = vcmp.eq.s32.totalorder %v4160_v31, %v5153_v53 }
 0x15d   : > { %v2355_v43 = vadd.f32 %v2099_v19, %v1574_v17  ;;  %v1319_v63 = vsel %vm1054_vm3, %v4125_v8, 0.0  ;;  %vm1835_vm4 = vcmp.eq.s32.totalorder %v4168_v35, %v5153_v53  ;;  %vm2616_vm6 = vcmp.eq.s32.totalorder %v4176_v40, %v5153_v53 }
 0x15e   : > { %3400 = vmatpush.xpose.msrb.mxu1 %v3139_v41  ;;  %v1575_v54 = vadd.f32 %v1319_v63, %v794_v48  ;;  %v2100_v44 = vsel %vm1835_vm4, %v4133_v13, 0.0  ;;  %v2881_v45 = vsel %vm2616_vm6, %v4141_v21, 0.0  ;;  %vm526_vm7 = vcmp.eq.s32.totalorder %v4146_v23, %v5153_v53 }
 0x15f   : > { %v3136_v47 = vadd.f32 %v2880_v56, %v2355_v43  ;;  %v791_v62 = vsel %vm526_vm7, %v4111_v61, 0.0  ;;  %vm1051_vm8 = vcmp.eq.s32.totalorder %v4154_v28, %v5153_v53  ;;  %vm1832_vm9 = vcmp.eq.s32.totalorder %v4162_v32, %v5153_v53 }
 0x160   : > { %v2356_v7 = vadd.f32 %v2100_v44, %v1575_v54  ;;  %v1316_v49 = vsel %vm1051_vm8, %v4119_v3, 0.0  ;;  %v2097_v57 = vsel %vm1832_vm9, %v4127_v9, 0.0  ;;  %vm2613_vm10 = vcmp.eq.s32.totalorder %v4170_v36, %v5153_v53 }
 0x161   : > { %3421 = vmatpush.xpose.msrb.mxu2 %v3136_v47  ;;  %v1572_v22 = vadd.f32 %v1316_v49, %v791_v62  ;;  %v2878_v52 = vsel %vm2613_vm10, %v4135_v14, 0.0  ;;  %vm527_vm11 = vcmp.eq.s32.totalorder %v4148_v24, %v5153_v53  ;;  %vm1052_vm12 = vcmp.eq.s32.totalorder %v4156_v29, %v5153_v53 }
 0x162   : > { %v3137_v58 = vadd.f32 %v2881_v45, %v2356_v7  ;;  %v792_v55 = vsel %vm527_vm11, %v4113_v0, 0.0  ;;  %v1317_v59 = vsel %vm1052_vm12, %v4121_v4, 0.0  ;;  %vm1833_vm13 = vcmp.eq.s32.totalorder %v4164_v33, %v5153_v53 }
 0x163   : > { %v2353_v15 = vadd.f32 %v2097_v57, %v1572_v22  ;;  %v1573_v42 = vadd.f32 %v1317_v59, %v792_v55  ;;  %v2098_v46 = vsel %vm1833_vm13, %v4129_v11, 0.0  ;;  %vm2614_vm14 = vcmp.eq.s32.totalorder %v4172_v37, %v5153_v53 }
 0x164   : > { %3441 = vmatpush.xpose.msrb.mxu3 %v3137_v58  ;;  %v2879_v60 = vsel %vm2614_vm14, %v4137_v18, 0.0  ;;  %vm524_vm15 = vcmp.eq.s32.totalorder %v4150_v25, %v5156_v6  ;;  %vm1049_vm0 = vcmp.eq.s32.totalorder %v4158_v30, %v5156_v6  ;;  %vm1830_vm1 = vcmp.eq.s32.totalorder %v4166_v34, %v5156_v6 }
 0x165   : > { %v3134_v16 = vadd.f32 %v2878_v52, %v2353_v15  ;;  %v2354_v50 = vadd.f32 %v2098_v46, %v1573_v42  ;;  %v789_v51 = vsel %vm524_vm15, %v4115_v1, 0.0  ;;  %v1314_v17 = vsel %vm1049_vm0, %v4123_v5, 0.0 }
 0x166   : > { %v1570_v19 = vadd.f32 %v1314_v17, %v789_v51  ;;  %v2095_v53 = vsel %vm1830_vm1, %v4131_v12, 0.0  ;;  %vm2611_vm2 = vcmp.eq.s32.totalorder %v4174_v38, %v5156_v6  ;;  %vm525_vm3 = vcmp.eq.s32.totalorder %v4152_v27, %v5156_v6 }
 0x167   : > { %3381 = vmatpush.xpose.msrb.mxu0 %v3134_v16  ;;  %v3135_v41 = vadd.f32 %v2879_v60, %v2354_v50  ;;  %v2876_v56 = vsel %vm2611_vm2, %v4139_v20, 0.0  ;;  %v790_v48 = vsel %vm525_vm3, %v4117_v2, 0.0  ;;  %vm1050_vm4 = vcmp.eq.s32.totalorder %v4160_v31, %v5156_v6 }
 0x168   : > { %v2351_v43 = vadd.f32 %v2095_v53, %v1570_v19  ;;  %v1315_v63 = vsel %vm1050_vm4, %v4125_v8, 0.0  ;;  %vm1831_vm6 = vcmp.eq.s32.totalorder %v4168_v35, %v5156_v6  ;;  %vm2612_vm7 = vcmp.eq.s32.totalorder %v4176_v40, %v5156_v6 }
 0x169   : > { %3401 = vmatpush.xpose.msrb.mxu1 %v3135_v41  ;;  %v1571_v54 = vadd.f32 %v1315_v63, %v790_v48  ;;  %v2096_v44 = vsel %vm1831_vm6, %v4133_v13, 0.0  ;;  %v2877_v45 = vsel %vm2612_vm7, %v4141_v21, 0.0  ;;  %vm522_vm8 = vcmp.eq.s32.totalorder %v4146_v23, %v5156_v6 }
 0x16a   : > { %v3132_v47 = vadd.f32 %v2876_v56, %v2351_v43  ;;  %v787_v62 = vsel %vm522_vm8, %v4111_v61, 0.0  ;;  %vm1047_vm9 = vcmp.eq.s32.totalorder %v4154_v28, %v5156_v6  ;;  %vm1828_vm10 = vcmp.eq.s32.totalorder %v4162_v32, %v5156_v6 }
 0x16b   : > { %v2352_v7 = vadd.f32 %v2096_v44, %v1571_v54  ;;  %v1312_v49 = vsel %vm1047_vm9, %v4119_v3, 0.0  ;;  %v2093_v57 = vsel %vm1828_vm10, %v4127_v9, 0.0  ;;  %vm2609_vm11 = vcmp.eq.s32.totalorder %v4170_v36, %v5156_v6 }
 0x16c   : > { %3422 = vmatpush.xpose.msrb.mxu2 %v3132_v47  ;;  %v1568_v22 = vadd.f32 %v1312_v49, %v787_v62  ;;  %v2874_v52 = vsel %vm2609_vm11, %v4135_v14, 0.0  ;;  %vm523_vm12 = vcmp.eq.s32.totalorder %v4148_v24, %v5156_v6  ;;  %vm1048_vm13 = vcmp.eq.s32.totalorder %v4156_v29, %v5156_v6 }
 0x16d   : > { %v3133_v58 = vadd.f32 %v2877_v45, %v2352_v7  ;;  %v788_v55 = vsel %vm523_vm12, %v4113_v0, 0.0  ;;  %v1313_v59 = vsel %vm1048_vm13, %v4121_v4, 0.0  ;;  %vm1829_vm14 = vcmp.eq.s32.totalorder %v4164_v33, %v5156_v6 }
 0x16e   : > { %v2349_v15 = vadd.f32 %v2093_v57, %v1568_v22  ;;  %v1569_v42 = vadd.f32 %v1313_v59, %v788_v55  ;;  %v2094_v46 = vsel %vm1829_vm14, %v4129_v11, 0.0  ;;  %vm2610_vm15 = vcmp.eq.s32.totalorder %v4172_v37, %v5156_v6 }
 0x16f   : > { %3442 = vmatpush.xpose.msrb.mxu3 %v3133_v58  ;;  %v2875_v60 = vsel %vm2610_vm15, %v4137_v18, 0.0  ;;  %v318_v16 = vadd.s32 176, %v4094_v26  ;;  %v317_v50 = vadd.s32 168, %v4094_v26  ;;  %v316_v51 = vadd.s32 160, %v4094_v26 }
 0x170   : > { %v3130_v17 = vadd.f32 %v2874_v52, %v2349_v15  ;;  %v2350_v19 = vadd.f32 %v2094_v46, %v1569_v42  ;;  %v315_v53 = vadd.s32 152, %v4094_v26 }
 0x171   : > { %v384_v41 = vadd.s32 %v4099_v39, %v318_v16  ;;  %v5340_v48 = vadd.s32 %v4099_v39, %v317_v50  ;;  %v5343_v6 = vadd.s32 %v4099_v39, %v316_v51 }
 0x172   : > { %3382 = vmatpush.xpose.msrb.mxu0 %v3130_v17  ;;  %v3131_v56 = vadd.f32 %v2875_v60, %v2350_v19  ;;  %v5346_v43 = vadd.s32 %v4099_v39, %v315_v53 }
 0x173   : > { %vm520_vm0 = vcmp.eq.s32.totalorder %v4150_v25, %v384_v41  ;;  %vm1045_vm1 = vcmp.eq.s32.totalorder %v4158_v30, %v384_v41  ;;  %vm1826_vm2 = vcmp.eq.s32.totalorder %v4166_v34, %v384_v41  ;;  %vm2607_vm3 = vcmp.eq.s32.totalorder %v4174_v38, %v384_v41 }
 0x174   : > { %3402 = vmatpush.xpose.msrb.mxu1 %v3131_v56  ;;  %v785_v63 = vsel %vm520_vm0, %v4115_v1, 0.0  ;;  %v1310_v54 = vsel %vm1045_vm1, %v4123_v5, 0.0  ;;  %v2091_v44 = vsel %vm1826_vm2, %v4131_v12, 0.0  ;;  %v2872_v45 = vsel %vm2607_vm3, %v4139_v20, 0.0 }
 0x175   : > { %v1566_v47 = vadd.f32 %v1310_v54, %v785_v63  ;;  %vm521_vm4 = vcmp.eq.s32.totalorder %v4152_v27, %v384_v41  ;;  %vm1046_vm6 = vcmp.eq.s32.totalorder %v4160_v31, %v384_v41  ;;  %vm1827_vm7 = vcmp.eq.s32.totalorder %v4168_v35, %v384_v41 }
 0x176   : > { %v786_v62 = vsel %vm521_vm4, %v4117_v2, 0.0  ;;  %v1311_v7 = vsel %vm1046_vm6, %v4125_v8, 0.0  ;;  %v2092_v49 = vsel %vm1827_vm7, %v4133_v13, 0.0  ;;  %vm2608_vm8 = vcmp.eq.s32.totalorder %v4176_v40, %v384_v41 }
 0x177   : > { %v2347_v57 = vadd.f32 %v2091_v44, %v1566_v47  ;;  %v1567_v22 = vadd.f32 %v1311_v7, %v786_v62  ;;  %v2873_v52 = vsel %vm2608_vm8, %v4141_v21, 0.0  ;;  %vm518_vm9 = vcmp.eq.s32.totalorder %v4146_v23, %v384_v41 }
 0x178   : > { %v783_v58 = vsel %vm518_vm9, %v4111_v61, 0.0  ;;  %vm1043_vm10 = vcmp.eq.s32.totalorder %v4154_v28, %v384_v41  ;;  %vm1824_vm11 = vcmp.eq.s32.totalorder %v4162_v32, %v384_v41  ;;  %vm2605_vm12 = vcmp.eq.s32.totalorder %v4170_v36, %v384_v41 }
 0x179   : > { %v3128_v55 = vadd.f32 %v2872_v45, %v2347_v57  ;;  %v2348_v59 = vadd.f32 %v2092_v49, %v1567_v22  ;;  %v1308_v15 = vsel %vm1043_vm10, %v4119_v3, 0.0  ;;  %v2089_v42 = vsel %vm1824_vm11, %v4127_v9, 0.0 }
 0x17a   : > { %v1564_v46 = vadd.f32 %v1308_v15, %v783_v58  ;;  %v2870_v60 = vsel %vm2605_vm12, %v4135_v14, 0.0  ;;  %vm519_vm13 = vcmp.eq.s32.totalorder %v4148_v24, %v384_v41  ;;  %vm1044_vm14 = vcmp.eq.s32.totalorder %v4156_v29, %v384_v41 }
 0x17b   : > { %3423 = vmatpush.xpose.msrb.mxu2 %v3128_v55  ;;  %v3129_v16 = vadd.f32 %v2873_v52, %v2348_v59  ;;  %v784_v50 = vsel %vm519_vm13, %v4113_v0, 0.0  ;;  %v1309_v51 = vsel %vm1044_vm14, %v4121_v4, 0.0  ;;  %vm1825_vm15 = vcmp.eq.s32.totalorder %v4164_v33, %v384_v41 }
 0x17c   : > { %v2345_v17 = vadd.f32 %v2089_v42, %v1564_v46  ;;  %v1565_v19 = vadd.f32 %v1309_v51, %v784_v50  ;;  %v2090_v53 = vsel %vm1825_vm15, %v4129_v11, 0.0  ;;  %vm2606_vm0 = vcmp.eq.s32.totalorder %v4172_v37, %v384_v41 }
 0x17d   : > { %3443 = vmatpush.xpose.msrb.mxu3 %v3129_v16  ;;  %v2871_v56 = vsel %vm2606_vm0, %v4137_v18, 0.0  ;;  %vm516_vm1 = vcmp.eq.s32.totalorder %v4150_v25, %v5340_v48  ;;  %vm1041_vm2 = vcmp.eq.s32.totalorder %v4158_v30, %v5340_v48  ;;  %vm1822_vm3 = vcmp.eq.s32.totalorder %v4166_v34, %v5340_v48 }
 0x17e   : > { %v3126_v63 = vadd.f32 %v2870_v60, %v2345_v17  ;;  %v2346_v54 = vadd.f32 %v2090_v53, %v1565_v19  ;;  %v781_v44 = vsel %vm516_vm1, %v4115_v1, 0.0  ;;  %v1306_v45 = vsel %vm1041_vm2, %v4123_v5, 0.0 }
 0x17f   : > { %v1562_v47 = vadd.f32 %v1306_v45, %v781_v44  ;;  %v2087_v41 = vsel %vm1822_vm3, %v4131_v12, 0.0  ;;  %vm2603_vm4 = vcmp.eq.s32.totalorder %v4174_v38, %v5340_v48  ;;  %vm517_vm6 = vcmp.eq.s32.totalorder %v4152_v27, %v5340_v48 }
 0x180   : > { %3383 = vmatpush.xpose.msrb.mxu0 %v3126_v63  ;;  %v3127_v62 = vadd.f32 %v2871_v56, %v2346_v54  ;;  %v2868_v7 = vsel %vm2603_vm4, %v4139_v20, 0.0  ;;  %v782_v49 = vsel %vm517_vm6, %v4117_v2, 0.0  ;;  %vm1042_vm7 = vcmp.eq.s32.totalorder %v4160_v31, %v5340_v48 }
 0x181   : > { %v2343_v57 = vadd.f32 %v2087_v41, %v1562_v47  ;;  %v1307_v22 = vsel %vm1042_vm7, %v4125_v8, 0.0  ;;  %vm1823_vm8 = vcmp.eq.s32.totalorder %v4168_v35, %v5340_v48  ;;  %vm2604_vm9 = vcmp.eq.s32.totalorder %v4176_v40, %v5340_v48 }
 0x182   : > { %3403 = vmatpush.xpose.msrb.mxu1 %v3127_v62  ;;  %v1563_v52 = vadd.f32 %v1307_v22, %v782_v49  ;;  %v2088_v58 = vsel %vm1823_vm8, %v4133_v13, 0.0  ;;  %v2869_v55 = vsel %vm2604_vm9, %v4141_v21, 0.0  ;;  %vm514_vm10 = vcmp.eq.s32.totalorder %v4146_v23, %v5340_v48 }
 0x183   : > { %v3124_v59 = vadd.f32 %v2868_v7, %v2343_v57  ;;  %v779_v15 = vsel %vm514_vm10, %v4111_v61, 0.0  ;;  %vm1039_vm11 = vcmp.eq.s32.totalorder %v4154_v28, %v5340_v48  ;;  %vm1820_vm12 = vcmp.eq.s32.totalorder %v4162_v32, %v5340_v48 }
 0x184   : > { %v2344_v42 = vadd.f32 %v2088_v58, %v1563_v52  ;;  %v1304_v46 = vsel %vm1039_vm11, %v4119_v3, 0.0  ;;  %v2085_v60 = vsel %vm1820_vm12, %v4127_v9, 0.0  ;;  %vm2601_vm13 = vcmp.eq.s32.totalorder %v4170_v36, %v5340_v48 }
 0x185   : > { %3424 = vmatpush.xpose.msrb.mxu2 %v3124_v59  ;;  %v1560_v16 = vadd.f32 %v1304_v46, %v779_v15  ;;  %v2866_v50 = vsel %vm2601_vm13, %v4135_v14, 0.0  ;;  %vm515_vm14 = vcmp.eq.s32.totalorder %v4148_v24, %v5340_v48  ;;  %vm1040_vm15 = vcmp.eq.s32.totalorder %v4156_v29, %v5340_v48 }
 0x186   : > { %v3125_v51 = vadd.f32 %v2869_v55, %v2344_v42  ;;  %v780_v17 = vsel %vm515_vm14, %v4113_v0, 0.0  ;;  %v1305_v19 = vsel %vm1040_vm15, %v4121_v4, 0.0  ;;  %vm1821_vm0 = vcmp.eq.s32.totalorder %v4164_v33, %v5340_v48 }
 0x187   : > { %v2341_v53 = vadd.f32 %v2085_v60, %v1560_v16  ;;  %v1561_v56 = vadd.f32 %v1305_v19, %v780_v17  ;;  %v2086_v63 = vsel %vm1821_vm0, %v4129_v11, 0.0  ;;  %vm2602_vm1 = vcmp.eq.s32.totalorder %v4172_v37, %v5340_v48 }
 0x188   : > { %3444 = vmatpush.xpose.msrb.mxu3 %v3125_v51  ;;  %v2867_v54 = vsel %vm2602_vm1, %v4137_v18, 0.0  ;;  %vm512_vm2 = vcmp.eq.s32.totalorder %v4150_v25, %v5343_v6  ;;  %vm1037_vm3 = vcmp.eq.s32.totalorder %v4158_v30, %v5343_v6  ;;  %vm1818_vm4 = vcmp.eq.s32.totalorder %v4166_v34, %v5343_v6 }
 0x189   : > { %v3122_v44 = vadd.f32 %v2866_v50, %v2341_v53  ;;  %v2342_v45 = vadd.f32 %v2086_v63, %v1561_v56  ;;  %v777_v47 = vsel %vm512_vm2, %v4115_v1, 0.0  ;;  %v1302_v41 = vsel %vm1037_vm3, %v4123_v5, 0.0 }
 0x18a   : > { %v1558_v62 = vadd.f32 %v1302_v41, %v777_v47  ;;  %v2083_v48 = vsel %vm1818_vm4, %v4131_v12, 0.0  ;;  %vm2599_vm6 = vcmp.eq.s32.totalorder %v4174_v38, %v5343_v6  ;;  %vm513_vm7 = vcmp.eq.s32.totalorder %v4152_v27, %v5343_v6 }
 0x18b   : > { %3384 = vmatpush.xpose.msrb.mxu0 %v3122_v44  ;;  %v3123_v7 = vadd.f32 %v2867_v54, %v2342_v45  ;;  %v2864_v49 = vsel %vm2599_vm6, %v4139_v20, 0.0  ;;  %v778_v57 = vsel %vm513_vm7, %v4117_v2, 0.0  ;;  %vm1038_vm8 = vcmp.eq.s32.totalorder %v4160_v31, %v5343_v6 }
 0x18c   : > { %v2339_v22 = vadd.f32 %v2083_v48, %v1558_v62  ;;  %v1303_v52 = vsel %vm1038_vm8, %v4125_v8, 0.0  ;;  %vm1819_vm9 = vcmp.eq.s32.totalorder %v4168_v35, %v5343_v6  ;;  %vm2600_vm10 = vcmp.eq.s32.totalorder %v4176_v40, %v5343_v6 }
 0x18d   : > { %3404 = vmatpush.xpose.msrb.mxu1 %v3123_v7  ;;  %v1559_v58 = vadd.f32 %v1303_v52, %v778_v57  ;;  %v2084_v55 = vsel %vm1819_vm9, %v4133_v13, 0.0  ;;  %v2865_v59 = vsel %vm2600_vm10, %v4141_v21, 0.0  ;;  %vm510_vm11 = vcmp.eq.s32.totalorder %v4146_v23, %v5343_v6 }
 0x18e   : > { %v3120_v15 = vadd.f32 %v2864_v49, %v2339_v22  ;;  %v775_v42 = vsel %vm510_vm11, %v4111_v61, 0.0  ;;  %vm1035_vm12 = vcmp.eq.s32.totalorder %v4154_v28, %v5343_v6  ;;  %vm1816_vm13 = vcmp.eq.s32.totalorder %v4162_v32, %v5343_v6 }
 0x18f   : > { %v2340_v46 = vadd.f32 %v2084_v55, %v1559_v58  ;;  %v1300_v60 = vsel %vm1035_vm12, %v4119_v3, 0.0  ;;  %v2081_v16 = vsel %vm1816_vm13, %v4127_v9, 0.0  ;;  %vm2597_vm14 = vcmp.eq.s32.totalorder %v4170_v36, %v5343_v6 }
 0x190   : > { %3425 = vmatpush.xpose.msrb.mxu2 %v3120_v15  ;;  %v1556_v50 = vadd.f32 %v1300_v60, %v775_v42  ;;  %v2862_v51 = vsel %vm2597_vm14, %v4135_v14, 0.0  ;;  %vm511_vm15 = vcmp.eq.s32.totalorder %v4148_v24, %v5343_v6  ;;  %vm1036_vm0 = vcmp.eq.s32.totalorder %v4156_v29, %v5343_v6 }
 0x191   : > { %v3121_v17 = vadd.f32 %v2865_v59, %v2340_v46  ;;  %v776_v19 = vsel %vm511_vm15, %v4113_v0, 0.0  ;;  %v1301_v53 = vsel %vm1036_vm0, %v4121_v4, 0.0  ;;  %vm1817_vm1 = vcmp.eq.s32.totalorder %v4164_v33, %v5343_v6 }
 0x192   : > { %v2337_v56 = vadd.f32 %v2081_v16, %v1556_v50  ;;  %v1557_v63 = vadd.f32 %v1301_v53, %v776_v19  ;;  %v2082_v54 = vsel %vm1817_vm1, %v4129_v11, 0.0  ;;  %vm2598_vm2 = vcmp.eq.s32.totalorder %v4172_v37, %v5343_v6 }
 0x193   : > { %3445 = vmatpush.xpose.msrb.mxu3 %v3121_v17  ;;  %v2863_v44 = vsel %vm2598_vm2, %v4137_v18, 0.0  ;;  %vm508_vm3 = vcmp.eq.s32.totalorder %v4150_v25, %v5346_v43  ;;  %vm1033_vm4 = vcmp.eq.s32.totalorder %v4158_v30, %v5346_v43  ;;  %vm1814_vm6 = vcmp.eq.s32.totalorder %v4166_v34, %v5346_v43  ;;  %v195_v17 = vld [vmem:[#allocation2 + $0x4] ss:$8 sm:$0xf] }
 0x194   : > { %v3118_v45 = vadd.f32 %v2862_v51, %v2337_v56  ;;  %v2338_v47 = vadd.f32 %v2082_v54, %v1557_v63  ;;  %v773_v41 = vsel %vm508_vm3, %v4115_v1, 0.0  ;;  %v1298_v62 = vsel %vm1033_vm4, %v4123_v5, 0.0  ;;  %v197_v63 = vld [vmem:[#allocation2 + $0x5] ss:$8 sm:$0xf] }
 0x195   : > { %v1554_v48 = vadd.f32 %v1298_v62, %v773_v41  ;;  %v2079_v6 = vsel %vm1814_vm6, %v4131_v12, 0.0  ;;  %vm2595_vm7 = vcmp.eq.s32.totalorder %v4174_v38, %v5346_v43  ;;  %vm509_vm8 = vcmp.eq.s32.totalorder %v4152_v27, %v5346_v43  ;;  %v3837_v62 = vld [vmem:[#allocation2] ss:$8 sm:$0xf] }
 0x196   : > { %3385 = vmatpush.xpose.msrb.mxu0 %v3118_v45  ;;  %v3119_v7 = vadd.f32 %v2863_v44, %v2338_v47  ;;  %v2860_v49 = vsel %vm2595_vm7, %v4139_v20, 0.0  ;;  %v774_v57 = vsel %vm509_vm8, %v4117_v2, 0.0  ;;  %vm1034_vm9 = vcmp.eq.s32.totalorder %v4160_v31, %v5346_v43 }
 0x197   : > { %v2335_v22 = vadd.f32 %v2079_v6, %v1554_v48  ;;  %v1299_v52 = vsel %vm1034_vm9, %v4125_v8, 0.0  ;;  %vm1815_vm10 = vcmp.eq.s32.totalorder %v4168_v35, %v5346_v43  ;;  %vm2596_vm11 = vcmp.eq.s32.totalorder %v4176_v40, %v5346_v43 }
 0x198   : > { %3405 = vmatpush.xpose.msrb.mxu1 %v3119_v7  ;;  %v1555_v58 = vadd.f32 %v1299_v52, %v774_v57  ;;  %v2080_v55 = vsel %vm1815_vm10, %v4133_v13, 0.0  ;;  %v2861_v59 = vsel %vm2596_vm11, %v4141_v21, 0.0  ;;  %vm506_vm12 = vcmp.eq.s32.totalorder %v4146_v23, %v5346_v43 }
 0x199   : > { %v3116_v15 = vadd.f32 %v2860_v49, %v2335_v22  ;;  %v771_v42 = vsel %vm506_vm12, %v4111_v61, 0.0  ;;  %vm1031_vm13 = vcmp.eq.s32.totalorder %v4154_v28, %v5346_v43  ;;  %vm1812_vm14 = vcmp.eq.s32.totalorder %v4162_v32, %v5346_v43  ;;  %v3838_v49 = vld [vmem:[#allocation2 + $0x1] ss:$8 sm:$0xf] }
 0x19a   : > { %v2336_v46 = vadd.f32 %v2080_v55, %v1555_v58  ;;  %v1296_v60 = vsel %vm1031_vm13, %v4119_v3, 0.0  ;;  %v2077_v16 = vsel %vm1812_vm14, %v4127_v9, 0.0  ;;  %vm2593_vm15 = vcmp.eq.s32.totalorder %v4170_v36, %v5346_v43 }
 0x19b   : > { %3426 = vmatpush.xpose.msrb.mxu2 %v3116_v15  ;;  %v1552_v50 = vadd.f32 %v1296_v60, %v771_v42  ;;  %v2858_v51 = vsel %vm2593_vm15, %v4135_v14, 0.0  ;;  %vm507_vm0 = vcmp.eq.s32.totalorder %v4148_v24, %v5346_v43  ;;  %vm1032_vm1 = vcmp.eq.s32.totalorder %v4156_v29, %v5346_v43 }
 0x19c   : > { %v3117_v19 = vadd.f32 %v2861_v59, %v2336_v46  ;;  %v772_v53 = vsel %vm507_vm0, %v4113_v0, 0.0  ;;  %v1297_v56 = vsel %vm1032_vm1, %v4121_v4, 0.0  ;;  %vm1813_vm2 = vcmp.eq.s32.totalorder %v4164_v33, %v5346_v43 }
 0x19d   : > { %v2333_v54 = vadd.f32 %v2077_v16, %v1552_v50  ;;  %v1553_v44 = vadd.f32 %v1297_v56, %v772_v53  ;;  %v2078_v45 = vsel %vm1813_vm2, %v4129_v11, 0.0  ;;  %vm2594_vm3 = vcmp.eq.s32.totalorder %v4172_v37, %v5346_v43 }
 0x19e   : > { %3446 = vmatpush.xpose.msrb.mxu3 %v3117_v19  ;;  %v2859_v47 = vsel %vm2594_vm3, %v4137_v18, 0.0  ;;  %v314_v41 = vadd.s32 144, %v4094_v26  ;;  %v264_v48 = vmul.f32 %v3837_v62, %v195_v17  ;;  %v265_v57 = vmul.f32 %v3838_v49, %v197_v63 }
 0x19f   : > { %v3114_v6 = vadd.f32 %v2858_v51, %v2333_v54  ;;  %v2334_v7 = vadd.f32 %v2078_v45, %v1553_v44  ;;  %v3989_v52 = vmov 1.0   ;;  %v268_v55 = vmul.f32 %v3837_v62, %v197_v63 }
 0x1a0   : > { %v380_v22 = vadd.s32 %v4099_v39, %v314_v41  ;;  %v263_v58 = vsel %vm4088_vm5, 0.0, %v3989_v52  ;;  %v269_v59 = vmul.f32 %v3838_v49, %v195_v17  ;;  %v266_v15 = vsub.f32 %v264_v48, %v265_v57 }
 0x1a1   : > { %3386 = vmatpush.xpose.msrb.mxu0 %v3114_v6  ;;  %v3115_v43 = vadd.f32 %v2859_v47, %v2334_v7  ;;  %v313_v42 = vadd.s32 136, %v4094_v26  ;;  %v5530_v46 = vadd.s32 128, %v4094_v26  ;;  %vm290_vm9 = vcmask 1040384  }
 0x1a2   : > { %vm504_vm4 = vcmp.eq.s32.totalorder %v4150_v25, %v380_v22  ;;  %vm1029_vm6 = vcmp.eq.s32.totalorder %v4158_v30, %v380_v22  ;;  %vm1810_vm7 = vcmp.eq.s32.totalorder %v4166_v34, %v380_v22  ;;  %vm2591_vm8 = vcmp.eq.s32.totalorder %v4174_v38, %v380_v22 }
 0x1a3   : > { %3406 = vmatpush.xpose.msrb.mxu1 %v3115_v43  ;;  %v769_v10 = vsel %vm504_vm4, %v4115_v1, 0.0  ;;  %v1294_v60 = vsel %vm1029_vm6, %v4123_v5, 0.0  ;;  %v2075_v16 = vsel %vm1810_vm7, %v4131_v12, 0.0  ;;  %v2856_v50 = vsel %vm2591_vm8, %v4139_v20, 0.0 }
 0x1a4   : > { %v1550_v51 = vadd.f32 %v1294_v60, %v769_v10  ;;  %vm505_vm5 = vcmp.eq.s32.totalorder %v4152_v27, %v380_v22  ;;  %vm1030_vm10 = vcmp.eq.s32.totalorder %v4160_v31, %v380_v22  ;;  %vm1811_vm11 = vcmp.eq.s32.totalorder %v4168_v35, %v380_v22 }
 0x1a5   : > { %v770_v17 = vsel %vm505_vm5, %v4117_v2, 0.0  ;;  %v1295_v19 = vsel %vm1030_vm10, %v4125_v8, 0.0  ;;  %v2076_v53 = vsel %vm1811_vm11, %v4133_v13, 0.0  ;;  %vm2592_vm12 = vcmp.eq.s32.totalorder %v4176_v40, %v380_v22 }
 0x1a6   : > { %v2331_v56 = vadd.f32 %v2075_v16, %v1550_v51  ;;  %v1551_v63 = vadd.f32 %v1295_v19, %v770_v17  ;;  %v2857_v54 = vsel %vm2592_vm12, %v4141_v21, 0.0  ;;  %v5548_v44 = vmul.f32 %v266_v15, %v263_v58 }
 0x1a7   : > { %v270_v45 = vadd.f32 %v269_v59, %v268_v55  ;;  %vm502_vm13 = vcmp.eq.s32.totalorder %v4146_v23, %v380_v22  ;;  %vm1027_vm14 = vcmp.eq.s32.totalorder %v4154_v28, %v380_v22  ;;  %vm1808_vm15 = vcmp.eq.s32.totalorder %v4162_v32, %v380_v22 }
 0x1a8   : > { %v3112_v47 = vadd.f32 %v2856_v50, %v2331_v56  ;;  %v2332_v41 = vadd.f32 %v2076_v53, %v1551_v63  ;;  %v275_v62 = vperm.slane %v5548_v44, 2  ;;  %v767_v48 = vsel %vm502_vm13, %v4111_v61, 0.0 }
 0x1a9   : > { %v5555_v6 = vmul.f32 %v270_v45, %v263_v58  ;;  %v1292_v7 = vsel %vm1027_vm14, %v4119_v3, 0.0  ;;  %v2073_v49 = vsel %vm1808_vm15, %v4127_v9, 0.0  ;;  %vm2589_vm0 = vcmp.eq.s32.totalorder %v4170_v36, %v380_v22 }
 0x1aa   : > { %3427 = vmatpush.xpose.msrb.mxu2 %v3112_v47  ;;  %v3113_v57 = vadd.f32 %v2857_v54, %v2332_v41  ;;  %v1548_v52 = vadd.f32 %v1292_v7, %v767_v48  ;;  %v2854_v55 = vsel %vm2589_vm0, %v4135_v14, 0.0  ;;  %vm503_vm1 = vcmp.eq.s32.totalorder %v4148_v24, %v380_v22 }
 0x1ab   : > { %v284_v59 = vperm.slane %v5555_v6, 2  ;;  %v768_v43 = vsel %vm503_vm1, %v4113_v0, 0.0  ;;  %vm1028_vm2 = vcmp.eq.s32.totalorder %v4156_v29, %v380_v22  ;;  %vm1809_vm3 = vcmp.eq.s32.totalorder %v4164_v33, %v380_v22 }
 0x1ac   : > { %3447 = vmatpush.xpose.msrb.mxu3 %v3113_v57  ;;  %v2329_v58 = vadd.f32 %v2073_v49, %v1548_v52  ;;  %v1293_v15 = vsel %vm1028_vm2, %v4121_v4, 0.0  ;;  %v2074_v10 = vsel %vm1809_vm3, %v4129_v11, 0.0  ;;  %vm2590_vm4 = vcmp.eq.s32.totalorder %v4172_v37, %v380_v22 }
 0x1ad   : > { %v5570_v60 = vsel %vm290_vm9, %v275_v62, %v284_v59  ;;  %v1549_v16 = vadd.f32 %v1293_v15, %v768_v43  ;;  %v2855_v50 = vsel %vm2590_vm4, %v4137_v18, 0.0  ;;  %v5574_v51 = vadd.s32 %v4099_v39, %v313_v42 }
 0x1ae   : > { %3350 = vmatmul.f32.vlgmr.msra.gmra.mxu2 %v5570_v60  ;;  %v3110_v17 = vadd.f32 %v2854_v55, %v2329_v58  ;;  %v276_v19 = vperm.slane %v5548_v44, 3  ;;  %v285_v53 = vperm.slane %v5555_v6, 3  ;;  %v273_v56 = vperm.slane %v5548_v44, 0 }
 0x1af   : > { %v2330_v63 = vadd.f32 %v2074_v10, %v1549_v16  ;;  %vm500_vm6 = vcmp.eq.s32.totalorder %v4150_v25, %v5574_v51  ;;  %vm1025_vm7 = vcmp.eq.s32.totalorder %v4158_v30, %v5574_v51  ;;  %vm1806_vm8 = vcmp.eq.s32.totalorder %v4166_v34, %v5574_v51 }
 0x1b0   : > { %3387 = vmatpush.xpose.msrb.mxu0 %v3110_v17  ;;  %v765_v22 = vsel %vm500_vm6, %v4115_v1, 0.0  ;;  %v1290_v42 = vsel %vm1025_vm7, %v4123_v5, 0.0  ;;  %v2071_v54 = vsel %vm1806_vm8, %v4131_v12, 0.0  ;;  %vm2587_vm5 = vcmp.eq.s32.totalorder %v4174_v38, %v5574_v51 }
 0x1b1   : > { %v3111_v45 = vadd.f32 %v2855_v50, %v2330_v63  ;;  %v1546_v47 = vadd.f32 %v1290_v42, %v765_v22  ;;  %v2852_v41 = vsel %vm2587_vm5, %v4139_v20, 0.0  ;;  %v5593_v62 = vsel %vm290_vm9, %v276_v19, %v285_v53 }
 0x1b2   : > { %3370 = vmatmul.f32.vlgmr.msra.gmra.mxu3 %v5593_v62  ;;  %vm501_vm10 = vcmp.eq.s32.totalorder %v4152_v27, %v5574_v51  ;;  %vm1026_vm11 = vcmp.eq.s32.totalorder %v4160_v31, %v5574_v51  ;;  %vm1807_vm12 = vcmp.eq.s32.totalorder %v4168_v35, %v5574_v51  ;;  %vm2588_vm13 = vcmp.eq.s32.totalorder %v4176_v40, %v5574_v51 }
 0x1b3   : > { %3407 = vmatpush.xpose.msrb.mxu1 %v3111_v45  ;;  %v2327_v48 = vadd.f32 %v2071_v54, %v1546_v47  ;;  %v766_v7 = vsel %vm501_vm10, %v4117_v2, 0.0  ;;  %v1291_v49 = vsel %vm1026_vm11, %v4125_v8, 0.0  ;;  %v2072_v57 = vsel %vm1807_vm12, %v4133_v13, 0.0 }
 0x1b4   : > { %v1547_v52 = vadd.f32 %v1291_v49, %v766_v7  ;;  %v2853_v55 = vsel %vm2588_vm13, %v4141_v21, 0.0  ;;  %v282_v59 = vperm.slane %v5555_v6, 0  ;;  %v274_v43 = vperm.slane %v5548_v44, 1 }
 0x1b5   : > { %v3108_v58 = vadd.f32 %v2852_v41, %v2327_v48  ;;  %v283_v15 = vperm.slane %v5555_v6, 1  ;;  %vm498_vm14 = vcmp.eq.s32.totalorder %v4146_v23, %v5574_v51  ;;  %vm1023_vm15 = vcmp.eq.s32.totalorder %v4154_v28, %v5574_v51 }
 0x1b6   : > { %v2328_v10 = vadd.f32 %v2072_v57, %v1547_v52  ;;  %v5616_v16 = vsel %vm290_vm9, %v273_v56, %v282_v59  ;;  %v763_v50 = vsel %vm498_vm14, %v4111_v61, 0.0  ;;  %v1288_v17 = vsel %vm1023_vm15, %v4119_v3, 0.0 }
 0x1b7   : > { %3428 = vmatpush.xpose.msrb.mxu2 %v3108_v58  ;;  %3310 = vmatmul.f32.vlgmr.msra.gmra.mxu0 %v5616_v16  ;;  %v5622_v44 = vsel %vm290_vm9, %v274_v43, %v283_v15  ;;  %v1544_v6 = vadd.f32 %v1288_v17, %v763_v50  ;;  %vm1804_vm0 = vcmp.eq.s32.totalorder %v4162_v32, %v5574_v51  ;;  %v343_v19 = vadd.s32 376, %v4094_v26 }
 0x1b8   : > { %v3109_v53 = vadd.f32 %v2853_v55, %v2328_v10  ;;  %3330 = vmatmul.f32.vlgmr.msra.gmra.mxu1 %v5622_v44  ;;  %v2069_v56 = vsel %vm1804_vm0, %v4127_v9, 0.0  ;;  %vm2585_vm1 = vcmp.eq.s32.totalorder %v4170_v36, %v5574_v51  ;;  %vm499_vm2 = vcmp.eq.s32.totalorder %v4148_v24, %v5574_v51 }
 0x1b9   : > { %v2325_v63 = vadd.f32 %v2069_v56, %v1544_v6  ;;  %v2850_v22 = vsel %vm2585_vm1, %v4135_v14, 0.0  ;;  %v764_v42 = vsel %vm499_vm2, %v4113_v0, 0.0  ;;  %vm1024_vm9 = vcmp.eq.s32.totalorder %v4156_v29, %v5574_v51 }
 0x1ba   : > { %3448 = vmatpush.xpose.msrb.mxu3 %v3109_v53  ;;  %v1289_v54 = vsel %vm1024_vm9, %v4121_v4, 0.0  ;;  %vm1805_vm3 = vcmp.eq.s32.totalorder %v4164_v33, %v5574_v51  ;;  %vm2586_vm4 = vcmp.eq.s32.totalorder %v4172_v37, %v5574_v51  ;;  %v5644_v45 = vadd.s32 %v4099_v39, %v5530_v46 }
 0x1bb   : > { %v3106_v47 = vadd.f32 %v2850_v22, %v2325_v63  ;;  %v1545_v41 = vadd.f32 %v1289_v54, %v764_v42  ;;  %v2070_v48 = vsel %vm1805_vm3, %v4129_v11, 0.0  ;;  %v2851_v7 = vsel %vm2586_vm4, %v4137_v18, 0.0 }
 0x1bc   : > { %vm496_vm6 = vcmp.eq.s32.totalorder %v4150_v25, %v5644_v45  ;;  %vm1021_vm7 = vcmp.eq.s32.totalorder %v4158_v30, %v5644_v45  ;;  %vm1802_vm8 = vcmp.eq.s32.totalorder %v4166_v34, %v5644_v45  ;;  %vm2583_vm5 = vcmp.eq.s32.totalorder %v4174_v38, %v5644_v45 }
 0x1bd   : > { %3388 = vmatpush.xpose.msrb.mxu0 %v3106_v47  ;;  %v2326_v46 = vadd.f32 %v2070_v48, %v1545_v41  ;;  %v761_v51 = vsel %vm496_vm6, %v4115_v1, 0.0  ;;  %v1286_v49 = vsel %vm1021_vm7, %v4123_v5, 0.0  ;;  %v2067_v57 = vsel %vm1802_vm8, %v4131_v12, 0.0 }
 0x1be   : > { %v1542_v52 = vadd.f32 %v1286_v49, %v761_v51  ;;  %v2848_v55 = vsel %vm2583_vm5, %v4139_v20, 0.0  ;;  %v5661_v59 = vadd.s32 %v4099_v39, %v343_v19  ;;  %vm497_vm10 = vcmp.eq.s32.totalorder %v4152_v27, %v5644_v45 }
 0x1bf   : > { %v3107_v43 = vadd.f32 %v2851_v7, %v2326_v46  ;;  %v762_v58 = vsel %vm497_vm10, %v4117_v2, 0.0  ;;  %vm1022_vm11 = vcmp.eq.s32.totalorder %v4160_v31, %v5644_v45  ;;  %vm1803_vm12 = vcmp.eq.s32.totalorder %v4168_v35, %v5644_v45 }
 0x1c0   : > { %v2323_v15 = vadd.f32 %v2067_v57, %v1542_v52  ;;  %vm620_vm13 = vcmp.eq.s32.totalorder %v4150_v25, %v5661_v59  ;;  %vm1145_vm14 = vcmp.eq.s32.totalorder %v4158_v30, %v5661_v59  ;;  %vm1926_vm15 = vcmp.eq.s32.totalorder %v4166_v34, %v5661_v59 }
 0x1c1   : > { %3408 = vmatpush.xpose.msrb.mxu1 %v3107_v43  ;;  %v885_v10 = vsel %vm620_vm13, %v4115_v1, 0.0  ;;  %v1410_v50 = vsel %vm1145_vm14, %v4123_v5, 0.0  ;;  %v2191_v17 = vsel %vm1926_vm15, %v4131_v12, 0.0  ;;  %vm2707_vm0 = vcmp.eq.s32.totalorder %v4174_v38, %v5661_v59 }
 0x1c2   : > { %v3104_v6 = vadd.f32 %v2848_v55, %v2323_v15  ;;  %v1666_v19 = vadd.f32 %v1410_v50, %v885_v10  ;;  %v2972_v53 = vsel %vm2707_vm0, %v4139_v20, 0.0  ;;  %v1287_v56 = vsel %vm1022_vm11, %v4125_v8, 0.0 }
 0x1c3   : > { %v1543_v63 = vadd.f32 %v1287_v56, %v762_v58  ;;  %v2068_v22 = vsel %vm1803_vm12, %v4133_v13, 0.0  ;;  %vm2584_vm1 = vcmp.eq.s32.totalorder %v4176_v40, %v5644_v45  ;;  %vm621_vm2 = vcmp.eq.s32.totalorder %v4152_v27, %v5661_v59 }
 0x1c4   : > { %3429 = vmatpush.xpose.msrb.mxu2 %v3104_v6  ;;  %v2447_v42 = vadd.f32 %v2191_v17, %v1666_v19  ;;  %v2849_v54 = vsel %vm2584_vm1, %v4141_v21, 0.0  ;;  %v886_v47 = vsel %vm621_vm2, %v4117_v2, 0.0  ;;  %vm1146_vm9 = vcmp.eq.s32.totalorder %v4160_v31, %v5661_v59 }
 0x1c5   : > { %v2324_v41 = vadd.f32 %v2068_v22, %v1543_v63  ;;  %v1411_v48 = vsel %vm1146_vm9, %v4125_v8, 0.0  ;;  %vm1927_vm3 = vcmp.eq.s32.totalorder %v4168_v35, %v5661_v59  ;;  %vm2708_vm4 = vcmp.eq.s32.totalorder %v4176_v40, %v5661_v59 }
 0x1c6   : > { %v3228_v7 = vadd.f32 %v2972_v53, %v2447_v42  ;;  %v1667_v46 = vadd.f32 %v1411_v48, %v886_v47  ;;  %v2192_v51 = vsel %vm1927_vm3, %v4133_v13, 0.0  ;;  %v2973_v49 = vsel %vm2708_vm4, %v4141_v21, 0.0 }
 0x1c7   : > { %v3105_v57 = vadd.f32 %v2849_v54, %v2324_v41  ;;  %3430 = vmatmul.f32.vlgmr.msrb.gmra.mxu2 %v5570_v60  ;;  %vm494_vm6 = vcmp.eq.s32.totalorder %v4146_v23, %v5644_v45  ;;  %vm1019_vm7 = vcmp.eq.s32.totalorder %v4154_v28, %v5644_v45  ;;  %vm1800_vm8 = vcmp.eq.s32.totalorder %v4162_v32, %v5644_v45 }
 0x1c8   : > { %3494 = vmatpush.xpose.msra.mxu2 %v3228_v7  ;;  %v2448_v52 = vadd.f32 %v2192_v51, %v1667_v46  ;;  %v759_v55 = vsel %vm494_vm6, %v4111_v61, 0.0  ;;  %v1284_v43 = vsel %vm1019_vm7, %v4119_v3, 0.0  ;;  %v2065_v58 = vsel %vm1800_vm8, %v4127_v9, 0.0 }
 0x1c9   : > { %3449 = vmatpush.xpose.msrb.mxu3 %v3105_v57  ;;  %v1540_v15 = vadd.f32 %v1284_v43, %v759_v55  ;;  %vm2581_vm5 = vcmp.eq.s32.totalorder %v4170_v36, %v5644_v45  ;;  %vm495_vm10 = vcmp.eq.s32.totalorder %v4148_v24, %v5644_v45  ;;  %vm1020_vm11 = vcmp.eq.s32.totalorder %v4156_v29, %v5644_v45 }
 0x1ca   : > { %v3229_v10 = vadd.f32 %v2973_v49, %v2448_v52  ;;  %v2846_v50 = vsel %vm2581_vm5, %v4135_v14, 0.0  ;;  %v760_v17 = vsel %vm495_vm10, %v4113_v0, 0.0  ;;  %v1285_v6 = vsel %vm1020_vm11, %v4121_v4, 0.0 }
 0x1cb   : > { %v2321_v19 = vadd.f32 %v2065_v58, %v1540_v15  ;;  %v1541_v53 = vadd.f32 %v1285_v6, %v760_v17  ;;  %vm1801_vm12 = vcmp.eq.s32.totalorder %v4164_v33, %v5644_v45  ;;  %vm2582_vm13 = vcmp.eq.s32.totalorder %v4172_v37, %v5644_v45 }
 0x1cc   : > { %v2066_v56 = vsel %vm1801_vm12, %v4129_v11, 0.0  ;;  %v2847_v63 = vsel %vm2582_vm13, %v4137_v18, 0.0  ;;  %vm618_vm14 = vcmp.eq.s32.totalorder %v4146_v23, %v5661_v59  ;;  %vm1143_vm15 = vcmp.eq.s32.totalorder %v4154_v28, %v5661_v59  ;;  %3450 = vmatmul.f32.vlgmr.msrb.gmra.mxu3 %v5593_v62 }
 0x1cd   : > { %3514 = vmatpush.xpose.msra.mxu3 %v3229_v10  ;;  %v3102_v22 = vadd.f32 %v2846_v50, %v2321_v19  ;;  %v2322_v42 = vadd.f32 %v2066_v56, %v1541_v53  ;;  %v883_v54 = vsel %vm618_vm14, %v4111_v61, 0.0  ;;  %v1408_v47 = vsel %vm1143_vm15, %v4119_v3, 0.0 }
 0x1ce   : > { %v1664_v45 = vadd.f32 %v1408_v47, %v883_v54  ;;  %vm1924_vm0 = vcmp.eq.s32.totalorder %v4162_v32, %v5661_v59  ;;  %vm2705_vm1 = vcmp.eq.s32.totalorder %v4170_v36, %v5661_v59  ;;  %vm619_vm2 = vcmp.eq.s32.totalorder %v4148_v24, %v5661_v59 }
 0x1cf   : > { %3389 = vmatpush.xpose.msrb.mxu0 %v3102_v22  ;;  %v3103_v41 = vadd.f32 %v2847_v63, %v2322_v42  ;;  %v2189_v48 = vsel %vm1924_vm0, %v4127_v9, 0.0  ;;  %v2970_v7 = vsel %vm2705_vm1, %v4135_v14, 0.0  ;;  %v884_v46 = vsel %vm619_vm2, %v4113_v0, 0.0 }
 0x1d0   : > { %v2445_v51 = vadd.f32 %v2189_v48, %v1664_v45  ;;  %vm1144_vm9 = vcmp.eq.s32.totalorder %v4156_v29, %v5661_v59  ;;  %vm1925_vm3 = vcmp.eq.s32.totalorder %v4164_v33, %v5661_v59  ;;  %vm2706_vm4 = vcmp.eq.s32.totalorder %v4172_v37, %v5661_v59 }
 0x1d1   : > { %3409 = vmatpush.xpose.msrb.mxu1 %v3103_v41  ;;  %v1409_v49 = vsel %vm1144_vm9, %v4121_v4, 0.0  ;;  %v2190_v57 = vsel %vm1925_vm3, %v4129_v11, 0.0  ;;  %v342_v52 = vadd.s32 368, %v4094_v26  ;;  %v341_v58 = vadd.s32 360, %v4094_v26 }
 0x1d2   : > { %v3226_v55 = vadd.f32 %v2970_v7, %v2445_v51  ;;  %v1665_v43 = vadd.f32 %v1409_v49, %v884_v46  ;;  %3390 = vmatmul.f32.vlgmr.msrb.gmra.mxu0 %v5616_v16  ;;  %v340_v15 = vadd.s32 352, %v4094_v26  ;;  %v2971_v10 = vsel %vm2706_vm4, %v4137_v18, 0.0 }
 0x1d3   : > { %v408_v50 = vadd.s32 %v4099_v39, %v342_v52  ;;  %v5756_v17 = vadd.s32 %v4099_v39, %v341_v58  ;;  %v5762_v19 = vadd.s32 344, %v4094_v26 }
 0x1d4   : > { %3454 = vmatpush.xpose.msra.mxu0 %v3226_v55  ;;  %v2446_v59 = vadd.f32 %v2190_v57, %v1665_v43  ;;  %3410 = vmatmul.f32.vlgmr.msrb.gmra.mxu1 %v5622_v44  ;;  %v5759_v6 = vadd.s32 %v4099_v39, %v340_v15 }
 0x1d5   : > { %vm616_vm6 = vcmp.eq.s32.totalorder %v4150_v25, %v408_v50  ;;  %vm1141_vm7 = vcmp.eq.s32.totalorder %v4158_v30, %v408_v50  ;;  %vm1922_vm8 = vcmp.eq.s32.totalorder %v4166_v34, %v408_v50  ;;  %vm2703_vm5 = vcmp.eq.s32.totalorder %v4174_v38, %v408_v50 }
 0x1d6   : > { %v3227_v53 = vadd.f32 %v2971_v10, %v2446_v59  ;;  %v881_v56 = vsel %vm616_vm6, %v4115_v1, 0.0  ;;  %v1406_v63 = vsel %vm1141_vm7, %v4123_v5, 0.0  ;;  %v2187_v22 = vsel %vm1922_vm8, %v4131_v12, 0.0 }
 0x1d7   : > { %v1662_v42 = vadd.f32 %v1406_v63, %v881_v56  ;;  %v2968_v54 = vsel %vm2703_vm5, %v4139_v20, 0.0  ;;  %vm617_vm10 = vcmp.eq.s32.totalorder %v4152_v27, %v408_v50  ;;  %vm1142_vm11 = vcmp.eq.s32.totalorder %v4160_v31, %v408_v50 }
 0x1d8   : > { %3474 = vmatpush.xpose.msra.mxu1 %v3227_v53  ;;  %v882_v47 = vsel %vm617_vm10, %v4117_v2, 0.0  ;;  %v1407_v45 = vsel %vm1142_vm11, %v4125_v8, 0.0  ;;  %vm1923_vm12 = vcmp.eq.s32.totalorder %v4168_v35, %v408_v50  ;;  %vm2704_vm13 = vcmp.eq.s32.totalorder %v4176_v40, %v408_v50 }
 0x1d9   : > { %v2443_v41 = vadd.f32 %v2187_v22, %v1662_v42  ;;  %v1663_v48 = vadd.f32 %v1407_v45, %v882_v47  ;;  %v2188_v7 = vsel %vm1923_vm12, %v4133_v13, 0.0  ;;  %v2969_v46 = vsel %vm2704_vm13, %v4141_v21, 0.0 }
 0x1da   : > { %vm614_vm14 = vcmp.eq.s32.totalorder %v4146_v23, %v408_v50  ;;  %vm1139_vm15 = vcmp.eq.s32.totalorder %v4154_v28, %v408_v50  ;;  %vm1920_vm0 = vcmp.eq.s32.totalorder %v4162_v32, %v408_v50  ;;  %vm2701_vm1 = vcmp.eq.s32.totalorder %v4170_v36, %v408_v50 }
 0x1db   : > { %v3224_v51 = vadd.f32 %v2968_v54, %v2443_v41  ;;  %v2444_v49 = vadd.f32 %v2188_v7, %v1663_v48  ;;  %v879_v57 = vsel %vm614_vm14, %v4111_v61, 0.0  ;;  %v1404_v52 = vsel %vm1139_vm15, %v4119_v3, 0.0 }
 0x1dc   : > { %v1660_v55 = vadd.f32 %v1404_v52, %v879_v57  ;;  %v2185_v43 = vsel %vm1920_vm0, %v4127_v9, 0.0  ;;  %v2966_v58 = vsel %vm2701_vm1, %v4135_v14, 0.0  ;;  %vm615_vm2 = vcmp.eq.s32.totalorder %v4148_v24, %v408_v50 }
 0x1dd   : > { %3495 = vmatpush.xpose.msra.mxu2 %v3224_v51  ;;  %v3225_v15 = vadd.f32 %v2969_v46, %v2444_v49  ;;  %v880_v10 = vsel %vm615_vm2, %v4113_v0, 0.0  ;;  %vm1140_vm9 = vcmp.eq.s32.totalorder %v4156_v29, %v408_v50  ;;  %vm1921_vm3 = vcmp.eq.s32.totalorder %v4164_v33, %v408_v50 }
 0x1de   : > { %v2441_v59 = vadd.f32 %v2185_v43, %v1660_v55  ;;  %v1405_v53 = vsel %vm1140_vm9, %v4121_v4, 0.0  ;;  %v2186_v56 = vsel %vm1921_vm3, %v4129_v11, 0.0  ;;  %vm2702_vm4 = vcmp.eq.s32.totalorder %v4172_v37, %v408_v50 }
 0x1df   : > { %3515 = vmatpush.xpose.msra.mxu3 %v3225_v15  ;;  %v1661_v63 = vadd.f32 %v1405_v53, %v880_v10  ;;  %v2967_v22 = vsel %vm2702_vm4, %v4137_v18, 0.0  ;;  %vm612_vm6 = vcmp.eq.s32.totalorder %v4150_v25, %v5756_v17  ;;  %vm1137_vm7 = vcmp.eq.s32.totalorder %v4158_v30, %v5756_v17 }
 0x1e0   : > { %v3222_v42 = vadd.f32 %v2966_v58, %v2441_v59  ;;  %v877_v54 = vsel %vm612_vm6, %v4115_v1, 0.0  ;;  %v1402_v47 = vsel %vm1137_vm7, %v4123_v5, 0.0  ;;  %vm1918_vm8 = vcmp.eq.s32.totalorder %v4166_v34, %v5756_v17 }
 0x1e1   : > { %v2442_v45 = vadd.f32 %v2186_v56, %v1661_v63  ;;  %v1658_v50 = vadd.f32 %v1402_v47, %v877_v54  ;;  %v2183_v41 = vsel %vm1918_vm8, %v4131_v12, 0.0  ;;  %vm2699_vm5 = vcmp.eq.s32.totalorder %v4174_v38, %v5756_v17 }
 0x1e2   : > { %3455 = vmatpush.xpose.msra.mxu0 %v3222_v42  ;;  %v2964_v48 = vsel %vm2699_vm5, %v4139_v20, 0.0  ;;  %vm613_vm10 = vcmp.eq.s32.totalorder %v4152_v27, %v5756_v17  ;;  %vm1138_vm11 = vcmp.eq.s32.totalorder %v4160_v31, %v5756_v17  ;;  %vm1919_vm12 = vcmp.eq.s32.totalorder %v4168_v35, %v5756_v17 }
 0x1e3   : > { %v3223_v7 = vadd.f32 %v2967_v22, %v2442_v45  ;;  %v2439_v46 = vadd.f32 %v2183_v41, %v1658_v50  ;;  %v878_v51 = vsel %vm613_vm10, %v4117_v2, 0.0  ;;  %v1403_v49 = vsel %vm1138_vm11, %v4125_v8, 0.0 }
 0x1e4   : > { %v1659_v57 = vadd.f32 %v1403_v49, %v878_v51  ;;  %v2184_v52 = vsel %vm1919_vm12, %v4133_v13, 0.0  ;;  %vm2700_vm13 = vcmp.eq.s32.totalorder %v4176_v40, %v5756_v17  ;;  %vm610_vm14 = vcmp.eq.s32.totalorder %v4146_v23, %v5756_v17 }
 0x1e5   : > { %3475 = vmatpush.xpose.msra.mxu1 %v3223_v7  ;;  %v3220_v55 = vadd.f32 %v2964_v48, %v2439_v46  ;;  %v2965_v43 = vsel %vm2700_vm13, %v4141_v21, 0.0  ;;  %v875_v58 = vsel %vm610_vm14, %v4111_v61, 0.0  ;;  %vm1135_vm15 = vcmp.eq.s32.totalorder %v4154_v28, %v5756_v17 }
 0x1e6   : > { %v2440_v15 = vadd.f32 %v2184_v52, %v1659_v57  ;;  %v1400_v10 = vsel %vm1135_vm15, %v4119_v3, 0.0  ;;  %vm1916_vm0 = vcmp.eq.s32.totalorder %v4162_v32, %v5756_v17  ;;  %vm2697_vm1 = vcmp.eq.s32.totalorder %v4170_v36, %v5756_v17 }
 0x1e7   : > { %3496 = vmatpush.xpose.msra.mxu2 %v3220_v55  ;;  %v1656_v59 = vadd.f32 %v1400_v10, %v875_v58  ;;  %v2181_v53 = vsel %vm1916_vm0, %v4127_v9, 0.0  ;;  %v2962_v56 = vsel %vm2697_vm1, %v4135_v14, 0.0  ;;  %vm611_vm2 = vcmp.eq.s32.totalorder %v4148_v24, %v5756_v17 }
 0x1e8   : > { %v3221_v63 = vadd.f32 %v2965_v43, %v2440_v15  ;;  %v876_v22 = vsel %vm611_vm2, %v4113_v0, 0.0  ;;  %vm1136_vm9 = vcmp.eq.s32.totalorder %v4156_v29, %v5756_v17  ;;  %vm1917_vm3 = vcmp.eq.s32.totalorder %v4164_v33, %v5756_v17 }
 0x1e9   : > { %v2437_v42 = vadd.f32 %v2181_v53, %v1656_v59  ;;  %v1401_v54 = vsel %vm1136_vm9, %v4121_v4, 0.0  ;;  %v2182_v47 = vsel %vm1917_vm3, %v4129_v11, 0.0  ;;  %vm2698_vm4 = vcmp.eq.s32.totalorder %v4172_v37, %v5756_v17 }
 0x1ea   : > { %3516 = vmatpush.xpose.msra.mxu3 %v3221_v63  ;;  %v1657_v45 = vadd.f32 %v1401_v54, %v876_v22  ;;  %v2963_v50 = vsel %vm2698_vm4, %v4137_v18, 0.0  ;;  %vm608_vm6 = vcmp.eq.s32.totalorder %v4150_v25, %v5759_v6  ;;  %vm1133_vm7 = vcmp.eq.s32.totalorder %v4158_v30, %v5759_v6 }
 0x1eb   : > { %v3218_v41 = vadd.f32 %v2962_v56, %v2437_v42  ;;  %v873_v48 = vsel %vm608_vm6, %v4115_v1, 0.0  ;;  %v1398_v7 = vsel %vm1133_vm7, %v4123_v5, 0.0  ;;  %vm1914_vm8 = vcmp.eq.s32.totalorder %v4166_v34, %v5759_v6 }
 0x1ec   : > { %v2438_v46 = vadd.f32 %v2182_v47, %v1657_v45  ;;  %v1654_v17 = vadd.f32 %v1398_v7, %v873_v48  ;;  %v2179_v51 = vsel %vm1914_vm8, %v4131_v12, 0.0  ;;  %vm2695_vm5 = vcmp.eq.s32.totalorder %v4174_v38, %v5759_v6 }
 0x1ed   : > { %3456 = vmatpush.xpose.msra.mxu0 %v3218_v41  ;;  %v2960_v49 = vsel %vm2695_vm5, %v4139_v20, 0.0  ;;  %vm609_vm10 = vcmp.eq.s32.totalorder %v4152_v27, %v5759_v6  ;;  %vm1134_vm11 = vcmp.eq.s32.totalorder %v4160_v31, %v5759_v6  ;;  %vm1915_vm12 = vcmp.eq.s32.totalorder %v4168_v35, %v5759_v6 }
 0x1ee   : > { %v3219_v57 = vadd.f32 %v2963_v50, %v2438_v46  ;;  %v2435_v52 = vadd.f32 %v2179_v51, %v1654_v17  ;;  %v874_v55 = vsel %vm609_vm10, %v4117_v2, 0.0  ;;  %v1399_v43 = vsel %vm1134_vm11, %v4125_v8, 0.0 }
 0x1ef   : > { %v1655_v58 = vadd.f32 %v1399_v43, %v874_v55  ;;  %v2180_v15 = vsel %vm1915_vm12, %v4133_v13, 0.0  ;;  %vm2696_vm13 = vcmp.eq.s32.totalorder %v4176_v40, %v5759_v6  ;;  %vm606_vm14 = vcmp.eq.s32.totalorder %v4146_v23, %v5759_v6 }
 0x1f0   : > { %3476 = vmatpush.xpose.msra.mxu1 %v3219_v57  ;;  %v3216_v10 = vadd.f32 %v2960_v49, %v2435_v52  ;;  %v2961_v59 = vsel %vm2696_vm13, %v4141_v21, 0.0  ;;  %v871_v53 = vsel %vm606_vm14, %v4111_v61, 0.0  ;;  %vm1131_vm15 = vcmp.eq.s32.totalorder %v4154_v28, %v5759_v6 }
 0x1f1   : > { %v2436_v56 = vadd.f32 %v2180_v15, %v1655_v58  ;;  %v1396_v63 = vsel %vm1131_vm15, %v4119_v3, 0.0  ;;  %vm1912_vm0 = vcmp.eq.s32.totalorder %v4162_v32, %v5759_v6  ;;  %vm2693_vm1 = vcmp.eq.s32.totalorder %v4170_v36, %v5759_v6 }
 0x1f2   : > { %3497 = vmatpush.xpose.msra.mxu2 %v3216_v10  ;;  %v1652_v22 = vadd.f32 %v1396_v63, %v871_v53  ;;  %v2177_v42 = vsel %vm1912_vm0, %v4127_v9, 0.0  ;;  %v2958_v54 = vsel %vm2693_vm1, %v4135_v14, 0.0  ;;  %vm607_vm2 = vcmp.eq.s32.totalorder %v4148_v24, %v5759_v6 }
 0x1f3   : > { %v3217_v47 = vadd.f32 %v2961_v59, %v2436_v56  ;;  %v872_v45 = vsel %vm607_vm2, %v4113_v0, 0.0  ;;  %vm1132_vm9 = vcmp.eq.s32.totalorder %v4156_v29, %v5759_v6  ;;  %vm1913_vm3 = vcmp.eq.s32.totalorder %v4164_v33, %v5759_v6 }
 0x1f4   : > { %v2433_v50 = vadd.f32 %v2177_v42, %v1652_v22  ;;  %v1397_v41 = vsel %vm1132_vm9, %v4121_v4, 0.0  ;;  %v2178_v48 = vsel %vm1913_vm3, %v4129_v11, 0.0  ;;  %vm2694_vm4 = vcmp.eq.s32.totalorder %v4172_v37, %v5759_v6 }
 0x1f5   : > { %3517 = vmatpush.xpose.msra.mxu3 %v3217_v47  ;;  %v1653_v7 = vadd.f32 %v1397_v41, %v872_v45  ;;  %v2959_v46 = vsel %vm2694_vm4, %v4137_v18, 0.0  ;;  %v405_v17 = vadd.s32 %v4099_v39, %v5762_v19  ;;  %v338_v49 = vadd.s32 336, %v4094_v26 }
 0x1f6   : > { %v3214_v51 = vadd.f32 %v2958_v54, %v2433_v50  ;;  %v337_v57 = vadd.s32 328, %v4094_v26  ;;  %v336_v52 = vadd.s32 320, %v4094_v26 }
 0x1f7   : > { %v2434_v55 = vadd.f32 %v2178_v48, %v1653_v7  ;;  %vm604_vm6 = vcmp.eq.s32.totalorder %v4150_v25, %v405_v17  ;;  %vm1129_vm7 = vcmp.eq.s32.totalorder %v4158_v30, %v405_v17  ;;  %vm1910_vm8 = vcmp.eq.s32.totalorder %v4166_v34, %v405_v17 }
 0x1f8   : > { %3457 = vmatpush.xpose.msra.mxu0 %v3214_v51  ;;  %v869_v6 = vsel %vm604_vm6, %v4115_v1, 0.0  ;;  %v1394_v43 = vsel %vm1129_vm7, %v4123_v5, 0.0  ;;  %v2175_v19 = vsel %vm1910_vm8, %v4131_v12, 0.0  ;;  %vm2691_vm5 = vcmp.eq.s32.totalorder %v4174_v38, %v405_v17 }
 0x1f9   : > { %v3215_v58 = vadd.f32 %v2959_v46, %v2434_v55  ;;  %v1650_v15 = vadd.f32 %v1394_v43, %v869_v6  ;;  %v2956_v10 = vsel %vm2691_vm5, %v4139_v20, 0.0  ;;  %vm605_vm10 = vcmp.eq.s32.totalorder %v4152_v27, %v405_v17 }
 0x1fa   : > { %v870_v59 = vsel %vm605_vm10, %v4117_v2, 0.0  ;;  %vm1130_vm11 = vcmp.eq.s32.totalorder %v4160_v31, %v405_v17  ;;  %vm1911_vm12 = vcmp.eq.s32.totalorder %v4168_v35, %v405_v17  ;;  %vm2692_vm13 = vcmp.eq.s32.totalorder %v4176_v40, %v405_v17 }
 0x1fb   : > { %3477 = vmatpush.xpose.msra.mxu1 %v3215_v58  ;;  %v2431_v53 = vadd.f32 %v2175_v19, %v1650_v15  ;;  %v1395_v56 = vsel %vm1130_vm11, %v4125_v8, 0.0  ;;  %v2176_v63 = vsel %vm1911_vm12, %v4133_v13, 0.0  ;;  %v2957_v22 = vsel %vm2692_vm13, %v4141_v21, 0.0 }
 0x1fc   : > { %v1651_v42 = vadd.f32 %v1395_v56, %v870_v59  ;;  %vm602_vm14 = vcmp.eq.s32.totalorder %v4146_v23, %v405_v17  ;;  %vm1127_vm15 = vcmp.eq.s32.totalorder %v4154_v28, %v405_v17  ;;  %vm1908_vm0 = vcmp.eq.s32.totalorder %v4162_v32, %v405_v17 }
 0x1fd   : > { %v3212_v54 = vadd.f32 %v2956_v10, %v2431_v53  ;;  %v867_v47 = vsel %vm602_vm14, %v4111_v61, 0.0  ;;  %v1392_v45 = vsel %vm1127_vm15, %v4119_v3, 0.0  ;;  %v2173_v50 = vsel %vm1908_vm0, %v4127_v9, 0.0 }
 0x1fe   : > { %v2432_v41 = vadd.f32 %v2176_v63, %v1651_v42  ;;  %v1648_v48 = vadd.f32 %v1392_v45, %v867_v47  ;;  %vm2689_vm1 = vcmp.eq.s32.totalorder %v4170_v36, %v405_v17  ;;  %vm603_vm2 = vcmp.eq.s32.totalorder %v4148_v24, %v405_v17 }
 0x1ff   : > { %3498 = vmatpush.xpose.msra.mxu2 %v3212_v54  ;;  %v2954_v7 = vsel %vm2689_vm1, %v4135_v14, 0.0  ;;  %v868_v46 = vsel %vm603_vm2, %v4113_v0, 0.0  ;;  %vm1128_vm9 = vcmp.eq.s32.totalorder %v4156_v29, %v405_v17  ;;  %vm1909_vm3 = vcmp.eq.s32.totalorder %v4164_v33, %v405_v17 }
 0x200   : > { %v3213_v51 = vadd.f32 %v2957_v22, %v2432_v41  ;;  %v2429_v55 = vadd.f32 %v2173_v50, %v1648_v48  ;;  %v1393_v6 = vsel %vm1128_vm9, %v4121_v4, 0.0  ;;  %v2174_v43 = vsel %vm1909_vm3, %v4129_v11, 0.0 }
 0x201   : > { %v1649_v19 = vadd.f32 %v1393_v6, %v868_v46  ;;  %vm2690_vm4 = vcmp.eq.s32.totalorder %v4172_v37, %v405_v17  ;;  %v404_v58 = vadd.s32 %v4099_v39, %v338_v49  ;;  %v5930_v15 = vadd.s32 %v4099_v39, %v337_v57 }
 0x202   : > { %3518 = vmatpush.xpose.msra.mxu3 %v3213_v51  ;;  %v3210_v10 = vadd.f32 %v2954_v7, %v2429_v55  ;;  %v2955_v59 = vsel %vm2690_vm4, %v4137_v18, 0.0  ;;  %v5934_v53 = vadd.s32 %v4099_v39, %v336_v52  ;;  %v5937_v56 = vadd.s32 312, %v4094_v26 }
 0x203   : > { %v2430_v63 = vadd.f32 %v2174_v43, %v1649_v19  ;;  %vm600_vm6 = vcmp.eq.s32.totalorder %v4150_v25, %v404_v58  ;;  %vm1125_vm7 = vcmp.eq.s32.totalorder %v4158_v30, %v404_v58  ;;  %vm1906_vm8 = vcmp.eq.s32.totalorder %v4166_v34, %v404_v58 }
 0x204   : > { %3458 = vmatpush.xpose.msra.mxu0 %v3210_v10  ;;  %v865_v17 = vsel %vm600_vm6, %v4115_v1, 0.0  ;;  %v1390_v49 = vsel %vm1125_vm7, %v4123_v5, 0.0  ;;  %v2171_v57 = vsel %vm1906_vm8, %v4131_v12, 0.0  ;;  %vm2687_vm5 = vcmp.eq.s32.totalorder %v4174_v38, %v404_v58 }
 0x205   : > { %v3211_v52 = vadd.f32 %v2955_v59, %v2430_v63  ;;  %v1646_v22 = vadd.f32 %v1390_v49, %v865_v17  ;;  %v2952_v42 = vsel %vm2687_vm5, %v4139_v20, 0.0  ;;  %vm601_vm10 = vcmp.eq.s32.totalorder %v4152_v27, %v404_v58 }
 0x206   : > { %v866_v54 = vsel %vm601_vm10, %v4117_v2, 0.0  ;;  %vm1126_vm11 = vcmp.eq.s32.totalorder %v4160_v31, %v404_v58  ;;  %vm1907_vm12 = vcmp.eq.s32.totalorder %v4168_v35, %v404_v58  ;;  %vm2688_vm13 = vcmp.eq.s32.totalorder %v4176_v40, %v404_v58 }
 0x207   : > { %3478 = vmatpush.xpose.msra.mxu1 %v3211_v52  ;;  %v2427_v47 = vadd.f32 %v2171_v57, %v1646_v22  ;;  %v1391_v45 = vsel %vm1126_vm11, %v4125_v8, 0.0  ;;  %v2172_v50 = vsel %vm1907_vm12, %v4133_v13, 0.0  ;;  %v2953_v41 = vsel %vm2688_vm13, %v4141_v21, 0.0 }
 0x208   : > { %v1647_v48 = vadd.f32 %v1391_v45, %v866_v54  ;;  %vm598_vm14 = vcmp.eq.s32.totalorder %v4146_v23, %v404_v58  ;;  %vm1123_vm15 = vcmp.eq.s32.totalorder %v4154_v28, %v404_v58  ;;  %vm1904_vm0 = vcmp.eq.s32.totalorder %v4162_v32, %v404_v58 }
 0x209   : > { %v3208_v7 = vadd.f32 %v2952_v42, %v2427_v47  ;;  %v863_v46 = vsel %vm598_vm14, %v4111_v61, 0.0  ;;  %v1388_v51 = vsel %vm1123_vm15, %v4119_v3, 0.0  ;;  %v2169_v55 = vsel %vm1904_vm0, %v4127_v9, 0.0 }
 0x20a   : > { %v2428_v6 = vadd.f32 %v2172_v50, %v1647_v48  ;;  %v1644_v43 = vadd.f32 %v1388_v51, %v863_v46  ;;  %vm2685_vm1 = vcmp.eq.s32.totalorder %v4170_v36, %v404_v58  ;;  %vm599_vm2 = vcmp.eq.s32.totalorder %v4148_v24, %v404_v58 }
 0x20b   : > { %3499 = vmatpush.xpose.msra.mxu2 %v3208_v7  ;;  %v2950_v19 = vsel %vm2685_vm1, %v4135_v14, 0.0  ;;  %v864_v10 = vsel %vm599_vm2, %v4113_v0, 0.0  ;;  %vm1124_vm9 = vcmp.eq.s32.totalorder %v4156_v29, %v404_v58  ;;  %vm1905_vm3 = vcmp.eq.s32.totalorder %v4164_v33, %v404_v58 }
 0x20c   : > { %v3209_v59 = vadd.f32 %v2953_v41, %v2428_v6  ;;  %v2425_v63 = vadd.f32 %v2169_v55, %v1644_v43  ;;  %v1389_v17 = vsel %vm1124_vm9, %v4121_v4, 0.0  ;;  %v2170_v49 = vsel %vm1905_vm3, %v4129_v11, 0.0 }
 0x20d   : > { %v1645_v57 = vadd.f32 %v1389_v17, %v864_v10  ;;  %vm2686_vm4 = vcmp.eq.s32.totalorder %v4172_v37, %v404_v58  ;;  %vm596_vm6 = vcmp.eq.s32.totalorder %v4150_v25, %v5930_v15  ;;  %vm1121_vm7 = vcmp.eq.s32.totalorder %v4158_v30, %v5930_v15 }
 0x20e   : > { %3519 = vmatpush.xpose.msra.mxu3 %v3209_v59  ;;  %v3206_v52 = vadd.f32 %v2950_v19, %v2425_v63  ;;  %v2951_v22 = vsel %vm2686_vm4, %v4137_v18, 0.0  ;;  %v861_v42 = vsel %vm596_vm6, %v4115_v1, 0.0  ;;  %v1386_v54 = vsel %vm1121_vm7, %v4123_v5, 0.0 }
 0x20f   : > { %v2426_v47 = vadd.f32 %v2170_v49, %v1645_v57  ;;  %v1642_v45 = vadd.f32 %v1386_v54, %v861_v42  ;;  %vm1902_vm8 = vcmp.eq.s32.totalorder %v4166_v34, %v5930_v15  ;;  %vm2683_vm5 = vcmp.eq.s32.totalorder %v4174_v38, %v5930_v15 }
 0x210   : > { %3459 = vmatpush.xpose.msra.mxu0 %v3206_v52  ;;  %v2167_v58 = vsel %vm1902_vm8, %v4131_v12, 0.0  ;;  %v2948_v50 = vsel %vm2683_vm5, %v4139_v20, 0.0  ;;  %vm597_vm10 = vcmp.eq.s32.totalorder %v4152_v27, %v5930_v15  ;;  %vm1122_vm11 = vcmp.eq.s32.totalorder %v4160_v31, %v5930_v15 }
 0x211   : > { %v3207_v41 = vadd.f32 %v2951_v22, %v2426_v47  ;;  %v2423_v48 = vadd.f32 %v2167_v58, %v1642_v45  ;;  %v862_v7 = vsel %vm597_vm10, %v4117_v2, 0.0  ;;  %v1387_v46 = vsel %vm1122_vm11, %v4125_v8, 0.0 }
 0x212   : > { %v1643_v51 = vadd.f32 %v1387_v46, %v862_v7  ;;  %vm1903_vm12 = vcmp.eq.s32.totalorder %v4168_v35, %v5930_v15  ;;  %vm2684_vm13 = vcmp.eq.s32.totalorder %v4176_v40, %v5930_v15  ;;  %vm594_vm14 = vcmp.eq.s32.totalorder %v4146_v23, %v5930_v15 }
 0x213   : > { %3479 = vmatpush.xpose.msra.mxu1 %v3207_v41  ;;  %v3204_v55 = vadd.f32 %v2948_v50, %v2423_v48  ;;  %v2168_v6 = vsel %vm1903_vm12, %v4133_v13, 0.0  ;;  %v2949_v43 = vsel %vm2684_vm13, %v4141_v21, 0.0  ;;  %v859_v19 = vsel %vm594_vm14, %v4111_v61, 0.0 }
 0x214   : > { %v2424_v10 = vadd.f32 %v2168_v6, %v1643_v51  ;;  %vm1119_vm15 = vcmp.eq.s32.totalorder %v4154_v28, %v5930_v15  ;;  %vm1900_vm0 = vcmp.eq.s32.totalorder %v4162_v32, %v5930_v15  ;;  %vm2681_vm1 = vcmp.eq.s32.totalorder %v4170_v36, %v5930_v15 }
 0x215   : > { %3500 = vmatpush.xpose.msra.mxu2 %v3204_v55  ;;  %v1384_v59 = vsel %vm1119_vm15, %v4119_v3, 0.0  ;;  %v2165_v63 = vsel %vm1900_vm0, %v4127_v9, 0.0  ;;  %v2946_v17 = vsel %vm2681_vm1, %v4135_v14, 0.0  ;;  %vm595_vm2 = vcmp.eq.s32.totalorder %v4148_v24, %v5930_v15 }
 0x216   : > { %v3205_v49 = vadd.f32 %v2949_v43, %v2424_v10  ;;  %v1640_v57 = vadd.f32 %v1384_v59, %v859_v19  ;;  %v860_v52 = vsel %vm595_vm2, %v4113_v0, 0.0  ;;  %vm1120_vm9 = vcmp.eq.s32.totalorder %v4156_v29, %v5930_v15 }
 0x217   : > { %v1385_v22 = vsel %vm1120_vm9, %v4121_v4, 0.0  ;;  %vm1901_vm3 = vcmp.eq.s32.totalorder %v4164_v33, %v5930_v15  ;;  %vm2682_vm4 = vcmp.eq.s32.totalorder %v4172_v37, %v5930_v15  ;;  %vm592_vm6 = vcmp.eq.s32.totalorder %v4150_v25, %v5934_v53 }
 0x218   : > { %3520 = vmatpush.xpose.msra.mxu3 %v3205_v49  ;;  %v2421_v42 = vadd.f32 %v2165_v63, %v1640_v57  ;;  %v1641_v54 = vadd.f32 %v1385_v22, %v860_v52  ;;  %v2166_v47 = vsel %vm1901_vm3, %v4129_v11, 0.0  ;;  %v2947_v45 = vsel %vm2682_vm4, %v4137_v18, 0.0 }
 0x219   : > { %v857_v58 = vsel %vm592_vm6, %v4115_v1, 0.0  ;;  %vm1117_vm7 = vcmp.eq.s32.totalorder %v4158_v30, %v5934_v53  ;;  %vm1898_vm8 = vcmp.eq.s32.totalorder %v4166_v34, %v5934_v53  ;;  %vm2679_vm5 = vcmp.eq.s32.totalorder %v4174_v38, %v5934_v53 }
 0x21a   : > { %v3202_v15 = vadd.f32 %v2946_v17, %v2421_v42  ;;  %v2422_v50 = vadd.f32 %v2166_v47, %v1641_v54  ;;  %v1382_v41 = vsel %vm1117_vm7, %v4123_v5, 0.0  ;;  %v2163_v48 = vsel %vm1898_vm8, %v4131_v12, 0.0 }
 0x21b   : > { %v1638_v7 = vadd.f32 %v1382_v41, %v857_v58  ;;  %v2944_v46 = vsel %vm2679_vm5, %v4139_v20, 0.0  ;;  %vm593_vm10 = vcmp.eq.s32.totalorder %v4152_v27, %v5934_v53  ;;  %vm1118_vm11 = vcmp.eq.s32.totalorder %v4160_v31, %v5934_v53 }
 0x21c   : > { %3460 = vmatpush.xpose.msra.mxu0 %v3202_v15  ;;  %v3203_v51 = vadd.f32 %v2947_v45, %v2422_v50  ;;  %v858_v55 = vsel %vm593_vm10, %v4117_v2, 0.0  ;;  %v1383_v6 = vsel %vm1118_vm11, %v4125_v8, 0.0  ;;  %vm1899_vm12 = vcmp.eq.s32.totalorder %v4168_v35, %v5934_v53 }
 0x21d   : > { %v2419_v43 = vadd.f32 %v2163_v48, %v1638_v7  ;;  %v1639_v19 = vadd.f32 %v1383_v6, %v858_v55  ;;  %v2164_v10 = vsel %vm1899_vm12, %v4133_v13, 0.0  ;;  %vm2680_vm13 = vcmp.eq.s32.totalorder %v4176_v40, %v5934_v53 }
 0x21e   : > { %3480 = vmatpush.xpose.msra.mxu1 %v3203_v51  ;;  %v2945_v59 = vsel %vm2680_vm13, %v4141_v21, 0.0  ;;  %vm590_vm14 = vcmp.eq.s32.totalorder %v4146_v23, %v5934_v53  ;;  %vm1115_vm15 = vcmp.eq.s32.totalorder %v4154_v28, %v5934_v53  ;;  %vm1896_vm0 = vcmp.eq.s32.totalorder %v4162_v32, %v5934_v53 }
 0x21f   : > { %v3200_v63 = vadd.f32 %v2944_v46, %v2419_v43  ;;  %v2420_v17 = vadd.f32 %v2164_v10, %v1639_v19  ;;  %v855_v49 = vsel %vm590_vm14, %v4111_v61, 0.0  ;;  %v1380_v57 = vsel %vm1115_vm15, %v4119_v3, 0.0 }
 0x220   : > { %v1636_v52 = vadd.f32 %v1380_v57, %v855_v49  ;;  %v2161_v22 = vsel %vm1896_vm0, %v4127_v9, 0.0  ;;  %vm2677_vm1 = vcmp.eq.s32.totalorder %v4170_v36, %v5934_v53  ;;  %vm591_vm2 = vcmp.eq.s32.totalorder %v4148_v24, %v5934_v53 }
 0x221   : > { %3501 = vmatpush.xpose.msra.mxu2 %v3200_v63  ;;  %v3201_v42 = vadd.f32 %v2945_v59, %v2420_v17  ;;  %v2942_v54 = vsel %vm2677_vm1, %v4135_v14, 0.0  ;;  %v856_v47 = vsel %vm591_vm2, %v4113_v0, 0.0  ;;  %vm1116_vm9 = vcmp.eq.s32.totalorder %v4156_v29, %v5934_v53 }
 0x222   : > { %v2417_v45 = vadd.f32 %v2161_v22, %v1636_v52  ;;  %v1381_v58 = vsel %vm1116_vm9, %v4121_v4, 0.0  ;;  %vm1897_vm3 = vcmp.eq.s32.totalorder %v4164_v33, %v5934_v53  ;;  %vm2678_vm4 = vcmp.eq.s32.totalorder %v4172_v37, %v5934_v53 }
 0x223   : > { %3521 = vmatpush.xpose.msra.mxu3 %v3201_v42  ;;  %v1637_v15 = vadd.f32 %v1381_v58, %v856_v47  ;;  %v2162_v50 = vsel %vm1897_vm3, %v4129_v11, 0.0  ;;  %v2943_v41 = vsel %vm2678_vm4, %v4137_v18, 0.0  ;;  %v401_v48 = vadd.s32 %v4099_v39, %v5937_v56 }
 0x224   : > { %v3198_v7 = vadd.f32 %v2942_v54, %v2417_v45  ;;  %v334_v46 = vadd.s32 304, %v4094_v26  ;;  %v333_v51 = vadd.s32 296, %v4094_v26  ;;  %v332_v55 = vadd.s32 288, %v4094_v26 }
 0x225   : > { %v2418_v6 = vadd.f32 %v2162_v50, %v1637_v15  ;;  %vm588_vm6 = vcmp.eq.s32.totalorder %v4150_v25, %v401_v48  ;;  %vm1113_vm7 = vcmp.eq.s32.totalorder %v4158_v30, %v401_v48  ;;  %vm1894_vm8 = vcmp.eq.s32.totalorder %v4166_v34, %v401_v48 }
 0x226   : > { %3461 = vmatpush.xpose.msra.mxu0 %v3198_v7  ;;  %v853_v53 = vsel %vm588_vm6, %v4115_v1, 0.0  ;;  %v1378_v43 = vsel %vm1113_vm7, %v4123_v5, 0.0  ;;  %v2159_v56 = vsel %vm1894_vm8, %v4131_v12, 0.0  ;;  %vm2675_vm5 = vcmp.eq.s32.totalorder %v4174_v38, %v401_v48 }
 0x227   : > { %v3199_v19 = vadd.f32 %v2943_v41, %v2418_v6  ;;  %v1634_v10 = vadd.f32 %v1378_v43, %v853_v53  ;;  %v2940_v59 = vsel %vm2675_vm5, %v4139_v20, 0.0  ;;  %vm589_vm10 = vcmp.eq.s32.totalorder %v4152_v27, %v401_v48 }
 0x228   : > { %v854_v63 = vsel %vm589_vm10, %v4117_v2, 0.0  ;;  %vm1114_vm11 = vcmp.eq.s32.totalorder %v4160_v31, %v401_v48  ;;  %vm1895_vm12 = vcmp.eq.s32.totalorder %v4168_v35, %v401_v48  ;;  %vm2676_vm13 = vcmp.eq.s32.totalorder %v4176_v40, %v401_v48 }
 0x229   : > { %3481 = vmatpush.xpose.msra.mxu1 %v3199_v19  ;;  %v2415_v17 = vadd.f32 %v2159_v56, %v1634_v10  ;;  %v1379_v49 = vsel %vm1114_vm11, %v4125_v8, 0.0  ;;  %v2160_v57 = vsel %vm1895_vm12, %v4133_v13, 0.0  ;;  %v2941_v52 = vsel %vm2676_vm13, %v4141_v21, 0.0 }
 0x22a   : > { %v1635_v22 = vadd.f32 %v1379_v49, %v854_v63  ;;  %vm586_vm14 = vcmp.eq.s32.totalorder %v4146_v23, %v401_v48  ;;  %vm1111_vm15 = vcmp.eq.s32.totalorder %v4154_v28, %v401_v48  ;;  %vm1892_vm0 = vcmp.eq.s32.totalorder %v4162_v32, %v401_v48 }
 0x22b   : > { %v3196_v42 = vadd.f32 %v2940_v59, %v2415_v17  ;;  %v851_v54 = vsel %vm586_vm14, %v4111_v61, 0.0  ;;  %v1376_v47 = vsel %vm1111_vm15, %v4119_v3, 0.0  ;;  %v2157_v45 = vsel %vm1892_vm0, %v4127_v9, 0.0 }
 0x22c   : > { %v2416_v58 = vadd.f32 %v2160_v57, %v1635_v22  ;;  %v1632_v15 = vadd.f32 %v1376_v47, %v851_v54  ;;  %vm2673_vm1 = vcmp.eq.s32.totalorder %v4170_v36, %v401_v48  ;;  %vm587_vm2 = vcmp.eq.s32.totalorder %v4148_v24, %v401_v48 }
 0x22d   : > { %3502 = vmatpush.xpose.msra.mxu2 %v3196_v42  ;;  %v2938_v50 = vsel %vm2673_vm1, %v4135_v14, 0.0  ;;  %v852_v41 = vsel %vm587_vm2, %v4113_v0, 0.0  ;;  %vm1112_vm9 = vcmp.eq.s32.totalorder %v4156_v29, %v401_v48  ;;  %vm1893_vm3 = vcmp.eq.s32.totalorder %v4164_v33, %v401_v48 }
 0x22e   : > { %v3197_v7 = vadd.f32 %v2941_v52, %v2416_v58  ;;  %v2413_v6 = vadd.f32 %v2157_v45, %v1632_v15  ;;  %v1377_v53 = vsel %vm1112_vm9, %v4121_v4, 0.0  ;;  %v2158_v43 = vsel %vm1893_vm3, %v4129_v11, 0.0 }
 0x22f   : > { %v1633_v56 = vadd.f32 %v1377_v53, %v852_v41  ;;  %vm2674_vm4 = vcmp.eq.s32.totalorder %v4172_v37, %v401_v48  ;;  %v400_v19 = vadd.s32 %v4099_v39, %v334_v46  ;;  %v6105_v10 = vadd.s32 %v4099_v39, %v333_v51 }
 0x230   : > { %3522 = vmatpush.xpose.msra.mxu3 %v3197_v7  ;;  %v3194_v59 = vadd.f32 %v2938_v50, %v2413_v6  ;;  %v2939_v63 = vsel %vm2674_vm4, %v4137_v18, 0.0  ;;  %v6109_v17 = vadd.s32 %v4099_v39, %v332_v55  ;;  %v6112_v49 = vadd.s32 280, %v4094_v26 }
 0x231   : > { %v2414_v57 = vadd.f32 %v2158_v43, %v1633_v56  ;;  %vm584_vm6 = vcmp.eq.s32.totalorder %v4150_v25, %v400_v19  ;;  %vm1109_vm7 = vcmp.eq.s32.totalorder %v4158_v30, %v400_v19  ;;  %vm1890_vm8 = vcmp.eq.s32.totalorder %v4166_v34, %v400_v19 }
 0x232   : > { %3462 = vmatpush.xpose.msra.mxu0 %v3194_v59  ;;  %v849_v48 = vsel %vm584_vm6, %v4115_v1, 0.0  ;;  %v1374_v46 = vsel %vm1109_vm7, %v4123_v5, 0.0  ;;  %v2155_v51 = vsel %vm1890_vm8, %v4131_v12, 0.0  ;;  %vm2671_vm5 = vcmp.eq.s32.totalorder %v4174_v38, %v400_v19 }
 0x233   : > { %v3195_v55 = vadd.f32 %v2939_v63, %v2414_v57  ;;  %v1630_v52 = vadd.f32 %v1374_v46, %v849_v48  ;;  %v2936_v22 = vsel %vm2671_vm5, %v4139_v20, 0.0  ;;  %vm585_vm10 = vcmp.eq.s32.totalorder %v4152_v27, %v400_v19 }
 0x234   : > { %v850_v42 = vsel %vm585_vm10, %v4117_v2, 0.0  ;;  %vm1110_vm11 = vcmp.eq.s32.totalorder %v4160_v31, %v400_v19  ;;  %vm1891_vm12 = vcmp.eq.s32.totalorder %v4168_v35, %v400_v19  ;;  %vm2672_vm13 = vcmp.eq.s32.totalorder %v4176_v40, %v400_v19 }
 0x235   : > { %3482 = vmatpush.xpose.msra.mxu1 %v3195_v55  ;;  %v2411_v54 = vadd.f32 %v2155_v51, %v1630_v52  ;;  %v1375_v47 = vsel %vm1110_vm11, %v4125_v8, 0.0  ;;  %v2156_v45 = vsel %vm1891_vm12, %v4133_v13, 0.0  ;;  %v2937_v58 = vsel %vm2672_vm13, %v4141_v21, 0.0 }
 0x236   : > { %v1631_v15 = vadd.f32 %v1375_v47, %v850_v42  ;;  %vm582_vm14 = vcmp.eq.s32.totalorder %v4146_v23, %v400_v19  ;;  %vm1107_vm15 = vcmp.eq.s32.totalorder %v4154_v28, %v400_v19  ;;  %vm1888_vm0 = vcmp.eq.s32.totalorder %v4162_v32, %v400_v19 }
 0x237   : > { %v3192_v50 = vadd.f32 %v2936_v22, %v2411_v54  ;;  %v847_v41 = vsel %vm582_vm14, %v4111_v61, 0.0  ;;  %v1372_v7 = vsel %vm1107_vm15, %v4119_v3, 0.0  ;;  %v2153_v6 = vsel %vm1888_vm0, %v4127_v9, 0.0 }
 0x238   : > { %v2412_v53 = vadd.f32 %v2156_v45, %v1631_v15  ;;  %v1628_v43 = vadd.f32 %v1372_v7, %v847_v41  ;;  %vm2669_vm1 = vcmp.eq.s32.totalorder %v4170_v36, %v400_v19  ;;  %vm583_vm2 = vcmp.eq.s32.totalorder %v4148_v24, %v400_v19 }
 0x239   : > { %3503 = vmatpush.xpose.msra.mxu2 %v3192_v50  ;;  %v2934_v56 = vsel %vm2669_vm1, %v4135_v14, 0.0  ;;  %v848_v59 = vsel %vm583_vm2, %v4113_v0, 0.0  ;;  %vm1108_vm9 = vcmp.eq.s32.totalorder %v4156_v29, %v400_v19  ;;  %vm1889_vm3 = vcmp.eq.s32.totalorder %v4164_v33, %v400_v19 }
 0x23a   : > { %v3193_v63 = vadd.f32 %v2937_v58, %v2412_v53  ;;  %v2409_v57 = vadd.f32 %v2153_v6, %v1628_v43  ;;  %v1373_v48 = vsel %vm1108_vm9, %v4121_v4, 0.0  ;;  %v2154_v46 = vsel %vm1889_vm3, %v4129_v11, 0.0 }
 0x23b   : > { %v1629_v51 = vadd.f32 %v1373_v48, %v848_v59  ;;  %vm2670_vm4 = vcmp.eq.s32.totalorder %v4172_v37, %v400_v19  ;;  %vm580_vm6 = vcmp.eq.s32.totalorder %v4150_v25, %v6105_v10  ;;  %vm1105_vm7 = vcmp.eq.s32.totalorder %v4158_v30, %v6105_v10 }
 0x23c   : > { %3523 = vmatpush.xpose.msra.mxu3 %v3193_v63  ;;  %v3190_v55 = vadd.f32 %v2934_v56, %v2409_v57  ;;  %v2935_v52 = vsel %vm2670_vm4, %v4137_v18, 0.0  ;;  %v845_v22 = vsel %vm580_vm6, %v4115_v1, 0.0  ;;  %v1370_v42 = vsel %vm1105_vm7, %v4123_v5, 0.0 }
 0x23d   : > { %v2410_v54 = vadd.f32 %v2154_v46, %v1629_v51  ;;  %v1626_v47 = vadd.f32 %v1370_v42, %v845_v22  ;;  %vm1886_vm8 = vcmp.eq.s32.totalorder %v4166_v34, %v6105_v10  ;;  %vm2667_vm5 = vcmp.eq.s32.totalorder %v4174_v38, %v6105_v10 }
 0x23e   : > { %3463 = vmatpush.xpose.msra.mxu0 %v3190_v55  ;;  %v2151_v19 = vsel %vm1886_vm8, %v4131_v12, 0.0  ;;  %v2932_v45 = vsel %vm2667_vm5, %v4139_v20, 0.0  ;;  %vm581_vm10 = vcmp.eq.s32.totalorder %v4152_v27, %v6105_v10  ;;  %vm1106_vm11 = vcmp.eq.s32.totalorder %v4160_v31, %v6105_v10 }
 0x23f   : > { %v3191_v58 = vadd.f32 %v2935_v52, %v2410_v54  ;;  %v2407_v15 = vadd.f32 %v2151_v19, %v1626_v47  ;;  %v846_v50 = vsel %vm581_vm10, %v4117_v2, 0.0  ;;  %v1371_v41 = vsel %vm1106_vm11, %v4125_v8, 0.0 }
 0x240   : > { %v1627_v7 = vadd.f32 %v1371_v41, %v846_v50  ;;  %vm1887_vm12 = vcmp.eq.s32.totalorder %v4168_v35, %v6105_v10  ;;  %vm2668_vm13 = vcmp.eq.s32.totalorder %v4176_v40, %v6105_v10  ;;  %vm578_vm14 = vcmp.eq.s32.totalorder %v4146_v23, %v6105_v10 }
 0x241   : > { %3483 = vmatpush.xpose.msra.mxu1 %v3191_v58  ;;  %v3188_v6 = vadd.f32 %v2932_v45, %v2407_v15  ;;  %v2152_v53 = vsel %vm1887_vm12, %v4133_v13, 0.0  ;;  %v2933_v43 = vsel %vm2668_vm13, %v4141_v21, 0.0  ;;  %v843_v56 = vsel %vm578_vm14, %v4111_v61, 0.0 }
 0x242   : > { %v2408_v59 = vadd.f32 %v2152_v53, %v1627_v7  ;;  %vm1103_vm15 = vcmp.eq.s32.totalorder %v4154_v28, %v6105_v10  ;;  %vm1884_vm0 = vcmp.eq.s32.totalorder %v4162_v32, %v6105_v10  ;;  %vm2665_vm1 = vcmp.eq.s32.totalorder %v4170_v36, %v6105_v10 }
 0x243   : > { %3504 = vmatpush.xpose.msra.mxu2 %v3188_v6  ;;  %v1368_v63 = vsel %vm1103_vm15, %v4119_v3, 0.0  ;;  %v2149_v57 = vsel %vm1884_vm0, %v4127_v9, 0.0  ;;  %v2930_v48 = vsel %vm2665_vm1, %v4135_v14, 0.0  ;;  %vm579_vm2 = vcmp.eq.s32.totalorder %v4148_v24, %v6105_v10 }
 0x244   : > { %v3189_v46 = vadd.f32 %v2933_v43, %v2408_v59  ;;  %v1624_v51 = vadd.f32 %v1368_v63, %v843_v56  ;;  %v844_v55 = vsel %vm579_vm2, %v4113_v0, 0.0  ;;  %vm1104_vm9 = vcmp.eq.s32.totalorder %v4156_v29, %v6105_v10 }
 0x245   : > { %v1369_v52 = vsel %vm1104_vm9, %v4121_v4, 0.0  ;;  %vm1885_vm3 = vcmp.eq.s32.totalorder %v4164_v33, %v6105_v10  ;;  %vm2666_vm4 = vcmp.eq.s32.totalorder %v4172_v37, %v6105_v10  ;;  %vm576_vm6 = vcmp.eq.s32.totalorder %v4150_v25, %v6109_v17 }
 0x246   : > { %3524 = vmatpush.xpose.msra.mxu3 %v3189_v46  ;;  %v2405_v22 = vadd.f32 %v2149_v57, %v1624_v51  ;;  %v1625_v42 = vadd.f32 %v1369_v52, %v844_v55  ;;  %v2150_v54 = vsel %vm1885_vm3, %v4129_v11, 0.0  ;;  %v2931_v47 = vsel %vm2666_vm4, %v4137_v18, 0.0 }
 0x247   : > { %v841_v19 = vsel %vm576_vm6, %v4115_v1, 0.0  ;;  %vm1101_vm7 = vcmp.eq.s32.totalorder %v4158_v30, %v6109_v17  ;;  %vm1882_vm8 = vcmp.eq.s32.totalorder %v4166_v34, %v6109_v17  ;;  %vm2663_vm5 = vcmp.eq.s32.totalorder %v4174_v38, %v6109_v17 }
 0x248   : > { %v3186_v10 = vadd.f32 %v2930_v48, %v2405_v22  ;;  %v2406_v45 = vadd.f32 %v2150_v54, %v1625_v42  ;;  %v1366_v58 = vsel %vm1101_vm7, %v4123_v5, 0.0  ;;  %v2147_v15 = vsel %vm1882_vm8, %v4131_v12, 0.0 }
 0x249   : > { %v1622_v50 = vadd.f32 %v1366_v58, %v841_v19  ;;  %v2928_v41 = vsel %vm2663_vm5, %v4139_v20, 0.0  ;;  %vm577_vm10 = vcmp.eq.s32.totalorder %v4152_v27, %v6109_v17  ;;  %vm1102_vm11 = vcmp.eq.s32.totalorder %v4160_v31, %v6109_v17 }
 0x24a   : > { %3464 = vmatpush.xpose.msra.mxu0 %v3186_v10  ;;  %v3187_v7 = vadd.f32 %v2931_v47, %v2406_v45  ;;  %v842_v6 = vsel %vm577_vm10, %v4117_v2, 0.0  ;;  %v1367_v53 = vsel %vm1102_vm11, %v4125_v8, 0.0  ;;  %vm1883_vm12 = vcmp.eq.s32.totalorder %v4168_v35, %v6109_v17 }
 0x24b   : > { %v2403_v43 = vadd.f32 %v2147_v15, %v1622_v50  ;;  %v1623_v56 = vadd.f32 %v1367_v53, %v842_v6  ;;  %v2148_v59 = vsel %vm1883_vm12, %v4133_v13, 0.0  ;;  %vm2664_vm13 = vcmp.eq.s32.totalorder %v4176_v40, %v6109_v17 }
 0x24c   : > { %3484 = vmatpush.xpose.msra.mxu1 %v3187_v7  ;;  %v2929_v63 = vsel %vm2664_vm13, %v4141_v21, 0.0  ;;  %vm574_vm14 = vcmp.eq.s32.totalorder %v4146_v23, %v6109_v17  ;;  %vm1099_vm15 = vcmp.eq.s32.totalorder %v4154_v28, %v6109_v17  ;;  %vm1880_vm0 = vcmp.eq.s32.totalorder %v4162_v32, %v6109_v17 }
 0x24d   : > { %v3184_v57 = vadd.f32 %v2928_v41, %v2403_v43  ;;  %v2404_v48 = vadd.f32 %v2148_v59, %v1623_v56  ;;  %v839_v46 = vsel %vm574_vm14, %v4111_v61, 0.0  ;;  %v1364_v51 = vsel %vm1099_vm15, %v4119_v3, 0.0 }
 0x24e   : > { %v1620_v55 = vadd.f32 %v1364_v51, %v839_v46  ;;  %v2145_v52 = vsel %vm1880_vm0, %v4127_v9, 0.0  ;;  %vm2661_vm1 = vcmp.eq.s32.totalorder %v4170_v36, %v6109_v17  ;;  %vm575_vm2 = vcmp.eq.s32.totalorder %v4148_v24, %v6109_v17 }
 0x24f   : > { %3505 = vmatpush.xpose.msra.mxu2 %v3184_v57  ;;  %v3185_v22 = vadd.f32 %v2929_v63, %v2404_v48  ;;  %v2926_v42 = vsel %vm2661_vm1, %v4135_v14, 0.0  ;;  %v840_v54 = vsel %vm575_vm2, %v4113_v0, 0.0  ;;  %vm1100_vm9 = vcmp.eq.s32.totalorder %v4156_v29, %v6109_v17 }
 0x250   : > { %v2401_v47 = vadd.f32 %v2145_v52, %v1620_v55  ;;  %v1365_v19 = vsel %vm1100_vm9, %v4121_v4, 0.0  ;;  %vm1881_vm3 = vcmp.eq.s32.totalorder %v4164_v33, %v6109_v17  ;;  %vm2662_vm4 = vcmp.eq.s32.totalorder %v4172_v37, %v6109_v17 }
 0x251   : > { %3525 = vmatpush.xpose.msra.mxu3 %v3185_v22  ;;  %v1621_v10 = vadd.f32 %v1365_v19, %v840_v54  ;;  %v2146_v45 = vsel %vm1881_vm3, %v4129_v11, 0.0  ;;  %v2927_v58 = vsel %vm2662_vm4, %v4137_v18, 0.0  ;;  %v397_v15 = vadd.s32 %v4099_v39, %v6112_v49 }
 0x252   : > { %v3182_v50 = vadd.f32 %v2926_v42, %v2401_v47  ;;  %v330_v41 = vadd.s32 272, %v4094_v26  ;;  %v329_v7 = vadd.s32 264, %v4094_v26  ;;  %v328_v6 = vadd.s32 256, %v4094_v26 }
 0x253   : > { %v2402_v53 = vadd.f32 %v2146_v45, %v1621_v10  ;;  %vm572_vm6 = vcmp.eq.s32.totalorder %v4150_v25, %v397_v15  ;;  %vm1097_vm7 = vcmp.eq.s32.totalorder %v4158_v30, %v397_v15  ;;  %vm1878_vm8 = vcmp.eq.s32.totalorder %v4166_v34, %v397_v15 }
 0x254   : > { %3465 = vmatpush.xpose.msra.mxu0 %v3182_v50  ;;  %v837_v17 = vsel %vm572_vm6, %v4115_v1, 0.0  ;;  %v1362_v43 = vsel %vm1097_vm7, %v4123_v5, 0.0  ;;  %v2143_v49 = vsel %vm1878_vm8, %v4131_v12, 0.0  ;;  %vm2659_vm5 = vcmp.eq.s32.totalorder %v4174_v38, %v397_v15 }
 0x255   : > { %v3183_v56 = vadd.f32 %v2927_v58, %v2402_v53  ;;  %v1618_v59 = vadd.f32 %v1362_v43, %v837_v17  ;;  %v2924_v63 = vsel %vm2659_vm5, %v4139_v20, 0.0  ;;  %vm573_vm10 = vcmp.eq.s32.totalorder %v4152_v27, %v397_v15 }
 0x256   : > { %v838_v57 = vsel %vm573_vm10, %v4117_v2, 0.0  ;;  %vm1098_vm11 = vcmp.eq.s32.totalorder %v4160_v31, %v397_v15  ;;  %vm1879_vm12 = vcmp.eq.s32.totalorder %v4168_v35, %v397_v15  ;;  %vm2660_vm13 = vcmp.eq.s32.totalorder %v4176_v40, %v397_v15 }
 0x257   : > { %3485 = vmatpush.xpose.msra.mxu1 %v3183_v56  ;;  %v2399_v48 = vadd.f32 %v2143_v49, %v1618_v59  ;;  %v1363_v46 = vsel %vm1098_vm11, %v4125_v8, 0.0  ;;  %v2144_v51 = vsel %vm1879_vm12, %v4133_v13, 0.0  ;;  %v2925_v55 = vsel %vm2660_vm13, %v4141_v21, 0.0 }
 0x258   : > { %v1619_v52 = vadd.f32 %v1363_v46, %v838_v57  ;;  %vm570_vm14 = vcmp.eq.s32.totalorder %v4146_v23, %v397_v15  ;;  %vm1095_vm15 = vcmp.eq.s32.totalorder %v4154_v28, %v397_v15  ;;  %vm1876_vm0 = vcmp.eq.s32.totalorder %v4162_v32, %v397_v15 }
 0x259   : > { %v3180_v22 = vadd.f32 %v2924_v63, %v2399_v48  ;;  %v835_v42 = vsel %vm570_vm14, %v4111_v61, 0.0  ;;  %v1360_v54 = vsel %vm1095_vm15, %v4119_v3, 0.0  ;;  %v2141_v47 = vsel %vm1876_vm0, %v4127_v9, 0.0 }
 0x25a   : > { %v2400_v19 = vadd.f32 %v2144_v51, %v1619_v52  ;;  %v1616_v10 = vadd.f32 %v1360_v54, %v835_v42  ;;  %vm2657_vm1 = vcmp.eq.s32.totalorder %v4170_v36, %v397_v15  ;;  %vm571_vm2 = vcmp.eq.s32.totalorder %v4148_v24, %v397_v15 }
 0x25b   : > { %3506 = vmatpush.xpose.msra.mxu2 %v3180_v22  ;;  %v2922_v45 = vsel %vm2657_vm1, %v4135_v14, 0.0  ;;  %v836_v58 = vsel %vm571_vm2, %v4113_v0, 0.0  ;;  %vm1096_vm9 = vcmp.eq.s32.totalorder %v4156_v29, %v397_v15  ;;  %vm1877_vm3 = vcmp.eq.s32.totalorder %v4164_v33, %v397_v15 }
 0x25c   : > { %v3181_v50 = vadd.f32 %v2925_v55, %v2400_v19  ;;  %v2397_v53 = vadd.f32 %v2141_v47, %v1616_v10  ;;  %v1361_v17 = vsel %vm1096_vm9, %v4121_v4, 0.0  ;;  %v2142_v43 = vsel %vm1877_vm3, %v4129_v11, 0.0 }
 0x25d   : > { %v1617_v49 = vadd.f32 %v1361_v17, %v836_v58  ;;  %vm2658_vm4 = vcmp.eq.s32.totalorder %v4172_v37, %v397_v15  ;;  %v396_v56 = vadd.s32 %v4099_v39, %v330_v41  ;;  %v6280_v59 = vadd.s32 %v4099_v39, %v329_v7 }
 0x25e   : > { %3526 = vmatpush.xpose.msra.mxu3 %v3181_v50  ;;  %v3178_v63 = vadd.f32 %v2922_v45, %v2397_v53  ;;  %v2923_v57 = vsel %vm2658_vm4, %v4137_v18, 0.0  ;;  %v6284_v48 = vadd.s32 %v4099_v39, %v328_v6  ;;  %v6287_v46 = vadd.s32 504, %v4094_v26 }
 0x25f   : > { %v2398_v51 = vadd.f32 %v2142_v43, %v1617_v49  ;;  %vm568_vm6 = vcmp.eq.s32.totalorder %v4150_v25, %v396_v56  ;;  %vm1093_vm7 = vcmp.eq.s32.totalorder %v4158_v30, %v396_v56  ;;  %vm1874_vm8 = vcmp.eq.s32.totalorder %v4166_v34, %v396_v56 }
 0x260   : > { %3466 = vmatpush.xpose.msra.mxu0 %v3178_v63  ;;  %v833_v15 = vsel %vm568_vm6, %v4115_v1, 0.0  ;;  %v1358_v41 = vsel %vm1093_vm7, %v4123_v5, 0.0  ;;  %v2139_v7 = vsel %vm1874_vm8, %v4131_v12, 0.0  ;;  %vm2655_vm5 = vcmp.eq.s32.totalorder %v4174_v38, %v396_v56 }
 0x261   : > { %v3179_v6 = vadd.f32 %v2923_v57, %v2398_v51  ;;  %v1614_v55 = vadd.f32 %v1358_v41, %v833_v15  ;;  %v2920_v52 = vsel %vm2655_vm5, %v4139_v20, 0.0  ;;  %vm569_vm10 = vcmp.eq.s32.totalorder %v4152_v27, %v396_v56 }
 0x262   : > { %v834_v22 = vsel %vm569_vm10, %v4117_v2, 0.0  ;;  %vm1094_vm11 = vcmp.eq.s32.totalorder %v4160_v31, %v396_v56  ;;  %vm1875_vm12 = vcmp.eq.s32.totalorder %v4168_v35, %v396_v56  ;;  %vm2656_vm13 = vcmp.eq.s32.totalorder %v4176_v40, %v396_v56 }
 0x263   : > { %3486 = vmatpush.xpose.msra.mxu1 %v3179_v6  ;;  %v2395_v42 = vadd.f32 %v2139_v7, %v1614_v55  ;;  %v1359_v54 = vsel %vm1094_vm11, %v4125_v8, 0.0  ;;  %v2140_v47 = vsel %vm1875_vm12, %v4133_v13, 0.0  ;;  %v2921_v19 = vsel %vm2656_vm13, %v4141_v21, 0.0 }
 0x264   : > { %v1615_v10 = vadd.f32 %v1359_v54, %v834_v22  ;;  %vm566_vm14 = vcmp.eq.s32.totalorder %v4146_v23, %v396_v56  ;;  %vm1091_vm15 = vcmp.eq.s32.totalorder %v4154_v28, %v396_v56  ;;  %vm1872_vm0 = vcmp.eq.s32.totalorder %v4162_v32, %v396_v56 }
 0x265   : > { %v3176_v45 = vadd.f32 %v2920_v52, %v2395_v42  ;;  %v831_v58 = vsel %vm566_vm14, %v4111_v61, 0.0  ;;  %v1356_v50 = vsel %vm1091_vm15, %v4119_v3, 0.0  ;;  %v2137_v53 = vsel %vm1872_vm0, %v4127_v9, 0.0 }
 0x266   : > { %v2396_v17 = vadd.f32 %v2140_v47, %v1615_v10  ;;  %v1612_v43 = vadd.f32 %v1356_v50, %v831_v58  ;;  %vm2653_vm1 = vcmp.eq.s32.totalorder %v4170_v36, %v396_v56  ;;  %vm567_vm2 = vcmp.eq.s32.totalorder %v4148_v24, %v396_v56 }
 0x267   : > { %3507 = vmatpush.xpose.msra.mxu2 %v3176_v45  ;;  %v2918_v49 = vsel %vm2653_vm1, %v4135_v14, 0.0  ;;  %v832_v63 = vsel %vm567_vm2, %v4113_v0, 0.0  ;;  %vm1092_vm9 = vcmp.eq.s32.totalorder %v4156_v29, %v396_v56  ;;  %vm1873_vm3 = vcmp.eq.s32.totalorder %v4164_v33, %v396_v56 }
 0x268   : > { %v3177_v57 = vadd.f32 %v2921_v19, %v2396_v17  ;;  %v2393_v51 = vadd.f32 %v2137_v53, %v1612_v43  ;;  %v1357_v15 = vsel %vm1092_vm9, %v4121_v4, 0.0  ;;  %v2138_v41 = vsel %vm1873_vm3, %v4129_v11, 0.0 }
 0x269   : > { %v1613_v7 = vadd.f32 %v1357_v15, %v832_v63  ;;  %vm2654_vm4 = vcmp.eq.s32.totalorder %v4172_v37, %v396_v56  ;;  %vm564_vm6 = vcmp.eq.s32.totalorder %v4150_v25, %v6280_v59  ;;  %vm1089_vm7 = vcmp.eq.s32.totalorder %v4158_v30, %v6280_v59 }
 0x26a   : > { %3527 = vmatpush.xpose.msra.mxu3 %v3177_v57  ;;  %v3174_v6 = vadd.f32 %v2918_v49, %v2393_v51  ;;  %v2919_v55 = vsel %vm2654_vm4, %v4137_v18, 0.0  ;;  %v829_v52 = vsel %vm564_vm6, %v4115_v1, 0.0  ;;  %v1354_v22 = vsel %vm1089_vm7, %v4123_v5, 0.0 }
 0x26b   : > { %v2394_v42 = vadd.f32 %v2138_v41, %v1613_v7  ;;  %v1610_v54 = vadd.f32 %v1354_v22, %v829_v52  ;;  %vm1870_vm8 = vcmp.eq.s32.totalorder %v4166_v34, %v6280_v59  ;;  %vm2651_vm5 = vcmp.eq.s32.totalorder %v4174_v38, %v6280_v59 }
 0x26c   : > { %3467 = vmatpush.xpose.msra.mxu0 %v3174_v6  ;;  %v2135_v56 = vsel %vm1870_vm8, %v4131_v12, 0.0  ;;  %v2916_v47 = vsel %vm2651_vm5, %v4139_v20, 0.0  ;;  %vm565_vm10 = vcmp.eq.s32.totalorder %v4152_v27, %v6280_v59  ;;  %vm1090_vm11 = vcmp.eq.s32.totalorder %v4160_v31, %v6280_v59 }
 0x26d   : > { %v3175_v19 = vadd.f32 %v2919_v55, %v2394_v42  ;;  %v2391_v10 = vadd.f32 %v2135_v56, %v1610_v54  ;;  %v830_v45 = vsel %vm565_vm10, %v4117_v2, 0.0  ;;  %v1355_v58 = vsel %vm1090_vm11, %v4125_v8, 0.0 }
 0x26e   : > { %v1611_v50 = vadd.f32 %v1355_v58, %v830_v45  ;;  %vm1871_vm12 = vcmp.eq.s32.totalorder %v4168_v35, %v6280_v59  ;;  %vm2652_vm13 = vcmp.eq.s32.totalorder %v4176_v40, %v6280_v59  ;;  %vm562_vm14 = vcmp.eq.s32.totalorder %v4146_v23, %v6280_v59 }
 0x26f   : > { %3487 = vmatpush.xpose.msra.mxu1 %v3175_v19  ;;  %v3172_v53 = vadd.f32 %v2916_v47, %v2391_v10  ;;  %v2136_v17 = vsel %vm1871_vm12, %v4133_v13, 0.0  ;;  %v2917_v43 = vsel %vm2652_vm13, %v4141_v21, 0.0  ;;  %v827_v49 = vsel %vm562_vm14, %v4111_v61, 0.0 }
 0x270   : > { %v2392_v63 = vadd.f32 %v2136_v17, %v1611_v50  ;;  %vm1087_vm15 = vcmp.eq.s32.totalorder %v4154_v28, %v6280_v59  ;;  %vm1868_vm0 = vcmp.eq.s32.totalorder %v4162_v32, %v6280_v59  ;;  %vm2649_vm1 = vcmp.eq.s32.totalorder %v4170_v36, %v6280_v59 }
 0x271   : > { %3508 = vmatpush.xpose.msra.mxu2 %v3172_v53  ;;  %v1352_v57 = vsel %vm1087_vm15, %v4119_v3, 0.0  ;;  %v2133_v51 = vsel %vm1868_vm0, %v4127_v9, 0.0  ;;  %v2914_v15 = vsel %vm2649_vm1, %v4135_v14, 0.0  ;;  %vm563_vm2 = vcmp.eq.s32.totalorder %v4148_v24, %v6280_v59 }
 0x272   : > { %v3173_v41 = vadd.f32 %v2917_v43, %v2392_v63  ;;  %v1608_v7 = vadd.f32 %v1352_v57, %v827_v49  ;;  %v828_v6 = vsel %vm563_vm2, %v4113_v0, 0.0  ;;  %vm1088_vm9 = vcmp.eq.s32.totalorder %v4156_v29, %v6280_v59 }
 0x273   : > { %v1353_v55 = vsel %vm1088_vm9, %v4121_v4, 0.0  ;;  %vm1869_vm3 = vcmp.eq.s32.totalorder %v4164_v33, %v6280_v59  ;;  %vm2650_vm4 = vcmp.eq.s32.totalorder %v4172_v37, %v6280_v59  ;;  %vm560_vm6 = vcmp.eq.s32.totalorder %v4150_v25, %v6284_v48 }
 0x274   : > { %3528 = vmatpush.xpose.msra.mxu3 %v3173_v41  ;;  %v2389_v52 = vadd.f32 %v2133_v51, %v1608_v7  ;;  %v1609_v22 = vadd.f32 %v1353_v55, %v828_v6  ;;  %v2134_v42 = vsel %vm1869_vm3, %v4129_v11, 0.0  ;;  %v2915_v54 = vsel %vm2650_vm4, %v4137_v18, 0.0 }
 0x275   : > { %v825_v56 = vsel %vm560_vm6, %v4115_v1, 0.0  ;;  %vm1085_vm7 = vcmp.eq.s32.totalorder %v4158_v30, %v6284_v48  ;;  %vm1866_vm8 = vcmp.eq.s32.totalorder %v4166_v34, %v6284_v48  ;;  %vm2647_vm5 = vcmp.eq.s32.totalorder %v4174_v38, %v6284_v48 }
 0x276   : > { %v3170_v59 = vadd.f32 %v2914_v15, %v2389_v52  ;;  %v2390_v47 = vadd.f32 %v2134_v42, %v1609_v22  ;;  %v1350_v19 = vsel %vm1085_vm7, %v4123_v5, 0.0  ;;  %v2131_v10 = vsel %vm1866_vm8, %v4131_v12, 0.0 }
 0x277   : > { %v1606_v45 = vadd.f32 %v1350_v19, %v825_v56  ;;  %v2912_v58 = vsel %vm2647_vm5, %v4139_v20, 0.0  ;;  %v6383_v50 = vadd.s32 %v4099_v39, %v6287_v46  ;;  %vm561_vm10 = vcmp.eq.s32.totalorder %v4152_v27, %v6284_v48 }
 0x278   : > { %3468 = vmatpush.xpose.msra.mxu0 %v3170_v59  ;;  %v3171_v53 = vadd.f32 %v2915_v54, %v2390_v47  ;;  %v826_v17 = vsel %vm561_vm10, %v4117_v2, 0.0  ;;  %vm1086_vm11 = vcmp.eq.s32.totalorder %v4160_v31, %v6284_v48  ;;  %vm1867_vm12 = vcmp.eq.s32.totalorder %v4168_v35, %v6284_v48 }
 0x279   : > { %v2387_v43 = vadd.f32 %v2131_v10, %v1606_v45  ;;  %vm684_vm13 = vcmp.eq.s32.totalorder %v4150_v25, %v6383_v50  ;;  %vm1209_vm14 = vcmp.eq.s32.totalorder %v4158_v30, %v6383_v50  ;;  %vm1990_vm15 = vcmp.eq.s32.totalorder %v4166_v34, %v6383_v50 }
 0x27a   : > { %3488 = vmatpush.xpose.msra.mxu1 %v3171_v53  ;;  %v949_v46 = vsel %vm684_vm13, %v4115_v1, 0.0  ;;  %v1474_v49 = vsel %vm1209_vm14, %v4123_v5, 0.0  ;;  %v2255_v63 = vsel %vm1990_vm15, %v4131_v12, 0.0  ;;  %vm2771_vm0 = vcmp.eq.s32.totalorder %v4174_v38, %v6383_v50 }
 0x27b   : > { %v3168_v57 = vadd.f32 %v2912_v58, %v2387_v43  ;;  %v1730_v51 = vadd.f32 %v1474_v49, %v949_v46  ;;  %v3036_v15 = vsel %vm2771_vm0, %v4139_v20, 0.0  ;;  %v1351_v41 = vsel %vm1086_vm11, %v4125_v8, 0.0 }
 0x27c   : > { %v1607_v7 = vadd.f32 %v1351_v41, %v826_v17  ;;  %v2132_v6 = vsel %vm1867_vm12, %v4133_v13, 0.0  ;;  %vm2648_vm1 = vcmp.eq.s32.totalorder %v4176_v40, %v6284_v48  ;;  %vm685_vm2 = vcmp.eq.s32.totalorder %v4152_v27, %v6383_v50 }
 0x27d   : > { %3509 = vmatpush.xpose.msra.mxu2 %v3168_v57  ;;  %v2511_v55 = vadd.f32 %v2255_v63, %v1730_v51  ;;  %v2913_v52 = vsel %vm2648_vm1, %v4141_v21, 0.0  ;;  %v950_v22 = vsel %vm685_vm2, %v4117_v2, 0.0  ;;  %vm1210_vm9 = vcmp.eq.s32.totalorder %v4160_v31, %v6383_v50 }
 0x27e   : > { %v2388_v42 = vadd.f32 %v2132_v6, %v1607_v7  ;;  %v1475_v54 = vsel %vm1210_vm9, %v4125_v8, 0.0  ;;  %vm1991_vm3 = vcmp.eq.s32.totalorder %v4168_v35, %v6383_v50  ;;  %vm2772_vm4 = vcmp.eq.s32.totalorder %v4176_v40, %v6383_v50 }
 0x27f   : > { %v3292_v56 = vadd.f32 %v3036_v15, %v2511_v55  ;;  %v1731_v59 = vadd.f32 %v1475_v54, %v950_v22  ;;  %v2256_v47 = vsel %vm1991_vm3, %v4133_v13, 0.0  ;;  %v3037_v19 = vsel %vm2772_vm4, %v4141_v21, 0.0 }
 0x280   : > { %v3169_v10 = vadd.f32 %v2913_v52, %v2388_v42  ;;  %vm558_vm6 = vcmp.eq.s32.totalorder %v4146_v23, %v6284_v48  ;;  %vm1083_vm7 = vcmp.eq.s32.totalorder %v4154_v28, %v6284_v48  ;;  %vm1864_vm8 = vcmp.eq.s32.totalorder %v4162_v32, %v6284_v48  ;;  %3510 = vmatmul.f32.vlgmr.msra.gmra.mxu2 %v5570_v60 }
 0x281   : > { %3574 = vmatpush.xpose.msrb.mxu2 %v3292_v56  ;;  %v2512_v45 = vadd.f32 %v2256_v47, %v1731_v59  ;;  %v823_v58 = vsel %vm558_vm6, %v4111_v61, 0.0  ;;  %v1348_v53 = vsel %vm1083_vm7, %v4119_v3, 0.0  ;;  %v2129_v17 = vsel %vm1864_vm8, %v4127_v9, 0.0 }
 0x282   : > { %3529 = vmatpush.xpose.msra.mxu3 %v3169_v10  ;;  %v1604_v43 = vadd.f32 %v1348_v53, %v823_v58  ;;  %vm2645_vm5 = vcmp.eq.s32.totalorder %v4170_v36, %v6284_v48  ;;  %vm559_vm10 = vcmp.eq.s32.totalorder %v4148_v24, %v6284_v48  ;;  %vm1084_vm11 = vcmp.eq.s32.totalorder %v4156_v29, %v6284_v48 }
 0x283   : > { %v3293_v46 = vadd.f32 %v3037_v19, %v2512_v45  ;;  %v2910_v49 = vsel %vm2645_vm5, %v4135_v14, 0.0  ;;  %v824_v63 = vsel %vm559_vm10, %v4113_v0, 0.0  ;;  %v1349_v57 = vsel %vm1084_vm11, %v4121_v4, 0.0 }
 0x284   : > { %v2385_v51 = vadd.f32 %v2129_v17, %v1604_v43  ;;  %v1605_v15 = vadd.f32 %v1349_v57, %v824_v63  ;;  %vm1865_vm12 = vcmp.eq.s32.totalorder %v4164_v33, %v6284_v48  ;;  %vm2646_vm13 = vcmp.eq.s32.totalorder %v4172_v37, %v6284_v48 }
 0x285   : > { %v2130_v41 = vsel %vm1865_vm12, %v4129_v11, 0.0  ;;  %v2911_v7 = vsel %vm2646_vm13, %v4137_v18, 0.0  ;;  %vm682_vm14 = vcmp.eq.s32.totalorder %v4146_v23, %v6383_v50  ;;  %vm1207_vm15 = vcmp.eq.s32.totalorder %v4154_v28, %v6383_v50  ;;  %3530 = vmatmul.f32.vlgmr.msra.gmra.mxu3 %v5593_v62 }
 0x286   : > { %3594 = vmatpush.xpose.msrb.mxu3 %v3293_v46  ;;  %v3166_v6 = vadd.f32 %v2910_v49, %v2385_v51  ;;  %v2386_v55 = vadd.f32 %v2130_v41, %v1605_v15  ;;  %v947_v52 = vsel %vm682_vm14, %v4111_v61, 0.0  ;;  %v1472_v22 = vsel %vm1207_vm15, %v4119_v3, 0.0 }
 0x287   : > { %v1728_v48 = vadd.f32 %v1472_v22, %v947_v52  ;;  %vm1988_vm0 = vcmp.eq.s32.totalorder %v4162_v32, %v6383_v50  ;;  %vm2769_vm1 = vcmp.eq.s32.totalorder %v4170_v36, %v6383_v50  ;;  %vm683_vm2 = vcmp.eq.s32.totalorder %v4148_v24, %v6383_v50 }
 0x288   : > { %3469 = vmatpush.xpose.msra.mxu0 %v3166_v6  ;;  %v3167_v42 = vadd.f32 %v2911_v7, %v2386_v55  ;;  %v2253_v54 = vsel %vm1988_vm0, %v4127_v9, 0.0  ;;  %v3034_v56 = vsel %vm2769_vm1, %v4135_v14, 0.0  ;;  %v948_v59 = vsel %vm683_vm2, %v4113_v0, 0.0 }
 0x289   : > { %v2509_v47 = vadd.f32 %v2253_v54, %v1728_v48  ;;  %vm1208_vm9 = vcmp.eq.s32.totalorder %v4156_v29, %v6383_v50  ;;  %vm1989_vm3 = vcmp.eq.s32.totalorder %v4164_v33, %v6383_v50  ;;  %vm2770_vm4 = vcmp.eq.s32.totalorder %v4172_v37, %v6383_v50 }
 0x28a   : > { %3489 = vmatpush.xpose.msra.mxu1 %v3167_v42  ;;  %v1473_v19 = vsel %vm1208_vm9, %v4121_v4, 0.0  ;;  %v2254_v10 = vsel %vm1989_vm3, %v4129_v11, 0.0  ;;  %v358_v45 = vadd.s32 496, %v4094_v26  ;;  %v357_v17 = vadd.s32 488, %v4094_v26 }
 0x28b   : > { %v3290_v58 = vadd.f32 %v3034_v56, %v2509_v47  ;;  %v1729_v53 = vadd.f32 %v1473_v19, %v948_v59  ;;  %v356_v43 = vadd.s32 480, %v4094_v26  ;;  %3470 = vmatmul.f32.vlgmr.msra.gmra.mxu0 %v5616_v16  ;;  %v3035_v46 = vsel %vm2770_vm4, %v4137_v18, 0.0 }
 0x28c   : > { %v424_v49 = vadd.s32 %v4099_v39, %v358_v45  ;;  %v6477_v63 = vadd.s32 %v4099_v39, %v357_v17  ;;  %v6483_v51 = vadd.s32 472, %v4094_v26 }
 0x28d   : > { %3534 = vmatpush.xpose.msrb.mxu0 %v3290_v58  ;;  %v2510_v50 = vadd.f32 %v2254_v10, %v1729_v53  ;;  %v6480_v57 = vadd.s32 %v4099_v39, %v356_v43  ;;  %3490 = vmatmul.f32.vlgmr.msra.gmra.mxu1 %v5622_v44 }
 0x28e   : > { %vm680_vm6 = vcmp.eq.s32.totalorder %v4150_v25, %v424_v49  ;;  %vm1205_vm7 = vcmp.eq.s32.totalorder %v4158_v30, %v424_v49  ;;  %vm1986_vm8 = vcmp.eq.s32.totalorder %v4166_v34, %v424_v49  ;;  %vm2767_vm5 = vcmp.eq.s32.totalorder %v4174_v38, %v424_v49 }
 0x28f   : > { %v3291_v15 = vadd.f32 %v3035_v46, %v2510_v50  ;;  %v945_v41 = vsel %vm680_vm6, %v4115_v1, 0.0  ;;  %v1470_v7 = vsel %vm1205_vm7, %v4123_v5, 0.0  ;;  %v2251_v6 = vsel %vm1986_vm8, %v4131_v12, 0.0 }
 0x290   : > { %v1726_v55 = vadd.f32 %v1470_v7, %v945_v41  ;;  %v3032_v52 = vsel %vm2767_vm5, %v4139_v20, 0.0  ;;  %vm681_vm10 = vcmp.eq.s32.totalorder %v4152_v27, %v424_v49  ;;  %vm1206_vm11 = vcmp.eq.s32.totalorder %v4160_v31, %v424_v49 }
 0x291   : > { %3554 = vmatpush.xpose.msrb.mxu1 %v3291_v15  ;;  %v946_v22 = vsel %vm681_vm10, %v4117_v2, 0.0  ;;  %v1471_v48 = vsel %vm1206_vm11, %v4125_v8, 0.0  ;;  %vm1987_vm12 = vcmp.eq.s32.totalorder %v4168_v35, %v424_v49  ;;  %vm2768_vm13 = vcmp.eq.s32.totalorder %v4176_v40, %v424_v49 }
 0x292   : > { %v2507_v42 = vadd.f32 %v2251_v6, %v1726_v55  ;;  %v1727_v54 = vadd.f32 %v1471_v48, %v946_v22  ;;  %v2252_v56 = vsel %vm1987_vm12, %v4133_v13, 0.0  ;;  %v3033_v59 = vsel %vm2768_vm13, %v4141_v21, 0.0 }
 0x293   : > { %vm678_vm14 = vcmp.eq.s32.totalorder %v4146_v23, %v424_v49  ;;  %vm1203_vm15 = vcmp.eq.s32.totalorder %v4154_v28, %v424_v49  ;;  %vm1984_vm0 = vcmp.eq.s32.totalorder %v4162_v32, %v424_v49  ;;  %vm2765_vm1 = vcmp.eq.s32.totalorder %v4170_v36, %v424_v49 }
 0x294   : > { %v3288_v47 = vadd.f32 %v3032_v52, %v2507_v42  ;;  %v2508_v19 = vadd.f32 %v2252_v56, %v1727_v54  ;;  %v943_v10 = vsel %vm678_vm14, %v4111_v61, 0.0  ;;  %v1468_v45 = vsel %vm1203_vm15, %v4119_v3, 0.0 }
 0x295   : > { %v1724_v58 = vadd.f32 %v1468_v45, %v943_v10  ;;  %v2249_v53 = vsel %vm1984_vm0, %v4127_v9, 0.0  ;;  %v3030_v17 = vsel %vm2765_vm1, %v4135_v14, 0.0  ;;  %vm679_vm2 = vcmp.eq.s32.totalorder %v4148_v24, %v424_v49 }
 0x296   : > { %3575 = vmatpush.xpose.msrb.mxu2 %v3288_v47  ;;  %v3289_v43 = vadd.f32 %v3033_v59, %v2508_v19  ;;  %v944_v46 = vsel %vm679_vm2, %v4113_v0, 0.0  ;;  %vm1204_vm9 = vcmp.eq.s32.totalorder %v4156_v29, %v424_v49  ;;  %vm1985_vm3 = vcmp.eq.s32.totalorder %v4164_v33, %v424_v49 }
 0x297   : > { %v2505_v50 = vadd.f32 %v2249_v53, %v1724_v58  ;;  %v1469_v15 = vsel %vm1204_vm9, %v4121_v4, 0.0  ;;  %v2250_v41 = vsel %vm1985_vm3, %v4129_v11, 0.0  ;;  %vm2766_vm4 = vcmp.eq.s32.totalorder %v4172_v37, %v424_v49 }
 0x298   : > { %3595 = vmatpush.xpose.msrb.mxu3 %v3289_v43  ;;  %v1725_v7 = vadd.f32 %v1469_v15, %v944_v46  ;;  %v3031_v6 = vsel %vm2766_vm4, %v4137_v18, 0.0  ;;  %vm676_vm6 = vcmp.eq.s32.totalorder %v4150_v25, %v6477_v63  ;;  %vm1201_vm7 = vcmp.eq.s32.totalorder %v4158_v30, %v6477_v63 }
 0x299   : > { %v3286_v55 = vadd.f32 %v3030_v17, %v2505_v50  ;;  %v941_v52 = vsel %vm676_vm6, %v4115_v1, 0.0  ;;  %v1466_v22 = vsel %vm1201_vm7, %v4123_v5, 0.0  ;;  %vm1982_vm8 = vcmp.eq.s32.totalorder %v4166_v34, %v6477_v63 }
 0x29a   : > { %v2506_v48 = vadd.f32 %v2250_v41, %v1725_v7  ;;  %v1722_v49 = vadd.f32 %v1466_v22, %v941_v52  ;;  %v2247_v42 = vsel %vm1982_vm8, %v4131_v12, 0.0  ;;  %vm2763_vm5 = vcmp.eq.s32.totalorder %v4174_v38, %v6477_v63 }
 0x29b   : > { %3535 = vmatpush.xpose.msrb.mxu0 %v3286_v55  ;;  %v3028_v54 = vsel %vm2763_vm5, %v4139_v20, 0.0  ;;  %vm677_vm10 = vcmp.eq.s32.totalorder %v4152_v27, %v6477_v63  ;;  %vm1202_vm11 = vcmp.eq.s32.totalorder %v4160_v31, %v6477_v63  ;;  %vm1983_vm12 = vcmp.eq.s32.totalorder %v4168_v35, %v6477_v63 }
 0x29c   : > { %v3287_v56 = vadd.f32 %v3031_v6, %v2506_v48  ;;  %v2503_v59 = vadd.f32 %v2247_v42, %v1722_v49  ;;  %v942_v47 = vsel %vm677_vm10, %v4117_v2, 0.0  ;;  %v1467_v19 = vsel %vm1202_vm11, %v4125_v8, 0.0 }
 0x29d   : > { %v1723_v10 = vadd.f32 %v1467_v19, %v942_v47  ;;  %v2248_v45 = vsel %vm1983_vm12, %v4133_v13, 0.0  ;;  %vm2764_vm13 = vcmp.eq.s32.totalorder %v4176_v40, %v6477_v63  ;;  %vm674_vm14 = vcmp.eq.s32.totalorder %v4146_v23, %v6477_v63 }
 0x29e   : > { %3555 = vmatpush.xpose.msrb.mxu1 %v3287_v56  ;;  %v3284_v58 = vadd.f32 %v3028_v54, %v2503_v59  ;;  %v3029_v53 = vsel %vm2764_vm13, %v4141_v21, 0.0  ;;  %v939_v17 = vsel %vm674_vm14, %v4111_v61, 0.0  ;;  %vm1199_vm15 = vcmp.eq.s32.totalorder %v4154_v28, %v6477_v63 }
 0x29f   : > { %v2504_v43 = vadd.f32 %v2248_v45, %v1723_v10  ;;  %v1464_v46 = vsel %vm1199_vm15, %v4119_v3, 0.0  ;;  %vm1980_vm0 = vcmp.eq.s32.totalorder %v4162_v32, %v6477_v63  ;;  %vm2761_vm1 = vcmp.eq.s32.totalorder %v4170_v36, %v6477_v63 }
 0x2a0   : > { %3576 = vmatpush.xpose.msrb.mxu2 %v3284_v58  ;;  %v1720_v50 = vadd.f32 %v1464_v46, %v939_v17  ;;  %v2245_v15 = vsel %vm1980_vm0, %v4127_v9, 0.0  ;;  %v3026_v41 = vsel %vm2761_vm1, %v4135_v14, 0.0  ;;  %vm675_vm2 = vcmp.eq.s32.totalorder %v4148_v24, %v6477_v63 }
 0x2a1   : > { %v3285_v7 = vadd.f32 %v3029_v53, %v2504_v43  ;;  %v940_v6 = vsel %vm675_vm2, %v4113_v0, 0.0  ;;  %vm1200_vm9 = vcmp.eq.s32.totalorder %v4156_v29, %v6477_v63  ;;  %vm1981_vm3 = vcmp.eq.s32.totalorder %v4164_v33, %v6477_v63 }
 0x2a2   : > { %v2501_v55 = vadd.f32 %v2245_v15, %v1720_v50  ;;  %v1465_v52 = vsel %vm1200_vm9, %v4121_v4, 0.0  ;;  %v2246_v22 = vsel %vm1981_vm3, %v4129_v11, 0.0  ;;  %vm2762_vm4 = vcmp.eq.s32.totalorder %v4172_v37, %v6477_v63 }
 0x2a3   : > { %3596 = vmatpush.xpose.msrb.mxu3 %v3285_v7  ;;  %v1721_v48 = vadd.f32 %v1465_v52, %v940_v6  ;;  %v3027_v49 = vsel %vm2762_vm4, %v4137_v18, 0.0  ;;  %vm672_vm6 = vcmp.eq.s32.totalorder %v4150_v25, %v6480_v57  ;;  %vm1197_vm7 = vcmp.eq.s32.totalorder %v4158_v30, %v6480_v57 }
 0x2a4   : > { %v3282_v42 = vadd.f32 %v3026_v41, %v2501_v55  ;;  %v937_v54 = vsel %vm672_vm6, %v4115_v1, 0.0  ;;  %v1462_v56 = vsel %vm1197_vm7, %v4123_v5, 0.0  ;;  %vm1978_vm8 = vcmp.eq.s32.totalorder %v4166_v34, %v6480_v57 }
 0x2a5   : > { %v2502_v59 = vadd.f32 %v2246_v22, %v1721_v48  ;;  %v1718_v63 = vadd.f32 %v1462_v56, %v937_v54  ;;  %v2243_v47 = vsel %vm1978_vm8, %v4131_v12, 0.0  ;;  %vm2759_vm5 = vcmp.eq.s32.totalorder %v4174_v38, %v6480_v57 }
 0x2a6   : > { %3536 = vmatpush.xpose.msrb.mxu0 %v3282_v42  ;;  %v3024_v19 = vsel %vm2759_vm5, %v4139_v20, 0.0  ;;  %vm673_vm10 = vcmp.eq.s32.totalorder %v4152_v27, %v6480_v57  ;;  %vm1198_vm11 = vcmp.eq.s32.totalorder %v4160_v31, %v6480_v57  ;;  %vm1979_vm12 = vcmp.eq.s32.totalorder %v4168_v35, %v6480_v57 }
 0x2a7   : > { %v3283_v10 = vadd.f32 %v3027_v49, %v2502_v59  ;;  %v2499_v45 = vadd.f32 %v2243_v47, %v1718_v63  ;;  %v938_v58 = vsel %vm673_vm10, %v4117_v2, 0.0  ;;  %v1463_v53 = vsel %vm1198_vm11, %v4125_v8, 0.0 }
 0x2a8   : > { %v1719_v17 = vadd.f32 %v1463_v53, %v938_v58  ;;  %v2244_v43 = vsel %vm1979_vm12, %v4133_v13, 0.0  ;;  %vm2760_vm13 = vcmp.eq.s32.totalorder %v4176_v40, %v6480_v57  ;;  %vm670_vm14 = vcmp.eq.s32.totalorder %v4146_v23, %v6480_v57 }
 0x2a9   : > { %3556 = vmatpush.xpose.msrb.mxu1 %v3283_v10  ;;  %v3280_v46 = vadd.f32 %v3024_v19, %v2499_v45  ;;  %v3025_v50 = vsel %vm2760_vm13, %v4141_v21, 0.0  ;;  %v935_v15 = vsel %vm670_vm14, %v4111_v61, 0.0  ;;  %vm1195_vm15 = vcmp.eq.s32.totalorder %v4154_v28, %v6480_v57 }
 0x2aa   : > { %v2500_v41 = vadd.f32 %v2244_v43, %v1719_v17  ;;  %v1460_v7 = vsel %vm1195_vm15, %v4119_v3, 0.0  ;;  %vm1976_vm0 = vcmp.eq.s32.totalorder %v4162_v32, %v6480_v57  ;;  %vm2757_vm1 = vcmp.eq.s32.totalorder %v4170_v36, %v6480_v57 }
 0x2ab   : > { %3577 = vmatpush.xpose.msrb.mxu2 %v3280_v46  ;;  %v1716_v6 = vadd.f32 %v1460_v7, %v935_v15  ;;  %v2241_v55 = vsel %vm1976_vm0, %v4127_v9, 0.0  ;;  %v3022_v52 = vsel %vm2757_vm1, %v4135_v14, 0.0  ;;  %vm671_vm2 = vcmp.eq.s32.totalorder %v4148_v24, %v6480_v57 }
 0x2ac   : > { %v3281_v22 = vadd.f32 %v3025_v50, %v2500_v41  ;;  %v936_v48 = vsel %vm671_vm2, %v4113_v0, 0.0  ;;  %vm1196_vm9 = vcmp.eq.s32.totalorder %v4156_v29, %v6480_v57  ;;  %vm1977_vm3 = vcmp.eq.s32.totalorder %v4164_v33, %v6480_v57 }
 0x2ad   : > { %v2497_v49 = vadd.f32 %v2241_v55, %v1716_v6  ;;  %v1461_v42 = vsel %vm1196_vm9, %v4121_v4, 0.0  ;;  %v2242_v54 = vsel %vm1977_vm3, %v4129_v11, 0.0  ;;  %vm2758_vm4 = vcmp.eq.s32.totalorder %v4172_v37, %v6480_v57 }
 0x2ae   : > { %3597 = vmatpush.xpose.msrb.mxu3 %v3281_v22  ;;  %v1717_v56 = vadd.f32 %v1461_v42, %v936_v48  ;;  %v3023_v59 = vsel %vm2758_vm4, %v4137_v18, 0.0  ;;  %v421_v63 = vadd.s32 %v4099_v39, %v6483_v51  ;;  %v354_v19 = vadd.s32 464, %v4094_v26 }
 0x2af   : > { %v3278_v47 = vadd.f32 %v3022_v52, %v2497_v49  ;;  %v353_v10 = vadd.s32 456, %v4094_v26  ;;  %v352_v45 = vadd.s32 448, %v4094_v26 }
 0x2b0   : > { %v2498_v58 = vadd.f32 %v2242_v54, %v1717_v56  ;;  %vm668_vm6 = vcmp.eq.s32.totalorder %v4150_v25, %v421_v63  ;;  %vm1193_vm7 = vcmp.eq.s32.totalorder %v4158_v30, %v421_v63  ;;  %vm1974_vm8 = vcmp.eq.s32.totalorder %v4166_v34, %v421_v63 }
 0x2b1   : > { %3537 = vmatpush.xpose.msrb.mxu0 %v3278_v47  ;;  %v933_v57 = vsel %vm668_vm6, %v4115_v1, 0.0  ;;  %v1458_v53 = vsel %vm1193_vm7, %v4123_v5, 0.0  ;;  %v2239_v51 = vsel %vm1974_vm8, %v4131_v12, 0.0  ;;  %vm2755_vm5 = vcmp.eq.s32.totalorder %v4174_v38, %v421_v63 }
 0x2b2   : > { %v3279_v17 = vadd.f32 %v3023_v59, %v2498_v58  ;;  %v1714_v43 = vadd.f32 %v1458_v53, %v933_v57  ;;  %v3020_v46 = vsel %vm2755_vm5, %v4139_v20, 0.0  ;;  %vm669_vm10 = vcmp.eq.s32.totalorder %v4152_v27, %v421_v63 }
 0x2b3   : > { %v934_v50 = vsel %vm669_vm10, %v4117_v2, 0.0  ;;  %vm1194_vm11 = vcmp.eq.s32.totalorder %v4160_v31, %v421_v63  ;;  %vm1975_vm12 = vcmp.eq.s32.totalorder %v4168_v35, %v421_v63  ;;  %vm2756_vm13 = vcmp.eq.s32.totalorder %v4176_v40, %v421_v63 }
 0x2b4   : > { %3557 = vmatpush.xpose.msrb.mxu1 %v3279_v17  ;;  %v2495_v15 = vadd.f32 %v2239_v51, %v1714_v43  ;;  %v1459_v41 = vsel %vm1194_vm11, %v4125_v8, 0.0  ;;  %v2240_v7 = vsel %vm1975_vm12, %v4133_v13, 0.0  ;;  %v3021_v6 = vsel %vm2756_vm13, %v4141_v21, 0.0 }
 0x2b5   : > { %v1715_v55 = vadd.f32 %v1459_v41, %v934_v50  ;;  %vm666_vm14 = vcmp.eq.s32.totalorder %v4146_v23, %v421_v63  ;;  %vm1191_vm15 = vcmp.eq.s32.totalorder %v4154_v28, %v421_v63  ;;  %vm1972_vm0 = vcmp.eq.s32.totalorder %v4162_v32, %v421_v63 }
 0x2b6   : > { %v3276_v52 = vadd.f32 %v3020_v46, %v2495_v15  ;;  %v931_v22 = vsel %vm666_vm14, %v4111_v61, 0.0  ;;  %v1456_v48 = vsel %vm1191_vm15, %v4119_v3, 0.0  ;;  %v2237_v49 = vsel %vm1972_vm0, %v4127_v9, 0.0 }
 0x2b7   : > { %v2496_v42 = vadd.f32 %v2240_v7, %v1715_v55  ;;  %v1712_v54 = vadd.f32 %v1456_v48, %v931_v22  ;;  %vm2753_vm1 = vcmp.eq.s32.totalorder %v4170_v36, %v421_v63  ;;  %vm667_vm2 = vcmp.eq.s32.totalorder %v4148_v24, %v421_v63 }
 0x2b8   : > { %3578 = vmatpush.xpose.msrb.mxu2 %v3276_v52  ;;  %v3018_v56 = vsel %vm2753_vm1, %v4135_v14, 0.0  ;;  %v932_v59 = vsel %vm667_vm2, %v4113_v0, 0.0  ;;  %vm1192_vm9 = vcmp.eq.s32.totalorder %v4156_v29, %v421_v63  ;;  %vm1973_vm3 = vcmp.eq.s32.totalorder %v4164_v33, %v421_v63 }
 0x2b9   : > { %v3277_v47 = vadd.f32 %v3021_v6, %v2496_v42  ;;  %v2493_v58 = vadd.f32 %v2237_v49, %v1712_v54  ;;  %v1457_v57 = vsel %vm1192_vm9, %v4121_v4, 0.0  ;;  %v2238_v53 = vsel %vm1973_vm3, %v4129_v11, 0.0 }
 0x2ba   : > { %v1713_v51 = vadd.f32 %v1457_v57, %v932_v59  ;;  %vm2754_vm4 = vcmp.eq.s32.totalorder %v4172_v37, %v421_v63  ;;  %v420_v17 = vadd.s32 %v4099_v39, %v354_v19  ;;  %v6652_v43 = vadd.s32 %v4099_v39, %v353_v10 }
 0x2bb   : > { %3598 = vmatpush.xpose.msrb.mxu3 %v3277_v47  ;;  %v3274_v46 = vadd.f32 %v3018_v56, %v2493_v58  ;;  %v3019_v50 = vsel %vm2754_vm4, %v4137_v18, 0.0  ;;  %v6656_v15 = vadd.s32 %v4099_v39, %v352_v45  ;;  %v6659_v41 = vadd.s32 440, %v4094_v26 }
 0x2bc   : > { %v2494_v7 = vadd.f32 %v2238_v53, %v1713_v51  ;;  %vm664_vm6 = vcmp.eq.s32.totalorder %v4150_v25, %v420_v17  ;;  %vm1189_vm7 = vcmp.eq.s32.totalorder %v4158_v30, %v420_v17  ;;  %vm1970_vm8 = vcmp.eq.s32.totalorder %v4166_v34, %v420_v17 }
 0x2bd   : > { %3538 = vmatpush.xpose.msrb.mxu0 %v3274_v46  ;;  %v929_v63 = vsel %vm664_vm6, %v4115_v1, 0.0  ;;  %v1454_v19 = vsel %vm1189_vm7, %v4123_v5, 0.0  ;;  %v2235_v10 = vsel %vm1970_vm8, %v4131_v12, 0.0  ;;  %vm2751_vm5 = vcmp.eq.s32.totalorder %v4174_v38, %v420_v17 }
 0x2be   : > { %v3275_v45 = vadd.f32 %v3019_v50, %v2494_v7  ;;  %v1710_v6 = vadd.f32 %v1454_v19, %v929_v63  ;;  %v3016_v55 = vsel %vm2751_vm5, %v4139_v20, 0.0  ;;  %vm665_vm10 = vcmp.eq.s32.totalorder %v4152_v27, %v420_v17 }
 0x2bf   : > { %v930_v52 = vsel %vm665_vm10, %v4117_v2, 0.0  ;;  %vm1190_vm11 = vcmp.eq.s32.totalorder %v4160_v31, %v420_v17  ;;  %vm1971_vm12 = vcmp.eq.s32.totalorder %v4168_v35, %v420_v17  ;;  %vm2752_vm13 = vcmp.eq.s32.totalorder %v4176_v40, %v420_v17 }
 0x2c0   : > { %3558 = vmatpush.xpose.msrb.mxu1 %v3275_v45  ;;  %v2491_v22 = vadd.f32 %v2235_v10, %v1710_v6  ;;  %v1455_v48 = vsel %vm1190_vm11, %v4125_v8, 0.0  ;;  %v2236_v49 = vsel %vm1971_vm12, %v4133_v13, 0.0  ;;  %v3017_v42 = vsel %vm2752_vm13, %v4141_v21, 0.0 }
 0x2c1   : > { %v1711_v54 = vadd.f32 %v1455_v48, %v930_v52  ;;  %vm662_vm14 = vcmp.eq.s32.totalorder %v4146_v23, %v420_v17  ;;  %vm1187_vm15 = vcmp.eq.s32.totalorder %v4154_v28, %v420_v17  ;;  %vm1968_vm0 = vcmp.eq.s32.totalorder %v4162_v32, %v420_v17 }
 0x2c2   : > { %v3272_v56 = vadd.f32 %v3016_v55, %v2491_v22  ;;  %v927_v59 = vsel %vm662_vm14, %v4111_v61, 0.0  ;;  %v1452_v47 = vsel %vm1187_vm15, %v4119_v3, 0.0  ;;  %v2233_v58 = vsel %vm1968_vm0, %v4127_v9, 0.0 }
 0x2c3   : > { %v2492_v57 = vadd.f32 %v2236_v49, %v1711_v54  ;;  %v1708_v53 = vadd.f32 %v1452_v47, %v927_v59  ;;  %vm2749_vm1 = vcmp.eq.s32.totalorder %v4170_v36, %v420_v17  ;;  %vm663_vm2 = vcmp.eq.s32.totalorder %v4148_v24, %v420_v17 }
 0x2c4   : > { %3579 = vmatpush.xpose.msrb.mxu2 %v3272_v56  ;;  %v3014_v51 = vsel %vm2749_vm1, %v4135_v14, 0.0  ;;  %v928_v46 = vsel %vm663_vm2, %v4113_v0, 0.0  ;;  %vm1188_vm9 = vcmp.eq.s32.totalorder %v4156_v29, %v420_v17  ;;  %vm1969_vm3 = vcmp.eq.s32.totalorder %v4164_v33, %v420_v17 }
 0x2c5   : > { %v3273_v50 = vadd.f32 %v3017_v42, %v2492_v57  ;;  %v2489_v7 = vadd.f32 %v2233_v58, %v1708_v53  ;;  %v1453_v63 = vsel %vm1188_vm9, %v4121_v4, 0.0  ;;  %v2234_v19 = vsel %vm1969_vm3, %v4129_v11, 0.0 }
 0x2c6   : > { %v1709_v10 = vadd.f32 %v1453_v63, %v928_v46  ;;  %vm2750_vm4 = vcmp.eq.s32.totalorder %v4172_v37, %v420_v17  ;;  %vm660_vm6 = vcmp.eq.s32.totalorder %v4150_v25, %v6652_v43  ;;  %vm1185_vm7 = vcmp.eq.s32.totalorder %v4158_v30, %v6652_v43 }
 0x2c7   : > { %3599 = vmatpush.xpose.msrb.mxu3 %v3273_v50  ;;  %v3270_v45 = vadd.f32 %v3014_v51, %v2489_v7  ;;  %v3015_v6 = vsel %vm2750_vm4, %v4137_v18, 0.0  ;;  %v925_v55 = vsel %vm660_vm6, %v4115_v1, 0.0  ;;  %v1450_v52 = vsel %vm1185_vm7, %v4123_v5, 0.0 }
 0x2c8   : > { %v2490_v22 = vadd.f32 %v2234_v19, %v1709_v10  ;;  %v1706_v48 = vadd.f32 %v1450_v52, %v925_v55  ;;  %vm1966_vm8 = vcmp.eq.s32.totalorder %v4166_v34, %v6652_v43  ;;  %vm2747_vm5 = vcmp.eq.s32.totalorder %v4174_v38, %v6652_v43 }
 0x2c9   : > { %3539 = vmatpush.xpose.msrb.mxu0 %v3270_v45  ;;  %v2231_v17 = vsel %vm1966_vm8, %v4131_v12, 0.0  ;;  %v3012_v49 = vsel %vm2747_vm5, %v4139_v20, 0.0  ;;  %vm661_vm10 = vcmp.eq.s32.totalorder %v4152_v27, %v6652_v43  ;;  %vm1186_vm11 = vcmp.eq.s32.totalorder %v4160_v31, %v6652_v43 }
 0x2ca   : > { %v3271_v42 = vadd.f32 %v3015_v6, %v2490_v22  ;;  %v2487_v54 = vadd.f32 %v2231_v17, %v1706_v48  ;;  %v926_v56 = vsel %vm661_vm10, %v4117_v2, 0.0  ;;  %v1451_v59 = vsel %vm1186_vm11, %v4125_v8, 0.0 }
 0x2cb   : > { %v1707_v47 = vadd.f32 %v1451_v59, %v926_v56  ;;  %vm1967_vm12 = vcmp.eq.s32.totalorder %v4168_v35, %v6652_v43  ;;  %vm2748_vm13 = vcmp.eq.s32.totalorder %v4176_v40, %v6652_v43  ;;  %vm658_vm14 = vcmp.eq.s32.totalorder %v4146_v23, %v6652_v43 }
 0x2cc   : > { %3559 = vmatpush.xpose.msrb.mxu1 %v3271_v42  ;;  %v3268_v58 = vadd.f32 %v3012_v49, %v2487_v54  ;;  %v2232_v57 = vsel %vm1967_vm12, %v4133_v13, 0.0  ;;  %v3013_v53 = vsel %vm2748_vm13, %v4141_v21, 0.0  ;;  %v923_v51 = vsel %vm658_vm14, %v4111_v61, 0.0 }
 0x2cd   : > { %v2488_v46 = vadd.f32 %v2232_v57, %v1707_v47  ;;  %vm1183_vm15 = vcmp.eq.s32.totalorder %v4154_v28, %v6652_v43  ;;  %vm1964_vm0 = vcmp.eq.s32.totalorder %v4162_v32, %v6652_v43  ;;  %vm2745_vm1 = vcmp.eq.s32.totalorder %v4170_v36, %v6652_v43 }
 0x2ce   : > { %3580 = vmatpush.xpose.msrb.mxu2 %v3268_v58  ;;  %v1448_v50 = vsel %vm1183_vm15, %v4119_v3, 0.0  ;;  %v2229_v7 = vsel %vm1964_vm0, %v4127_v9, 0.0  ;;  %v3010_v63 = vsel %vm2745_vm1, %v4135_v14, 0.0  ;;  %vm659_vm2 = vcmp.eq.s32.totalorder %v4148_v24, %v6652_v43 }
 0x2cf   : > { %v3269_v19 = vadd.f32 %v3013_v53, %v2488_v46  ;;  %v1704_v10 = vadd.f32 %v1448_v50, %v923_v51  ;;  %v924_v45 = vsel %vm659_vm2, %v4113_v0, 0.0  ;;  %vm1184_vm9 = vcmp.eq.s32.totalorder %v4156_v29, %v6652_v43 }
 0x2d0   : > { %v1449_v6 = vsel %vm1184_vm9, %v4121_v4, 0.0  ;;  %vm1965_vm3 = vcmp.eq.s32.totalorder %v4164_v33, %v6652_v43  ;;  %vm2746_vm4 = vcmp.eq.s32.totalorder %v4172_v37, %v6652_v43  ;;  %vm656_vm6 = vcmp.eq.s32.totalorder %v4150_v25, %v6656_v15 }
 0x2d1   : > { %3600 = vmatpush.xpose.msrb.mxu3 %v3269_v19  ;;  %v2485_v55 = vadd.f32 %v2229_v7, %v1704_v10  ;;  %v1705_v52 = vadd.f32 %v1449_v6, %v924_v45  ;;  %v2230_v22 = vsel %vm1965_vm3, %v4129_v11, 0.0  ;;  %v3011_v48 = vsel %vm2746_vm4, %v4137_v18, 0.0 }
 0x2d2   : > { %v921_v17 = vsel %vm656_vm6, %v4115_v1, 0.0  ;;  %vm1181_vm7 = vcmp.eq.s32.totalorder %v4158_v30, %v6656_v15  ;;  %vm1962_vm8 = vcmp.eq.s32.totalorder %v4166_v34, %v6656_v15  ;;  %vm2743_vm5 = vcmp.eq.s32.totalorder %v4174_v38, %v6656_v15 }
 0x2d3   : > { %v3266_v43 = vadd.f32 %v3010_v63, %v2485_v55  ;;  %v2486_v49 = vadd.f32 %v2230_v22, %v1705_v52  ;;  %v1446_v42 = vsel %vm1181_vm7, %v4123_v5, 0.0  ;;  %v2227_v54 = vsel %vm1962_vm8, %v4131_v12, 0.0 }
 0x2d4   : > { %v1702_v56 = vadd.f32 %v1446_v42, %v921_v17  ;;  %v3008_v59 = vsel %vm2743_vm5, %v4139_v20, 0.0  ;;  %vm657_vm10 = vcmp.eq.s32.totalorder %v4152_v27, %v6656_v15  ;;  %vm1182_vm11 = vcmp.eq.s32.totalorder %v4160_v31, %v6656_v15 }
 0x2d5   : > { %3540 = vmatpush.xpose.msrb.mxu0 %v3266_v43  ;;  %v3267_v47 = vadd.f32 %v3011_v48, %v2486_v49  ;;  %v922_v58 = vsel %vm657_vm10, %v4117_v2, 0.0  ;;  %v1447_v57 = vsel %vm1182_vm11, %v4125_v8, 0.0  ;;  %vm1963_vm12 = vcmp.eq.s32.totalorder %v4168_v35, %v6656_v15 }
 0x2d6   : > { %v2483_v53 = vadd.f32 %v2227_v54, %v1702_v56  ;;  %v1703_v51 = vadd.f32 %v1447_v57, %v922_v58  ;;  %v2228_v46 = vsel %vm1963_vm12, %v4133_v13, 0.0  ;;  %vm2744_vm13 = vcmp.eq.s32.totalorder %v4176_v40, %v6656_v15 }
 0x2d7   : > { %3560 = vmatpush.xpose.msrb.mxu1 %v3267_v47  ;;  %v3009_v50 = vsel %vm2744_vm13, %v4141_v21, 0.0  ;;  %vm654_vm14 = vcmp.eq.s32.totalorder %v4146_v23, %v6656_v15  ;;  %vm1179_vm15 = vcmp.eq.s32.totalorder %v4154_v28, %v6656_v15  ;;  %vm1960_vm0 = vcmp.eq.s32.totalorder %v4162_v32, %v6656_v15 }
 0x2d8   : > { %v3264_v7 = vadd.f32 %v3008_v59, %v2483_v53  ;;  %v2484_v63 = vadd.f32 %v2228_v46, %v1703_v51  ;;  %v919_v19 = vsel %vm654_vm14, %v4111_v61, 0.0  ;;  %v1444_v10 = vsel %vm1179_vm15, %v4119_v3, 0.0 }
 0x2d9   : > { %v1700_v45 = vadd.f32 %v1444_v10, %v919_v19  ;;  %v2225_v6 = vsel %vm1960_vm0, %v4127_v9, 0.0  ;;  %vm2741_vm1 = vcmp.eq.s32.totalorder %v4170_v36, %v6656_v15  ;;  %vm655_vm2 = vcmp.eq.s32.totalorder %v4148_v24, %v6656_v15 }
 0x2da   : > { %3581 = vmatpush.xpose.msrb.mxu2 %v3264_v7  ;;  %v3265_v55 = vadd.f32 %v3009_v50, %v2484_v63  ;;  %v3006_v52 = vsel %vm2741_vm1, %v4135_v14, 0.0  ;;  %v920_v22 = vsel %vm655_vm2, %v4113_v0, 0.0  ;;  %vm1180_vm9 = vcmp.eq.s32.totalorder %v4156_v29, %v6656_v15 }
 0x2db   : > { %v2481_v48 = vadd.f32 %v2225_v6, %v1700_v45  ;;  %v1445_v17 = vsel %vm1180_vm9, %v4121_v4, 0.0  ;;  %vm1961_vm3 = vcmp.eq.s32.totalorder %v4164_v33, %v6656_v15  ;;  %vm2742_vm4 = vcmp.eq.s32.totalorder %v4172_v37, %v6656_v15 }
 0x2dc   : > { %3601 = vmatpush.xpose.msrb.mxu3 %v3265_v55  ;;  %v1701_v43 = vadd.f32 %v1445_v17, %v920_v22  ;;  %v2226_v49 = vsel %vm1961_vm3, %v4129_v11, 0.0  ;;  %v3007_v42 = vsel %vm2742_vm4, %v4137_v18, 0.0  ;;  %v417_v54 = vadd.s32 %v4099_v39, %v6659_v41 }
 0x2dd   : > { %v3262_v56 = vadd.f32 %v3006_v52, %v2481_v48  ;;  %v350_v59 = vadd.s32 432, %v4094_v26  ;;  %v349_v47 = vadd.s32 424, %v4094_v26  ;;  %v348_v58 = vadd.s32 416, %v4094_v26 }
 0x2de   : > { %v2482_v57 = vadd.f32 %v2226_v49, %v1701_v43  ;;  %vm652_vm6 = vcmp.eq.s32.totalorder %v4150_v25, %v417_v54  ;;  %vm1177_vm7 = vcmp.eq.s32.totalorder %v4158_v30, %v417_v54  ;;  %vm1958_vm8 = vcmp.eq.s32.totalorder %v4166_v34, %v417_v54 }
 0x2df   : > { %3541 = vmatpush.xpose.msrb.mxu0 %v3262_v56  ;;  %v917_v15 = vsel %vm652_vm6, %v4115_v1, 0.0  ;;  %v1442_v53 = vsel %vm1177_vm7, %v4123_v5, 0.0  ;;  %v2223_v41 = vsel %vm1958_vm8, %v4131_v12, 0.0  ;;  %vm2739_vm5 = vcmp.eq.s32.totalorder %v4174_v38, %v417_v54 }
 0x2e0   : > { %v3263_v51 = vadd.f32 %v3007_v42, %v2482_v57  ;;  %v1698_v46 = vadd.f32 %v1442_v53, %v917_v15  ;;  %v3004_v50 = vsel %vm2739_vm5, %v4139_v20, 0.0  ;;  %vm653_vm10 = vcmp.eq.s32.totalorder %v4152_v27, %v417_v54 }
 0x2e1   : > { %v918_v7 = vsel %vm653_vm10, %v4117_v2, 0.0  ;;  %vm1178_vm11 = vcmp.eq.s32.totalorder %v4160_v31, %v417_v54  ;;  %vm1959_vm12 = vcmp.eq.s32.totalorder %v4168_v35, %v417_v54  ;;  %vm2740_vm13 = vcmp.eq.s32.totalorder %v4176_v40, %v417_v54 }
 0x2e2   : > { %3561 = vmatpush.xpose.msrb.mxu1 %v3263_v51  ;;  %v2479_v63 = vadd.f32 %v2223_v41, %v1698_v46  ;;  %v1443_v19 = vsel %vm1178_vm11, %v4125_v8, 0.0  ;;  %v2224_v10 = vsel %vm1959_vm12, %v4133_v13, 0.0  ;;  %v3005_v45 = vsel %vm2740_vm13, %v4141_v21, 0.0 }
 0x2e3   : > { %v1699_v6 = vadd.f32 %v1443_v19, %v918_v7  ;;  %vm650_vm14 = vcmp.eq.s32.totalorder %v4146_v23, %v417_v54  ;;  %vm1175_vm15 = vcmp.eq.s32.totalorder %v4154_v28, %v417_v54  ;;  %vm1956_vm0 = vcmp.eq.s32.totalorder %v4162_v32, %v417_v54 }
 0x2e4   : > { %v3260_v55 = vadd.f32 %v3004_v50, %v2479_v63  ;;  %v915_v52 = vsel %vm650_vm14, %v4111_v61, 0.0  ;;  %v1440_v22 = vsel %vm1175_vm15, %v4119_v3, 0.0  ;;  %v2221_v48 = vsel %vm1956_vm0, %v4127_v9, 0.0 }
 0x2e5   : > { %v2480_v17 = vadd.f32 %v2224_v10, %v1699_v6  ;;  %v1696_v43 = vadd.f32 %v1440_v22, %v915_v52  ;;  %vm2737_vm1 = vcmp.eq.s32.totalorder %v4170_v36, %v417_v54  ;;  %vm651_vm2 = vcmp.eq.s32.totalorder %v4148_v24, %v417_v54 }
 0x2e6   : > { %3582 = vmatpush.xpose.msrb.mxu2 %v3260_v55  ;;  %v3002_v49 = vsel %vm2737_vm1, %v4135_v14, 0.0  ;;  %v916_v42 = vsel %vm651_vm2, %v4113_v0, 0.0  ;;  %vm1176_vm9 = vcmp.eq.s32.totalorder %v4156_v29, %v417_v54  ;;  %vm1957_vm3 = vcmp.eq.s32.totalorder %v4164_v33, %v417_v54 }
 0x2e7   : > { %v3261_v56 = vadd.f32 %v3005_v45, %v2480_v17  ;;  %v2477_v57 = vadd.f32 %v2221_v48, %v1696_v43  ;;  %v1441_v15 = vsel %vm1176_vm9, %v4121_v4, 0.0  ;;  %v2222_v53 = vsel %vm1957_vm3, %v4129_v11, 0.0 }
 0x2e8   : > { %v1697_v41 = vadd.f32 %v1441_v15, %v916_v42  ;;  %vm2738_vm4 = vcmp.eq.s32.totalorder %v4172_v37, %v417_v54  ;;  %v416_v51 = vadd.s32 %v4099_v39, %v350_v59  ;;  %v6827_v46 = vadd.s32 %v4099_v39, %v349_v47 }
 0x2e9   : > { %3602 = vmatpush.xpose.msrb.mxu3 %v3261_v56  ;;  %v3258_v50 = vadd.f32 %v3002_v49, %v2477_v57  ;;  %v3003_v7 = vsel %vm2738_vm4, %v4137_v18, 0.0  ;;  %v6831_v63 = vadd.s32 %v4099_v39, %v348_v58  ;;  %v6834_v19 = vadd.s32 408, %v4094_v26 }
 0x2ea   : > { %v2478_v10 = vadd.f32 %v2222_v53, %v1697_v41  ;;  %vm648_vm6 = vcmp.eq.s32.totalorder %v4150_v25, %v416_v51  ;;  %vm1173_vm7 = vcmp.eq.s32.totalorder %v4158_v30, %v416_v51  ;;  %vm1954_vm8 = vcmp.eq.s32.totalorder %v4166_v34, %v416_v51 }
 0x2eb   : > { %3542 = vmatpush.xpose.msrb.mxu0 %v3258_v50  ;;  %v913_v54 = vsel %vm648_vm6, %v4115_v1, 0.0  ;;  %v1438_v59 = vsel %vm1173_vm7, %v4123_v5, 0.0  ;;  %v2219_v47 = vsel %vm1954_vm8, %v4131_v12, 0.0  ;;  %vm2735_vm5 = vcmp.eq.s32.totalorder %v4174_v38, %v416_v51 }
 0x2ec   : > { %v3259_v58 = vadd.f32 %v3003_v7, %v2478_v10  ;;  %v1694_v45 = vadd.f32 %v1438_v59, %v913_v54  ;;  %v3000_v6 = vsel %vm2735_vm5, %v4139_v20, 0.0  ;;  %vm649_vm10 = vcmp.eq.s32.totalorder %v4152_v27, %v416_v51 }
 0x2ed   : > { %v914_v55 = vsel %vm649_vm10, %v4117_v2, 0.0  ;;  %vm1174_vm11 = vcmp.eq.s32.totalorder %v4160_v31, %v416_v51  ;;  %vm1955_vm12 = vcmp.eq.s32.totalorder %v4168_v35, %v416_v51  ;;  %vm2736_vm13 = vcmp.eq.s32.totalorder %v4176_v40, %v416_v51 }
 0x2ee   : > { %3562 = vmatpush.xpose.msrb.mxu1 %v3259_v58  ;;  %v2475_v52 = vadd.f32 %v2219_v47, %v1694_v45  ;;  %v1439_v22 = vsel %vm1174_vm11, %v4125_v8, 0.0  ;;  %v2220_v48 = vsel %vm1955_vm12, %v4133_v13, 0.0  ;;  %v3001_v17 = vsel %vm2736_vm13, %v4141_v21, 0.0 }
 0x2ef   : > { %v1695_v43 = vadd.f32 %v1439_v22, %v914_v55  ;;  %vm646_vm14 = vcmp.eq.s32.totalorder %v4146_v23, %v416_v51  ;;  %vm1171_vm15 = vcmp.eq.s32.totalorder %v4154_v28, %v416_v51  ;;  %vm1952_vm0 = vcmp.eq.s32.totalorder %v4162_v32, %v416_v51 }
 0x2f0   : > { %v3256_v49 = vadd.f32 %v3000_v6, %v2475_v52  ;;  %v911_v42 = vsel %vm646_vm14, %v4111_v61, 0.0  ;;  %v1436_v56 = vsel %vm1171_vm15, %v4119_v3, 0.0  ;;  %v2217_v57 = vsel %vm1952_vm0, %v4127_v9, 0.0 }
 0x2f1   : > { %v2476_v15 = vadd.f32 %v2220_v48, %v1695_v43  ;;  %v1692_v53 = vadd.f32 %v1436_v56, %v911_v42  ;;  %vm2733_vm1 = vcmp.eq.s32.totalorder %v4170_v36, %v416_v51  ;;  %vm647_vm2 = vcmp.eq.s32.totalorder %v4148_v24, %v416_v51 }
 0x2f2   : > { %3583 = vmatpush.xpose.msrb.mxu2 %v3256_v49  ;;  %v2998_v41 = vsel %vm2733_vm1, %v4135_v14, 0.0  ;;  %v912_v50 = vsel %vm647_vm2, %v4113_v0, 0.0  ;;  %vm1172_vm9 = vcmp.eq.s32.totalorder %v4156_v29, %v416_v51  ;;  %vm1953_vm3 = vcmp.eq.s32.totalorder %v4164_v33, %v416_v51 }
 0x2f3   : > { %v3257_v7 = vadd.f32 %v3001_v17, %v2476_v15  ;;  %v2473_v10 = vadd.f32 %v2217_v57, %v1692_v53  ;;  %v1437_v54 = vsel %vm1172_vm9, %v4121_v4, 0.0  ;;  %v2218_v59 = vsel %vm1953_vm3, %v4129_v11, 0.0 }
 0x2f4   : > { %v1693_v47 = vadd.f32 %v1437_v54, %v912_v50  ;;  %vm2734_vm4 = vcmp.eq.s32.totalorder %v4172_v37, %v416_v51  ;;  %vm644_vm6 = vcmp.eq.s32.totalorder %v4150_v25, %v6827_v46  ;;  %vm1169_vm7 = vcmp.eq.s32.totalorder %v4158_v30, %v6827_v46 }
 0x2f5   : > { %3603 = vmatpush.xpose.msrb.mxu3 %v3257_v7  ;;  %v3254_v58 = vadd.f32 %v2998_v41, %v2473_v10  ;;  %v2999_v45 = vsel %vm2734_vm4, %v4137_v18, 0.0  ;;  %v909_v6 = vsel %vm644_vm6, %v4115_v1, 0.0  ;;  %v1434_v55 = vsel %vm1169_vm7, %v4123_v5, 0.0 }
 0x2f6   : > { %v2474_v52 = vadd.f32 %v2218_v59, %v1693_v47  ;;  %v1690_v22 = vadd.f32 %v1434_v55, %v909_v6  ;;  %vm1950_vm8 = vcmp.eq.s32.totalorder %v4166_v34, %v6827_v46  ;;  %vm2731_vm5 = vcmp.eq.s32.totalorder %v4174_v38, %v6827_v46 }
 0x2f7   : > { %3543 = vmatpush.xpose.msrb.mxu0 %v3254_v58  ;;  %v2215_v51 = vsel %vm1950_vm8, %v4131_v12, 0.0  ;;  %v2996_v48 = vsel %vm2731_vm5, %v4139_v20, 0.0  ;;  %vm645_vm10 = vcmp.eq.s32.totalorder %v4152_v27, %v6827_v46  ;;  %vm1170_vm11 = vcmp.eq.s32.totalorder %v4160_v31, %v6827_v46 }
 0x2f8   : > { %v3255_v17 = vadd.f32 %v2999_v45, %v2474_v52  ;;  %v2471_v43 = vadd.f32 %v2215_v51, %v1690_v22  ;;  %v910_v49 = vsel %vm645_vm10, %v4117_v2, 0.0  ;;  %v1435_v42 = vsel %vm1170_vm11, %v4125_v8, 0.0 }
 0x2f9   : > { %v1691_v56 = vadd.f32 %v1435_v42, %v910_v49  ;;  %vm1951_vm12 = vcmp.eq.s32.totalorder %v4168_v35, %v6827_v46  ;;  %vm2732_vm13 = vcmp.eq.s32.totalorder %v4176_v40, %v6827_v46  ;;  %vm642_vm14 = vcmp.eq.s32.totalorder %v4146_v23, %v6827_v46 }
 0x2fa   : > { %3563 = vmatpush.xpose.msrb.mxu1 %v3255_v17  ;;  %v3252_v57 = vadd.f32 %v2996_v48, %v2471_v43  ;;  %v2216_v15 = vsel %vm1951_vm12, %v4133_v13, 0.0  ;;  %v2997_v53 = vsel %vm2732_vm13, %v4141_v21, 0.0  ;;  %v907_v41 = vsel %vm642_vm14, %v4111_v61, 0.0 }
 0x2fb   : > { %v2472_v50 = vadd.f32 %v2216_v15, %v1691_v56  ;;  %vm1167_vm15 = vcmp.eq.s32.totalorder %v4154_v28, %v6827_v46  ;;  %vm1948_vm0 = vcmp.eq.s32.totalorder %v4162_v32, %v6827_v46  ;;  %vm2729_vm1 = vcmp.eq.s32.totalorder %v4170_v36, %v6827_v46 }
 0x2fc   : > { %3584 = vmatpush.xpose.msrb.mxu2 %v3252_v57  ;;  %v1432_v7 = vsel %vm1167_vm15, %v4119_v3, 0.0  ;;  %v2213_v10 = vsel %vm1948_vm0, %v4127_v9, 0.0  ;;  %v2994_v54 = vsel %vm2729_vm1, %v4135_v14, 0.0  ;;  %vm643_vm2 = vcmp.eq.s32.totalorder %v4148_v24, %v6827_v46 }
 0x2fd   : > { %v3253_v59 = vadd.f32 %v2997_v53, %v2472_v50  ;;  %v1688_v47 = vadd.f32 %v1432_v7, %v907_v41  ;;  %v908_v58 = vsel %vm643_vm2, %v4113_v0, 0.0  ;;  %vm1168_vm9 = vcmp.eq.s32.totalorder %v4156_v29, %v6827_v46 }
 0x2fe   : > { %v1433_v45 = vsel %vm1168_vm9, %v4121_v4, 0.0  ;;  %vm1949_vm3 = vcmp.eq.s32.totalorder %v4164_v33, %v6827_v46  ;;  %vm2730_vm4 = vcmp.eq.s32.totalorder %v4172_v37, %v6827_v46  ;;  %vm640_vm6 = vcmp.eq.s32.totalorder %v4150_v25, %v6831_v63 }
 0x2ff   : > { %3604 = vmatpush.xpose.msrb.mxu3 %v3253_v59  ;;  %v2469_v6 = vadd.f32 %v2213_v10, %v1688_v47  ;;  %v1689_v55 = vadd.f32 %v1433_v45, %v908_v58  ;;  %v2214_v52 = vsel %vm1949_vm3, %v4129_v11, 0.0  ;;  %v2995_v22 = vsel %vm2730_vm4, %v4137_v18, 0.0 }
 0x300   : > { %v905_v51 = vsel %vm640_vm6, %v4115_v1, 0.0  ;;  %vm1165_vm7 = vcmp.eq.s32.totalorder %v4158_v30, %v6831_v63  ;;  %vm1946_vm8 = vcmp.eq.s32.totalorder %v4166_v34, %v6831_v63  ;;  %vm2727_vm5 = vcmp.eq.s32.totalorder %v4174_v38, %v6831_v63 }
 0x301   : > { %v3250_v46 = vadd.f32 %v2994_v54, %v2469_v6  ;;  %v2470_v48 = vadd.f32 %v2214_v52, %v1689_v55  ;;  %v1430_v17 = vsel %vm1165_vm7, %v4123_v5, 0.0  ;;  %v2211_v43 = vsel %vm1946_vm8, %v4131_v12, 0.0 }
 0x302   : > { %v1686_v49 = vadd.f32 %v1430_v17, %v905_v51  ;;  %v2992_v42 = vsel %vm2727_vm5, %v4139_v20, 0.0  ;;  %vm641_vm10 = vcmp.eq.s32.totalorder %v4152_v27, %v6831_v63  ;;  %vm1166_vm11 = vcmp.eq.s32.totalorder %v4160_v31, %v6831_v63 }
 0x303   : > { %3544 = vmatpush.xpose.msrb.mxu0 %v3250_v46  ;;  %v3251_v56 = vadd.f32 %v2995_v22, %v2470_v48  ;;  %v906_v57 = vsel %vm641_vm10, %v4117_v2, 0.0  ;;  %v1431_v15 = vsel %vm1166_vm11, %v4125_v8, 0.0  ;;  %vm1947_vm12 = vcmp.eq.s32.totalorder %v4168_v35, %v6831_v63 }
 0x304   : > { %v2467_v53 = vadd.f32 %v2211_v43, %v1686_v49  ;;  %v1687_v41 = vadd.f32 %v1431_v15, %v906_v57  ;;  %v2212_v50 = vsel %vm1947_vm12, %v4133_v13, 0.0  ;;  %vm2728_vm13 = vcmp.eq.s32.totalorder %v4176_v40, %v6831_v63 }
 0x305   : > { %3564 = vmatpush.xpose.msrb.mxu1 %v3251_v56  ;;  %v2993_v7 = vsel %vm2728_vm13, %v4141_v21, 0.0  ;;  %vm638_vm14 = vcmp.eq.s32.totalorder %v4146_v23, %v6831_v63  ;;  %vm1163_vm15 = vcmp.eq.s32.totalorder %v4154_v28, %v6831_v63  ;;  %vm1944_vm0 = vcmp.eq.s32.totalorder %v4162_v32, %v6831_v63 }
 0x306   : > { %v3248_v10 = vadd.f32 %v2992_v42, %v2467_v53  ;;  %v2468_v54 = vadd.f32 %v2212_v50, %v1687_v41  ;;  %v903_v59 = vsel %vm638_vm14, %v4111_v61, 0.0  ;;  %v1428_v47 = vsel %vm1163_vm15, %v4119_v3, 0.0 }
 0x307   : > { %v1684_v58 = vadd.f32 %v1428_v47, %v903_v59  ;;  %v2209_v45 = vsel %vm1944_vm0, %v4127_v9, 0.0  ;;  %vm2725_vm1 = vcmp.eq.s32.totalorder %v4170_v36, %v6831_v63  ;;  %vm639_vm2 = vcmp.eq.s32.totalorder %v4148_v24, %v6831_v63 }
 0x308   : > { %3585 = vmatpush.xpose.msrb.mxu2 %v3248_v10  ;;  %v3249_v6 = vadd.f32 %v2993_v7, %v2468_v54  ;;  %v2990_v55 = vsel %vm2725_vm1, %v4135_v14, 0.0  ;;  %v904_v52 = vsel %vm639_vm2, %v4113_v0, 0.0  ;;  %vm1164_vm9 = vcmp.eq.s32.totalorder %v4156_v29, %v6831_v63 }
 0x309   : > { %v2465_v22 = vadd.f32 %v2209_v45, %v1684_v58  ;;  %v1429_v51 = vsel %vm1164_vm9, %v4121_v4, 0.0  ;;  %vm1945_vm3 = vcmp.eq.s32.totalorder %v4164_v33, %v6831_v63  ;;  %vm2726_vm4 = vcmp.eq.s32.totalorder %v4172_v37, %v6831_v63 }
 0x30a   : > { %3605 = vmatpush.xpose.msrb.mxu3 %v3249_v6  ;;  %v1685_v46 = vadd.f32 %v1429_v51, %v904_v52  ;;  %v2210_v48 = vsel %vm1945_vm3, %v4129_v11, 0.0  ;;  %v2991_v17 = vsel %vm2726_vm4, %v4137_v18, 0.0  ;;  %v413_v43 = vadd.s32 %v4099_v39, %v6834_v19 }
 0x30b   : > { %v3246_v49 = vadd.f32 %v2990_v55, %v2465_v22  ;;  %v346_v42 = vadd.s32 400, %v4094_v26  ;;  %v345_v56 = vadd.s32 392, %v4094_v26  ;;  %v344_v57 = vadd.s32 384, %v4094_v26 }
 0x30c   : > { %v2466_v15 = vadd.f32 %v2210_v48, %v1685_v46  ;;  %vm636_vm6 = vcmp.eq.s32.totalorder %v4150_v25, %v413_v43  ;;  %vm1161_vm7 = vcmp.eq.s32.totalorder %v4158_v30, %v413_v43  ;;  %vm1942_vm8 = vcmp.eq.s32.totalorder %v4166_v34, %v413_v43 }
 0x30d   : > { %3545 = vmatpush.xpose.msrb.mxu0 %v3246_v49  ;;  %v901_v63 = vsel %vm636_vm6, %v4115_v1, 0.0  ;;  %v1426_v53 = vsel %vm1161_vm7, %v4123_v5, 0.0  ;;  %v2207_v19 = vsel %vm1942_vm8, %v4131_v12, 0.0  ;;  %vm2723_vm5 = vcmp.eq.s32.totalorder %v4174_v38, %v413_v43 }
 0x30e   : > { %v3247_v41 = vadd.f32 %v2991_v17, %v2466_v15  ;;  %v1682_v50 = vadd.f32 %v1426_v53, %v901_v63  ;;  %v2988_v26 = vsel %vm2723_vm5, %v4139_v20, 0.0  ;;  %vm637_vm10 = vcmp.eq.s32.totalorder %v4152_v27, %v413_v43 }
 0x30f   : > { %v902_v7 = vsel %vm637_vm10, %v4117_v2, 0.0  ;;  %vm1162_vm11 = vcmp.eq.s32.totalorder %v4160_v31, %v413_v43  ;;  %vm1943_vm12 = vcmp.eq.s32.totalorder %v4168_v35, %v413_v43  ;;  %vm2724_vm13 = vcmp.eq.s32.totalorder %v4176_v40, %v413_v43 }
 0x310   : > { %3565 = vmatpush.xpose.msrb.mxu1 %v3247_v41  ;;  %v2463_v10 = vadd.f32 %v2207_v19, %v1682_v50  ;;  %v1427_v54 = vsel %vm1162_vm11, %v4125_v8, 0.0  ;;  %v2208_v59 = vsel %vm1943_vm12, %v4133_v13, 0.0  ;;  %v2989_v47 = vsel %vm2724_vm13, %v4141_v21, 0.0 }
 0x311   : > { %v1683_v58 = vadd.f32 %v1427_v54, %v902_v7  ;;  %vm634_vm14 = vcmp.eq.s32.totalorder %v4146_v23, %v413_v43  ;;  %vm1159_vm15 = vcmp.eq.s32.totalorder %v4154_v28, %v413_v43  ;;  %vm1940_vm0 = vcmp.eq.s32.totalorder %v4162_v32, %v413_v43 }
 0x312   : > { %v3244_v45 = vadd.f32 %v2988_v26, %v2463_v10  ;;  %v899_v6 = vsel %vm634_vm14, %v4111_v61, 0.0  ;;  %v1424_v55 = vsel %vm1159_vm15, %v4119_v3, 0.0  ;;  %v2205_v52 = vsel %vm1940_vm0, %v4127_v9, 0.0 }
 0x313   : > { %v2464_v22 = vadd.f32 %v2208_v59, %v1683_v58  ;;  %v1680_v51 = vadd.f32 %v1424_v55, %v899_v6  ;;  %vm2721_vm1 = vcmp.eq.s32.totalorder %v4170_v36, %v413_v43  ;;  %vm635_vm2 = vcmp.eq.s32.totalorder %v4148_v24, %v413_v43 }
 0x314   : > { %3586 = vmatpush.xpose.msrb.mxu2 %v3244_v45  ;;  %v2986_v46 = vsel %vm2721_vm1, %v4135_v14, 0.0  ;;  %v900_v48 = vsel %vm635_vm2, %v4113_v0, 0.0  ;;  %vm1160_vm9 = vcmp.eq.s32.totalorder %v4156_v29, %v413_v43  ;;  %vm1941_vm3 = vcmp.eq.s32.totalorder %v4164_v33, %v413_v43 }
 0x315   : > { %v3245_v17 = vadd.f32 %v2989_v47, %v2464_v22  ;;  %v2461_v49 = vadd.f32 %v2205_v52, %v1680_v51  ;;  %v1425_v15 = vsel %vm1160_vm9, %v4121_v4, 0.0  ;;  %v2206_v63 = vsel %vm1941_vm3, %v4129_v11, 0.0 }
 0x316   : > { %v1681_v53 = vadd.f32 %v1425_v15, %v900_v48  ;;  %vm2722_vm4 = vcmp.eq.s32.totalorder %v4172_v37, %v413_v43  ;;  %v412_v19 = vadd.s32 %v4099_v39, %v346_v42  ;;  %v7003_v26 = vadd.s32 %v4099_v39, %v345_v56 }
 0x317   : > { %3606 = vmatpush.xpose.msrb.mxu3 %v3245_v17  ;;  %v3242_v41 = vadd.f32 %v2986_v46, %v2461_v49  ;;  %v2987_v50 = vsel %vm2722_vm4, %v4137_v18, 0.0  ;;  %v7006_v7 = vadd.s32 %v4099_v39, %v344_v57 }
 0x318   : > { %v2462_v10 = vadd.f32 %v2206_v63, %v1681_v53  ;;  %vm632_vm6 = vcmp.eq.s32.totalorder %v4150_v25, %v412_v19  ;;  %vm1157_vm7 = vcmp.eq.s32.totalorder %v4158_v30, %v412_v19  ;;  %vm1938_vm8 = vcmp.eq.s32.totalorder %v4166_v34, %v412_v19 }
 0x319   : > { %3546 = vmatpush.xpose.msrb.mxu0 %v3242_v41  ;;  %v897_v43 = vsel %vm632_vm6, %v4115_v1, 0.0  ;;  %v1422_v42 = vsel %vm1157_vm7, %v4123_v5, 0.0  ;;  %v2203_v54 = vsel %vm1938_vm8, %v4131_v12, 0.0  ;;  %vm2719_vm5 = vcmp.eq.s32.totalorder %v4174_v38, %v412_v19 }
 0x31a   : > { %v3243_v56 = vadd.f32 %v2987_v50, %v2462_v10  ;;  %v1678_v59 = vadd.f32 %v1422_v42, %v897_v43  ;;  %v2984_v39 = vsel %vm2719_vm5, %v4139_v20, 0.0  ;;  %vm633_vm10 = vcmp.eq.s32.totalorder %v4152_v27, %v412_v19 }
 0x31b   : > { %v898_v57 = vsel %vm633_vm10, %v4117_v2, 0.0  ;;  %vm1158_vm11 = vcmp.eq.s32.totalorder %v4160_v31, %v412_v19  ;;  %vm1939_vm12 = vcmp.eq.s32.totalorder %v4168_v35, %v412_v19  ;;  %vm2720_vm13 = vcmp.eq.s32.totalorder %v4176_v40, %v412_v19 }
 0x31c   : > { %3566 = vmatpush.xpose.msrb.mxu1 %v3243_v56  ;;  %v2459_v47 = vadd.f32 %v2203_v54, %v1678_v59  ;;  %v1423_v58 = vsel %vm1158_vm11, %v4125_v8, 0.0  ;;  %v2204_v45 = vsel %vm1939_vm12, %v4133_v13, 0.0  ;;  %v2985_v6 = vsel %vm2720_vm13, %v4141_v21, 0.0 }
 0x31d   : > { %v1679_v55 = vadd.f32 %v1423_v58, %v898_v57  ;;  %vm630_vm14 = vcmp.eq.s32.totalorder %v4146_v23, %v412_v19  ;;  %vm1155_vm15 = vcmp.eq.s32.totalorder %v4154_v28, %v412_v19  ;;  %vm1936_vm0 = vcmp.eq.s32.totalorder %v4162_v32, %v412_v19 }
 0x31e   : > { %v3240_v52 = vadd.f32 %v2984_v39, %v2459_v47  ;;  %v895_v22 = vsel %vm630_vm14, %v4111_v61, 0.0  ;;  %v1420_v51 = vsel %vm1155_vm15, %v4119_v3, 0.0  ;;  %v2201_v46 = vsel %vm1936_vm0, %v4127_v9, 0.0 }
 0x31f   : > { %v2460_v48 = vadd.f32 %v2204_v45, %v1679_v55  ;;  %v1676_v17 = vadd.f32 %v1420_v51, %v895_v22  ;;  %vm2717_vm1 = vcmp.eq.s32.totalorder %v4170_v36, %v412_v19  ;;  %vm631_vm2 = vcmp.eq.s32.totalorder %v4148_v24, %v412_v19 }
 0x320   : > { %3587 = vmatpush.xpose.msrb.mxu2 %v3240_v52  ;;  %v2982_v49 = vsel %vm2717_vm1, %v4135_v14, 0.0  ;;  %v896_v15 = vsel %vm631_vm2, %v4113_v0, 0.0  ;;  %vm1156_vm9 = vcmp.eq.s32.totalorder %v4156_v29, %v412_v19  ;;  %vm1937_vm3 = vcmp.eq.s32.totalorder %v4164_v33, %v412_v19 }
 0x321   : > { %v3241_v63 = vadd.f32 %v2985_v6, %v2460_v48  ;;  %v2457_v53 = vadd.f32 %v2201_v46, %v1676_v17  ;;  %v1421_v41 = vsel %vm1156_vm9, %v4121_v4, 0.0  ;;  %v2202_v50 = vsel %vm1937_vm3, %v4129_v11, 0.0 }
 0x322   : > { %v1677_v10 = vadd.f32 %v1421_v41, %v896_v15  ;;  %vm2718_vm4 = vcmp.eq.s32.totalorder %v4172_v37, %v412_v19  ;;  %vm628_vm6 = vcmp.eq.s32.totalorder %v4150_v25, %v7003_v26  ;;  %vm1153_vm7 = vcmp.eq.s32.totalorder %v4158_v30, %v7003_v26 }
 0x323   : > { %3607 = vmatpush.xpose.msrb.mxu3 %v3241_v63  ;;  %v3238_v43 = vadd.f32 %v2982_v49, %v2457_v53  ;;  %v2983_v42 = vsel %vm2718_vm4, %v4137_v18, 0.0  ;;  %v893_v54 = vsel %vm628_vm6, %v4115_v1, 0.0  ;;  %v1418_v56 = vsel %vm1153_vm7, %v4123_v5, 0.0 }
 0x324   : > { %v2458_v59 = vadd.f32 %v2202_v50, %v1677_v10  ;;  %v1674_v39 = vadd.f32 %v1418_v56, %v893_v54  ;;  %vm1934_vm8 = vcmp.eq.s32.totalorder %v4166_v34, %v7003_v26  ;;  %vm2715_vm5 = vcmp.eq.s32.totalorder %v4174_v38, %v7003_v26 }
 0x325   : > { %3547 = vmatpush.xpose.msrb.mxu0 %v3238_v43  ;;  %v2199_v19 = vsel %vm1934_vm8, %v4131_v12, 0.0  ;;  %v2980_v57 = vsel %vm2715_vm5, %v4139_v20, 0.0  ;;  %vm629_vm10 = vcmp.eq.s32.totalorder %v4152_v27, %v7003_v26  ;;  %vm1154_vm11 = vcmp.eq.s32.totalorder %v4160_v31, %v7003_v26 }
 0x326   : > { %v3239_v47 = vadd.f32 %v2983_v42, %v2458_v59  ;;  %v2455_v58 = vadd.f32 %v2199_v19, %v1674_v39  ;;  %v894_v45 = vsel %vm629_vm10, %v4117_v2, 0.0  ;;  %v1419_v6 = vsel %vm1154_vm11, %v4125_v8, 0.0 }
 0x327   : > { %v1675_v55 = vadd.f32 %v1419_v6, %v894_v45  ;;  %vm1935_vm12 = vcmp.eq.s32.totalorder %v4168_v35, %v7003_v26  ;;  %vm2716_vm13 = vcmp.eq.s32.totalorder %v4176_v40, %v7003_v26  ;;  %vm626_vm14 = vcmp.eq.s32.totalorder %v4146_v23, %v7003_v26 }
 0x328   : > { %3567 = vmatpush.xpose.msrb.mxu1 %v3239_v47  ;;  %v3236_v52 = vadd.f32 %v2980_v57, %v2455_v58  ;;  %v2200_v22 = vsel %vm1935_vm12, %v4133_v13, 0.0  ;;  %v2981_v51 = vsel %vm2716_vm13, %v4141_v21, 0.0  ;;  %v891_v46 = vsel %vm626_vm14, %v4111_v61, 0.0 }
 0x329   : > { %v2456_v48 = vadd.f32 %v2200_v22, %v1675_v55  ;;  %vm1151_vm15 = vcmp.eq.s32.totalorder %v4154_v28, %v7003_v26  ;;  %vm1932_vm0 = vcmp.eq.s32.totalorder %v4162_v32, %v7003_v26  ;;  %vm2713_vm1 = vcmp.eq.s32.totalorder %v4170_v36, %v7003_v26 }
 0x32a   : > { %3588 = vmatpush.xpose.msrb.mxu2 %v3236_v52  ;;  %v1416_v17 = vsel %vm1151_vm15, %v4119_v3, 0.0  ;;  %v2197_v49 = vsel %vm1932_vm0, %v4127_v9, 0.0  ;;  %v2978_v15 = vsel %vm2713_vm1, %v4135_v14, 0.0  ;;  %vm627_vm2 = vcmp.eq.s32.totalorder %v4148_v24, %v7003_v26 }
 0x32b   : > { %v3237_v63 = vadd.f32 %v2981_v51, %v2456_v48  ;;  %v1672_v53 = vadd.f32 %v1416_v17, %v891_v46  ;;  %v892_v41 = vsel %vm627_vm2, %v4113_v0, 0.0  ;;  %vm1152_vm9 = vcmp.eq.s32.totalorder %v4156_v29, %v7003_v26 }
 0x32c   : > { %v1417_v50 = vsel %vm1152_vm9, %v4121_v4, 0.0  ;;  %vm1933_vm3 = vcmp.eq.s32.totalorder %v4164_v33, %v7003_v26  ;;  %vm2714_vm4 = vcmp.eq.s32.totalorder %v4172_v37, %v7003_v26  ;;  %vm624_vm6 = vcmp.eq.s32.totalorder %v4150_v25, %v7006_v7 }
 0x32d   : > { %3608 = vmatpush.xpose.msrb.mxu3 %v3237_v63  ;;  %v2453_v10 = vadd.f32 %v2197_v49, %v1672_v53  ;;  %v1673_v43 = vadd.f32 %v1417_v50, %v892_v41  ;;  %v2198_v42 = vsel %vm1933_vm3, %v4129_v11, 0.0  ;;  %v2979_v54 = vsel %vm2714_vm4, %v4137_v18, 0.0 }
 0x32e   : > { %v889_v56 = vsel %vm624_vm6, %v4115_v1, 0.0  ;;  %vm1149_vm7 = vcmp.eq.s32.totalorder %v4158_v30, %v7006_v7  ;;  %vm1930_vm8 = vcmp.eq.s32.totalorder %v4166_v34, %v7006_v7  ;;  %vm2711_vm5 = vcmp.eq.s32.totalorder %v4174_v38, %v7006_v7 }
 0x32f   : > { %v3234_v26 = vadd.f32 %v2978_v15, %v2453_v10  ;;  %v2454_v25 = vadd.f32 %v2198_v42, %v1673_v43  ;;  %v1414_v59 = vsel %vm1149_vm7, %v4123_v5, 0.0  ;;  %v2195_v39 = vsel %vm1930_vm8, %v4131_v12, 0.0 }
 0x330   : > { %v1670_v19 = vadd.f32 %v1414_v59, %v889_v56  ;;  %v2976_v57 = vsel %vm2711_vm5, %v4139_v20, 0.0  ;;  %vm625_vm10 = vcmp.eq.s32.totalorder %v4152_v27, %v7006_v7  ;;  %vm1150_vm11 = vcmp.eq.s32.totalorder %v4160_v31, %v7006_v7 }
 0x331   : > { %3548 = vmatpush.xpose.msrb.mxu0 %v3234_v26  ;;  %v3235_v1 = vadd.f32 %v2979_v54, %v2454_v25  ;;  %v890_v30 = vsel %vm625_vm10, %v4117_v2, 0.0  ;;  %v1415_v34 = vsel %vm1150_vm11, %v4125_v8, 0.0  ;;  %vm1931_vm12 = vcmp.eq.s32.totalorder %v4168_v35, %v7006_v7 }
 0x332   : > { %v2451_v5 = vadd.f32 %v2195_v39, %v1670_v19  ;;  %v1671_v12 = vadd.f32 %v1415_v34, %v890_v30  ;;  %v2196_v38 = vsel %vm1931_vm12, %v4133_v13, 0.0  ;;  %vm2712_vm13 = vcmp.eq.s32.totalorder %v4176_v40, %v7006_v7 }
 0x333   : > { %3568 = vmatpush.xpose.msrb.mxu1 %v3235_v1  ;;  %v2977_v20 = vsel %vm2712_vm13, %v4141_v21, 0.0  ;;  %vm622_vm14 = vcmp.eq.s32.totalorder %v4146_v23, %v7006_v7  ;;  %vm1147_vm15 = vcmp.eq.s32.totalorder %v4154_v28, %v7006_v7  ;;  %vm1928_vm0 = vcmp.eq.s32.totalorder %v4162_v32, %v7006_v7 }
 0x334   : > { %v3232_v2 = vadd.f32 %v2976_v57, %v2451_v5  ;;  %v2452_v8 = vadd.f32 %v2196_v38, %v1671_v12  ;;  %v887_v27 = vsel %vm622_vm14, %v4111_v61, 0.0  ;;  %v1412_v31 = vsel %vm1147_vm15, %v4119_v3, 0.0 }
 0x335   : > { %v1668_v35 = vadd.f32 %v1412_v31, %v887_v27  ;;  %vm2709_vm1 = vcmp.eq.s32.totalorder %v4170_v36, %v7006_v7  ;;  %vm623_vm2 = vcmp.eq.s32.totalorder %v4148_v24, %v7006_v7  ;;  %v2193_v21 = vsel %vm1928_vm0, %v4127_v9, 0.0  ;;  %v3351_v36 = vpop.f32.mrf.mxu2 }
 0x336   : > { %3589 = vmatpush.xpose.msrb.mxu2 %v3232_v2  ;;  %v3233_v13 = vadd.f32 %v2977_v20, %v2452_v8  ;;  %v2974_v23 = vsel %vm2709_vm1, %v4135_v14, 0.0  ;;  %v888_v61 = vsel %vm623_vm2, %v4113_v0, 0.0  ;;  %vm1148_vm9 = vcmp.eq.s32.totalorder %v4156_v29, %v7006_v7 }
 0x337   : > { %v2449_v28 = vadd.f32 %v2193_v21, %v1668_v35  ;;  %vm1929_vm3 = vcmp.eq.s32.totalorder %v4164_v33, %v7006_v7  ;;  %vm2710_vm4 = vcmp.eq.s32.totalorder %v4172_v37, %v7006_v7  ;;  %v1413_v3 = vsel %vm1148_vm9, %v4121_v4, 0.0  ;;  %v3311_v33 = vpop.f32.mrf.mxu0  ;;  %v3331_v4 = vpop.f32.mrf.mxu1 }
 0x338   : > { %3609 = vmatpush.xpose.msrb.mxu3 %v3233_v13  ;;  %v2194_v24 = vsel %vm1929_vm3, %v4129_v11, 0.0  ;;  %v1669_v14 = vadd.f32 %v1413_v3, %v888_v61  ;;  %v2975_v0 = vsel %vm2710_vm4, %v4137_v18, 0.0  ;;  %v3371_v11 = vpop.f32.mrf.mxu3  ;;  %v3332_v52 = vadd.f32 %v3331_v4, %v3311_v33 }
 0x339   : > { %3590 = vmatmul.f32.vlgmr.msrb.gmra.mxu2 %v5570_v60  ;;  %v3230_v9 = vadd.f32 %v2974_v23, %v2449_v28  ;;  %vm3622_vm6 = vcmask 1041408   ;;  %vm3624_vm7 = vcmask 1045508   ;;  %vm3626_vm8 = vcmask 1043456  }
 0x33a   : > { %v2450_v32 = vadd.f32 %v2194_v24, %v1669_v14  ;;  %v3352_v49 = vadd.f32 %v3351_v36, %v3332_v52 }
 0x33b   : > { %3549 = vmatpush.xpose.msrb.mxu0 %v3230_v9  ;;  %3610 = vmatmul.f32.vlgmr.msrb.gmra.mxu3 %v5593_v62 }
 0x33c   : > { %v3231_v29 = vadd.f32 %v2975_v0, %v2450_v32  ;;  %v3372_v50 = vadd.f32 %v3371_v11, %v3352_v49 }
 0x33d   : > { %v3431_v60 = vpop.f32.mrf.mxu2 }
 0x33e   : > { %3550 = vmatmul.f32.vlgmr.msrb.gmra.mxu0 %v5616_v16  ;;  %3569 = vmatpush.xpose.msrb.mxu1 %v3231_v29 }
 0x33f   : > { %v3391_v37 = vpop.f32.mrf.mxu0  ;;  %v3411_v40 = vpop.f32.mrf.mxu1 }
 0x340   : > { %v3451_v7 = vpop.f32.mrf.mxu3  ;;  %v3412_v45 = vadd.f32 %v3411_v40, %v3391_v37 }
 0x341   : > { %3570 = vmatmul.f32.vlgmr.msrb.gmra.mxu1 %v5622_v44 }
 0x342   : > { %v3432_v16 = vadd.f32 %v3431_v60, %v3412_v45 }
 0x344   : > { %v3452_v46 = vadd.f32 %v3451_v7, %v3432_v16 }
 0x345   : > { %v3511_v58 = vpop.f32.mrf.mxu2 }
 0x346   : > { %v3619_v53 = vrot.slane %v3452_v46, 6 }
 0x347   : > { %v3471_v18 = vpop.f32.mrf.mxu0  ;;  %v3491_v47 = vpop.f32.mrf.mxu1 }
 0x348   : > { %v3531_v62 = vpop.f32.mrf.mxu3  ;;  %v3492_v6 = vadd.f32 %v3491_v47, %v3471_v18  ;;  %v3623_v42 = vsel %vm3622_vm6, %v3372_v50, %v3619_v53 }
 0x34a   : > { %v3512_v44 = vadd.f32 %v3511_v58, %v3492_v6 }
 0x34c   : > { %v3532_v15 = vadd.f32 %v3531_v62, %v3512_v44 }
 0x34e   : > { %v3620_v10 = vrot.slane %v3532_v15, 4 }
 0x3bb   : > { %v3551_v55 = vpop.f32.mrf.mxu0 }
 0x3bc   : > { %v3591_v51 = vpop.f32.mrf.mxu2 }
 0x3be   : > { %v3571_v22 = vpop.f32.mrf.mxu1  ;;  %v3611_v17 = vpop.f32.mrf.mxu3 }
 0x3bf   : > { %v3572_v48 = vadd.f32 %v3571_v22, %v3551_v55 }
 0x3c1   : > { %v3592_v63 = vadd.f32 %v3591_v51, %v3572_v48 }
 0x3c3   : > { %v3612_v41 = vadd.f32 %v3611_v17, %v3592_v63 }
 0x3c5   : > { %v3621_v43 = vrot.slane %v3612_v41, 2 }
 0x3c7   : > { %v3625_v54 = vsel %vm3624_vm7, %v3620_v10, %v3621_v43 }
 0x3c8   : > { %v3627_v56 = vsel %vm3626_vm8, %v3623_v42, %v3625_v54 }
 0x3c9   : > { %3630 = vst [vmem:[%s178_s24] sm:$0xff] %v3627_v56 }
 0x3ca   : > { %3926 = shalt.err (!%p3923_p7)
}
 0x3cb   : > { %3765 = dma.vmem_to_hbm [thread:$0]  (%p4045_p4), %s3646_s25, 128, %s3648_s26, %s3632_s12  }
 0x3cc PF: > { %p3782_p9 = scmp.ge.s32.totalorder %s3985_s14, 2  ;;  %s3659_s6 = sand.u32 1, %s3965_s9  }
 0x3cd   : > { %s3660_s7 = scalar_lea.sflag [#allocation4], %s3659_s6 }
 0x3ce   : > { %p3775_p10 = pnand %p3782_p9, %p4052_p8 }
 0x3d0   : > { %p3776_p11 = pneg %p3775_p10 }
 0x3d2   : > { %3960 = dma.done.wait (%p3776_p11), %s3660_s7, 128  }
 0x3d3   : > { %3962 = vsyncadd (%p3776_p11), %s3660_s7, 4294967168  ;;  %s17_s14 = sadd.s32 1, %s3985_s14   ;;  %s7186_s9 = smov %s3969_s10 }
 0x3d4   : > { %p14_p12 = scmp.ge.s32.totalorder %s17_s14, 4   ;;  %s7187_s10 = smov %s3973_s11 }
 0x3d5   : > { %s7188_s11 = smov %s4058_s22  ;;  %s7189_s12 = smov %s3981_s13 }
 0x3d6   : > { %s7190_s13 = smov %s7192_s17  ;;  %16 = sbr.rel (!%p14_p12) target bundleno = 6 (0x6), region = 80 }
 0x3db   :  { %3666 = vsyncpa [#allocation3], 1 }
 0x3dc   :  { %3668 = vsyncpa [#allocation3 + $0x1], 1 }
 0x3dd   :  { %3669 = vsyncpa [#allocation6], 1 }
 0x3de   :  { %3670 = vsyncpa [#allocation4], 1 }
 0x3df   :  { %3672 = vsyncpa [#allocation4 + $0x1], 1 }

</bundles_post_ra>
